<compile_context>
chip_gen: v7x
topology: tpu7x:2x2x1
jax: 0.10.0
libtpu: 0.0.40
codegen_flags: <defaults>
</compile_context>

<pallas_src>
import functools

import jax
import jax.numpy as jnp
import numpy as np
from jax.experimental import pallas as pl
from jax.experimental.pallas import tpu as pltpu


# ----------------------------- roll-direction calibration -----------------------------

_ROLL_SIGN_CACHE = "unset"


def _roll_sign():
    """Detect pltpu.roll's rotation convention once (returns +1 for np.roll semantics,
    -1 for the opposite direction, None if roll is unavailable -> jnp.roll fallback)."""
    global _ROLL_SIGN_CACHE
    if _ROLL_SIGN_CACHE != "unset":
        return _ROLL_SIGN_CACHE

    def _probe_kernel(o_ref):
        rows = jax.lax.broadcasted_iota(jnp.float32, (16, 128), 0).astype(jnp.bfloat16)
        o_ref[...] = pltpu.roll(rows, 1, axis=0)

    sign = None
    try:
        r = pl.pallas_call(
            _probe_kernel,
            out_shape=jax.ShapeDtypeStruct((16, 128), jnp.bfloat16),
        )()
        v = float(jax.device_get(r.astype(jnp.float32))[1, 0])
        if v == 0.0:          # result[1] == input[0]  -> np.roll convention
            sign = 1
        elif v == 2.0:        # result[1] == input[2]  -> opposite convention
            sign = -1
    except Exception:
        sign = None
    _ROLL_SIGN_CACHE = sign
    return sign


def _shift_rows(x, offset, roll_sign):
    """Return an array s.t. result[r] = x[r + offset] for in-range rows.
    Wrapped rows are garbage but are always zeroed by the caller's vy/vx masks."""
    if offset == 0:
        return x
    R = x.shape[0]
    if roll_sign is None:
        return jnp.roll(x, -offset, axis=0)              # slice+concat fallback
    return pltpu.roll(x, (-roll_sign * offset) % R, axis=0)


# ----------------------------- fused Pallas kernel -----------------------------

def _fused_bottleneck_kernel(x_ref, w1_ref, b1_ref, w2_ref, b2_ref, w3_ref, b3_ref,
                             o_ref, *, H, W, roll_sign):
    """One grid step processes `rows = images_per_step * H * W` pixels.

    x_ref : (rows, C)  bf16   flattened NHWC pixels (images contiguous)
    w1_ref: (C, P)     bf16   1x1 conv, BN1 scale folded in
    w2_ref: (9, P, P)  bf16   3x3 conv taps (dy*3+dx), BN2 scale folded in
    w3_ref: (P, C)     bf16   1x1 conv, BN3 scale folded in
    b*_ref: (1, *)     f32    folded BN biases
    o_ref : (rows, C)  bf16
    """
    R, C = x_ref.shape
    P = w1_ref.shape[1]

    xb = x_ref[...]                                                  # (R, C) bf16

    # ---- conv1 (1x1) + folded BN + ReLU, single cast to bf16 for the 3x3 taps ----
    h1 = jnp.dot(xb, w1_ref[...], preferred_element_type=jnp.float32)
    h1b = jnp.maximum(h1 + b1_ref[...], 0.0).astype(jnp.bfloat16)    # (R, P)

    # validity masks for taps that would cross an image-row / image boundary
    r_idx = jax.lax.broadcasted_iota(jnp.int32, (R, 1), 0)
    x_in_row = r_idx % W                 # x position within the image row
    r_in_img = r_idx % (H * W)           # y*W + x position within the image
    vy = {0: r_in_img >= W, 1: None, 2: r_in_img < (H - 1) * W}
    vx = {0: x_in_row > 0, 1: None, 2: x_in_row < (W - 1)}

    # ---- conv2 (3x3, stride 1, pad 1): nine taps, each a row-rolled copy of h1
    #      (XLU), out-of-image / wrapped rows masked, f32 MXU accumulation.  The
    #      accumulator is seeded with the folded BN2 bias. ----
    zero_bf16 = jnp.zeros((), jnp.bfloat16)
    acc = None
    for dy in range(3):
        for dx in range(3):
            off = (dy - 1) * W + (dx - 1)                 # static row offset of the tap
            slab = _shift_rows(h1b, off, roll_sign)       # (R, P) bf16
            mask = vy[dy]
            if vx[dx] is not None:
                mask = vx[dx] if mask is None else jnp.logical_and(mask, vx[dx])
            if mask is not None:
                slab = jnp.where(mask, slab, zero_bf16)
            d = jnp.dot(slab, w2_ref[dy * 3 + dx], preferred_element_type=jnp.float32)
            acc = (d + b2_ref[...]) if acc is None else (acc + d)
    h2 = jnp.maximum(acc, 0.0).astype(jnp.bfloat16)                  # (R, P) bf16

    # ---- conv3 (1x1) + folded BN + residual add + final ReLU, bf16 writeback ----
    y = jnp.dot(h2, w3_ref[...], preferred_element_type=jnp.float32)
    y = y + b3_ref[...] + xb.astype(jnp.float32)
    o_ref[...] = jnp.maximum(y, 0.0).astype(o_ref.dtype)


# ----------------------------- tiling / VMEM policy -----------------------------

def _round_up(a, b):
    return (a + b - 1) // b * b


def _tpu_vmem_capacity():
    try:
        return int(pltpu.get_tpu_info().vmem_capacity_bytes)
    except Exception:
        return 128 * 2 ** 20          # v5e / v6e default


def _target_rows(vmem_cap, C):
    # v7x: 64 MiB VMEM per TensorCore -> smaller row tiles; v5e/v6e: 128 MiB -> larger
    # tiles to amortize per-step overhead (these kernels are mostly HBM-bound there).
    base = 1024 if vmem_cap <= 80 * 2 ** 20 else 4096
    # keep the streaming in/out blocks (double-buffered bf16 in + out) within ~1/3 VMEM
    budget = (vmem_cap // 3) // max(1, 8 * C)
    return max(256, min(base, budget))


def _choose_images_per_step(N, H, W, target_rows, min_steps=4):
    """Pick images-per-step so that rows = ips*H*W is sublane friendly, the grid has
    >= min_steps iterations when divisors allow, and rows stays near target_rows."""
    hw = H * W
    divisors = [d for d in range(1, N + 1) if N % d == 0]
    cand = divisors
    for align in (16, 8):
        ok = [d for d in divisors if (d * hw) % align == 0]
        if ok:
            cand = ok
            break
    pref = ([d for d in cand if N // d >= min_steps]
            or [d for d in cand if N // d >= 2]
            or cand)
    fit = [d for d in pref if d * hw <= target_rows]
    return max(fit) if fit else min(pref)


def _vmem_limit_bytes(rows, C, P, vmem_cap):
    def padded(r, c, itemsize):
        sub = 8 if itemsize >= 4 else 16
        return _round_up(max(r, 1), sub) * _round_up(max(c, 1), 128) * itemsize

    est = 2 * padded(rows, C, 2)                      # x blocks (bf16, double-buffered)
    est += 2 * padded(rows, C, 2)                     # out blocks (bf16)
    est += 2 * (padded(C, P, 2) + 9 * padded(P, P, 2) + padded(P, C, 2)
                + 2 * padded(1, P, 4) + padded(1, C, 4))
    # live intermediates: h1 f32, h1 bf16, acc f32, rolled slab bf16, y f32
    est += 2 * padded(rows, P, 4) + 2 * padded(rows, P, 2) + padded(rows, C, 4)
    est = int(1.5 * est)                              # spill / relayout headroom
    cap = min(int(0.6 * vmem_cap), 100 * 2 ** 20)
    return int(max(24 * 2 ** 20, min(est, cap)))


def _const_spec(shape):
    n = len(shape)
    return pl.BlockSpec(shape, lambda i, n=n: (0,) * n)


# ----------------------------- parameters -----------------------------

def init_params(key, inplanes, planes, expansion=4):
    outplanes = planes * expansion
    ks = jax.random.split(key, 9)

    def bn_fold(kg, kb, c):
        gamma = jax.random.uniform(kg, (c,), jnp.float32, 0.5, 1.5)
        beta = 0.1 * jax.random.normal(kb, (c,), jnp.float32)
        running_mean = jnp.zeros((c,), jnp.float32)   # inference-mode running stats
        running_var = jnp.ones((c,), jnp.float32)
        scale = gamma * jax.lax.rsqrt(running_var + 1e-5)
        bias = beta - running_mean * scale
        return scale, bias

    w1 = 0.2 * jax.random.normal(ks[0], (inplanes, planes), jnp.float32)        # 1x1
    s1, b1 = bn_fold(ks[1], ks[2], planes)
    w2 = 0.2 * jax.random.normal(ks[3], (3, 3, planes, planes), jnp.float32)    # 3x3 HWIO
    s2, b2 = bn_fold(ks[4], ks[5], planes)
    w3 = 0.2 * jax.random.normal(ks[6], (planes, outplanes), jnp.float32)       # 1x1
    s3, b3 = bn_fold(ks[7], ks[8], outplanes)
    return dict(w1=w1, s1=s1, b1=b1, w2=w2, s2=s2, b2=b2, w3=w3, s3=s3, b3=b3)


def fold_params(params):
    """Fold the BN scale into the conv weights (host side) and cast weights to bf16."""
    return dict(
        w1=(params["w1"] * params["s1"][None, :]).astype(jnp.bfloat16),
        b1=params["b1"].astype(jnp.float32),
        w2=(params["w2"] * params["s2"][None, None, None, :]).astype(jnp.bfloat16),
        b2=params["b2"].astype(jnp.float32),
        w3=(params["w3"] * params["s3"][None, :]).astype(jnp.bfloat16),
        b3=params["b3"].astype(jnp.float32),
    )


# ----------------------------- forward -----------------------------

def anis_bottleneck_forward(x_group, params, images_per_step=None):
    """x_group: [G, B, C, H, W] — the PyTorch list of NCHW tensors stacked on axis 0.
    Returns bf16 (kernel writes back bf16 to halve HBM traffic)."""
    Gd, B, C, H, W = x_group.shape
    N = Gd * B
    fp = fold_params(params)
    P = fp["w1"].shape[1]
    Cout = fp["w3"].shape[1]
    assert Cout == C, "residual path with downsample=None needs inplanes == planes*expansion"

    # boundary glue: NCHW -> NHWC, bf16 activations, flatten pixels to rows
    x_nhwc = jnp.transpose(x_group.reshape(N, C, H, W), (0, 2, 3, 1))
    x2d = x_nhwc.reshape(N * H * W, C).astype(jnp.bfloat16)

    vmem_cap = _tpu_vmem_capacity()
    target_rows = _target_rows(vmem_cap, C)
    ips = images_per_step or _choose_images_per_step(N, H, W, target_rows)
    rows = ips * H * W
    total_rows = N * H * W
    assert total_rows % rows == 0
    grid = (total_rows // rows,)

    w2taps = fp["w2"].reshape(9, P, P)                 # (ky*3+kx, in, out)
    b1 = fp["b1"].reshape(1, P)
    b2 = fp["b2"].reshape(1, P)
    b3 = fp["b3"].reshape(1, Cout)

    kernel = functools.partial(_fused_bottleneck_kernel, H=H, W=W, roll_sign=_roll_sign())

    out2d = pl.pallas_call(
        kernel,
        out_shape=jax.ShapeDtypeStruct((total_rows, Cout), jnp.bfloat16),
        grid=grid,
        in_specs=[
            pl.BlockSpec((rows, C), lambda i: (i, 0)),     # x (rows of pixels)
            _const_spec((C, P)),                           # w1
            _const_spec((1, P)),                           # b1
            _const_spec((9, P, P)),                        # w2 taps
            _const_spec((1, P)),                           # b2
            _const_spec((P, Cout)),                        # w3
            _const_spec((1, Cout)),                        # b3
        ],
        out_specs=pl.BlockSpec((rows, Cout), lambda i: (i, 0)),
        compiler_params=pltpu.CompilerParams(
            dimension_semantics=("parallel",),
            vmem_limit_bytes=_vmem_limit_bytes(rows, C, P, vmem_cap)),
    )(x2d, fp["w1"], b1, w2taps, b2, fp["w3"], b3)

    out = out2d.reshape(N, H, W, Cout).transpose(0, 3, 1, 2)
    return out.reshape(Gd, B, Cout, H, W)


# ----------------------------- reference -----------------------------

def reference_forward(x_group, params):
    """Pure-JAX reference using the same folded bf16 weights / bf16 activation casts
    (f32 accumulation), so it checks the kernel's mixed-precision math exactly."""
    Gd, B, C, H, W = x_group.shape
    fp = fold_params(params)
    hi = jax.lax.Precision.HIGHEST

    x = jnp.transpose(x_group.reshape(Gd * B, C, H, W), (0, 2, 3, 1))
    xb = x.astype(jnp.bfloat16).astype(jnp.float32)
    w1 = fp["w1"].astype(jnp.float32)
    w2 = fp["w2"].astype(jnp.float32)
    w3 = fp["w3"].astype(jnp.float32)

    h = jnp.einsum("nhwc,cp->nhwp", xb, w1, precision=hi) + fp["b1"]
    h = jnp.maximum(h, 0.0).astype(jnp.bfloat16).astype(jnp.float32)
    h = jax.lax.conv_general_dilated(h, w2, (1, 1), ((1, 1), (1, 1)),
                                     dimension_numbers=("NHWC", "HWIO", "NHWC"),
                                     precision=hi) + fp["b2"]
    h = jnp.maximum(h, 0.0).astype(jnp.bfloat16).astype(jnp.float32)
    h = jnp.einsum("nhwp,pc->nhwc", h, w3, precision=hi) + fp["b3"]
    out = jnp.maximum(h + xb, 0.0)
    return jnp.transpose(out, (0, 3, 1, 2)).reshape(Gd, B, C, H, W)


# ----------------------------- test -----------------------------

if __name__ == "__main__":
    Gd, B = 2, 2                # group size (list length), batch per element
    planes = 4
    inplanes = planes * 4       # 16 — so the identity path matches conv3 output
    H = W = 16

    key = jax.random.PRNGKey(0)
    kx, kp = jax.random.split(key)
    x_group = jax.random.normal(kx, (Gd, B, inplanes, H, W), jnp.float32)
    params = init_params(kp, inplanes, planes)

    out = jax.block_until_ready(anis_bottleneck_forward(x_group, params))
    ref = jax.block_until_ready(reference_forward(x_group, params))

    # the kernel writes back bf16; quantize the f32 reference the same way before comparing
    out_f = np.asarray(out.astype(jnp.float32))
    ref_q = np.asarray(jnp.asarray(ref, jnp.bfloat16).astype(jnp.float32))
    np.testing.assert_allclose(out_f, ref_q, rtol=2e-2, atol=2e-2)
    print("KERNEL_OK")
</pallas_src>

<mosaic_0001>
module attributes {stable_mosaic.version = 11 : i64} {
  func.func @_fused_bottleneck_kernel(%arg0: i32, %arg1: memref<256x16xbf16, #tpu.memory_space<vmem>>, %arg2: memref<16x4xbf16, #tpu.memory_space<vmem>>, %arg3: memref<1x4xf32, #tpu.memory_space<vmem>>, %arg4: memref<9x4x4xbf16, #tpu.memory_space<vmem>>, %arg5: memref<1x4xf32, #tpu.memory_space<vmem>>, %arg6: memref<4x16xbf16, #tpu.memory_space<vmem>>, %arg7: memref<1x16xf32, #tpu.memory_space<vmem>>, %arg8: memref<256x16xbf16, #tpu.memory_space<vmem>>) attributes {dimension_semantics = [#tpu.dimension_semantics<parallel>], iteration_bounds = array<i64: 4>, scalar_prefetch = 0 : i64, scratch_operands = 0 : i64, tpu.core_type = #tpu.core_type<tc>, window_params = [{transform_indices = @transform_0, window_bounds = array<i64: 256, 16>}, {pipeline_mode = #tpu.pipeline_mode<synchronous>, transform_indices = @transform_1, window_bounds = array<i64: 16, 4>}, {pipeline_mode = #tpu.pipeline_mode<synchronous>, transform_indices = @transform_2, window_bounds = array<i64: 1, 4>}, {pipeline_mode = #tpu.pipeline_mode<synchronous>, transform_indices = @transform_3, window_bounds = array<i64: 9, 4, 4>}, {pipeline_mode = #tpu.pipeline_mode<synchronous>, transform_indices = @transform_4, window_bounds = array<i64: 1, 4>}, {pipeline_mode = #tpu.pipeline_mode<synchronous>, transform_indices = @transform_5, window_bounds = array<i64: 4, 16>}, {pipeline_mode = #tpu.pipeline_mode<synchronous>, transform_indices = @transform_6, window_bounds = array<i64: 1, 16>}, {transform_indices = @transform_7, window_bounds = array<i64: 256, 16>}]} {
    %c0 = arith.constant 0 : index
    %c0_0 = arith.constant 0 : index
    %0 = vector.load %arg1[%c0, %c0_0] : memref<256x16xbf16, #tpu.memory_space<vmem>>, vector<256x16xbf16>
    %c0_1 = arith.constant 0 : index
    %c0_2 = arith.constant 0 : index
    %1 = vector.load %arg2[%c0_1, %c0_2] : memref<16x4xbf16, #tpu.memory_space<vmem>>, vector<16x4xbf16>
    %cst = arith.constant dense<0.000000e+00> : vector<256x4xf32>
    %2 = tpu.matmul %0, %1, %cst {dimension_numbers = #tpu.dot_dimension_numbers<[1], [0], [0], [1], [0, 0, 1, 1], [], []>} : vector<256x16xbf16>, vector<16x4xbf16>, vector<256x4xf32> -> vector<256x4xf32>
    %c0_3 = arith.constant 0 : index
    %c0_4 = arith.constant 0 : index
    %3 = vector.load %arg3[%c0_3, %c0_4] : memref<1x4xf32, #tpu.memory_space<vmem>>, vector<1x4xf32>
    %4 = vector.broadcast %3 : vector<1x4xf32> to vector<256x4xf32>
    %5 = arith.addf %2, %4 : vector<256x4xf32>
    %cst_5 = arith.constant 0.000000e+00 : f32
    %6 = vector.broadcast %cst_5 : f32 to vector<256x4xf32>
    %7 = arith.maximumf %5, %6 : vector<256x4xf32>
    %8 = arith.truncf %7 : vector<256x4xf32> to vector<256x4xbf16>
    %9 = tpu.iota {dimensions = array<i32: 0>} : vector<256x1xi32>
    %c16_i32 = arith.constant 16 : i32
    %c0_i32 = arith.constant 0 : i32
    %10 = arith.cmpi eq, %c16_i32, %c0_i32 : i32
    %c1_i32 = arith.constant 1 : i32
    %11 = arith.select %10, %c1_i32, %c16_i32 : i32
    %12 = vector.broadcast %11 : i32 to vector<256x1xi32>
    %13 = arith.remsi %9, %12 : vector<256x1xi32>
    %c0_i32_6 = arith.constant 0 : i32
    %14 = vector.broadcast %c0_i32_6 : i32 to vector<256x1xi32>
    %15 = arith.cmpi ne, %13, %14 : vector<256x1xi32>
    %c0_i32_7 = arith.constant 0 : i32
    %16 = vector.broadcast %c0_i32_7 : i32 to vector<256x1xi32>
    %17 = arith.cmpi slt, %13, %16 : vector<256x1xi32>
    %c0_i32_8 = arith.constant 0 : i32
    %18 = arith.cmpi slt, %11, %c0_i32_8 : i32
    %19 = vector.broadcast %18 : i1 to vector<256x1xi1>
    %20 = vector.broadcast %19 : vector<256x1xi1> to vector<256x1xi1>
    %21 = arith.xori %17, %20 : vector<256x1xi1>
    %22 = arith.andi %21, %15 : vector<256x1xi1>
    %23 = vector.broadcast %11 : i32 to vector<256x1xi32>
    %24 = arith.addi %13, %23 : vector<256x1xi32>
    %25 = arith.select %22, %24, %13 : vector<256x1xi1>, vector<256x1xi32>
    %c256_i32 = arith.constant 256 : i32
    %c0_i32_9 = arith.constant 0 : i32
    %26 = arith.cmpi eq, %c256_i32, %c0_i32_9 : i32
    %c1_i32_10 = arith.constant 1 : i32
    %27 = arith.select %26, %c1_i32_10, %c256_i32 : i32
    %28 = vector.broadcast %27 : i32 to vector<256x1xi32>
    %29 = arith.remsi %9, %28 : vector<256x1xi32>
    %c0_i32_11 = arith.constant 0 : i32
    %30 = vector.broadcast %c0_i32_11 : i32 to vector<256x1xi32>
    %31 = arith.cmpi ne, %29, %30 : vector<256x1xi32>
    %c0_i32_12 = arith.constant 0 : i32
    %32 = vector.broadcast %c0_i32_12 : i32 to vector<256x1xi32>
    %33 = arith.cmpi slt, %29, %32 : vector<256x1xi32>
    %c0_i32_13 = arith.constant 0 : i32
    %34 = arith.cmpi slt, %27, %c0_i32_13 : i32
    %35 = vector.broadcast %34 : i1 to vector<256x1xi1>
    %36 = vector.broadcast %35 : vector<256x1xi1> to vector<256x1xi1>
    %37 = arith.xori %33, %36 : vector<256x1xi1>
    %38 = arith.andi %37, %31 : vector<256x1xi1>
    %39 = vector.broadcast %27 : i32 to vector<256x1xi32>
    %40 = arith.addi %29, %39 : vector<256x1xi32>
    %41 = arith.select %38, %40, %29 : vector<256x1xi1>, vector<256x1xi32>
    %c16_i32_14 = arith.constant 16 : i32
    %42 = vector.broadcast %c16_i32_14 : i32 to vector<256x1xi32>
    %43 = arith.cmpi sge, %41, %42 : vector<256x1xi32>
    %c240_i32 = arith.constant 240 : i32
    %44 = vector.broadcast %c240_i32 : i32 to vector<256x1xi32>
    %45 = arith.cmpi slt, %41, %44 : vector<256x1xi32>
    %c0_i32_15 = arith.constant 0 : i32
    %46 = vector.broadcast %c0_i32_15 : i32 to vector<256x1xi32>
    %47 = arith.cmpi sgt, %25, %46 : vector<256x1xi32>
    %c15_i32 = arith.constant 15 : i32
    %48 = vector.broadcast %c15_i32 : i32 to vector<256x1xi32>
    %49 = arith.cmpi slt, %25, %48 : vector<256x1xi32>
    %50 = vector.extract_strided_slice %8 {offsets = [239, 0], sizes = [17, 4], strides = [1, 1]} : vector<256x4xbf16> to vector<17x4xbf16>
    %51 = vector.extract_strided_slice %8 {offsets = [0, 0], sizes = [239, 4], strides = [1, 1]} : vector<256x4xbf16> to vector<239x4xbf16>
    %52 = tpu.concatenate %50, %51 in 0 : vector<17x4xbf16>, vector<239x4xbf16> -> vector<256x4xbf16>
    %53 = arith.andi %43, %47 : vector<256x1xi1>
    %cst_16 = arith.constant 0.000000e+00 : bf16
    %54 = vector.shape_cast %53 : vector<256x1xi1> to vector<256x1xi1>
    %55 = vector.broadcast %54 : vector<256x1xi1> to vector<256x4xi1>
    %56 = vector.broadcast %cst_16 : bf16 to vector<256x4xbf16>
    %57 = arith.select %55, %52, %56 : vector<256x4xi1>, vector<256x4xbf16>
    %c0_17 = arith.constant 0 : index
    %c0_18 = arith.constant 0 : index
    %c0_19 = arith.constant 0 : index
    %58 = vector.load %arg4[%c0_17, %c0_18, %c0_19] : memref<9x4x4xbf16, #tpu.memory_space<vmem>>, vector<1x4x4xbf16>
    %59 = vector.shape_cast %58 : vector<1x4x4xbf16> to vector<4x4xbf16>
    %cst_20 = arith.constant dense<0.000000e+00> : vector<256x4xf32>
    %60 = tpu.matmul %57, %59, %cst_20 {dimension_numbers = #tpu.dot_dimension_numbers<[1], [0], [0], [1], [0, 0, 1, 1], [], []>} : vector<256x4xbf16>, vector<4x4xbf16>, vector<256x4xf32> -> vector<256x4xf32>
    %c0_21 = arith.constant 0 : index
    %c0_22 = arith.constant 0 : index
    %61 = vector.load %arg5[%c0_21, %c0_22] : memref<1x4xf32, #tpu.memory_space<vmem>>, vector<1x4xf32>
    %62 = vector.broadcast %61 : vector<1x4xf32> to vector<256x4xf32>
    %63 = arith.addf %60, %62 : vector<256x4xf32>
    %64 = vector.extract_strided_slice %8 {offsets = [240, 0], sizes = [16, 4], strides = [1, 1]} : vector<256x4xbf16> to vector<16x4xbf16>
    %65 = vector.extract_strided_slice %8 {offsets = [0, 0], sizes = [240, 4], strides = [1, 1]} : vector<256x4xbf16> to vector<240x4xbf16>
    %66 = tpu.concatenate %64, %65 in 0 : vector<16x4xbf16>, vector<240x4xbf16> -> vector<256x4xbf16>
    %cst_23 = arith.constant 0.000000e+00 : bf16
    %67 = vector.shape_cast %43 : vector<256x1xi1> to vector<256x1xi1>
    %68 = vector.broadcast %67 : vector<256x1xi1> to vector<256x4xi1>
    %69 = vector.broadcast %cst_23 : bf16 to vector<256x4xbf16>
    %70 = arith.select %68, %66, %69 : vector<256x4xi1>, vector<256x4xbf16>
    %c1 = arith.constant 1 : index
    %c0_24 = arith.constant 0 : index
    %c0_25 = arith.constant 0 : index
    %71 = vector.load %arg4[%c1, %c0_24, %c0_25] : memref<9x4x4xbf16, #tpu.memory_space<vmem>>, vector<1x4x4xbf16>
    %72 = vector.shape_cast %71 : vector<1x4x4xbf16> to vector<4x4xbf16>
    %cst_26 = arith.constant dense<0.000000e+00> : vector<256x4xf32>
    %73 = tpu.matmul %70, %72, %cst_26 {dimension_numbers = #tpu.dot_dimension_numbers<[1], [0], [0], [1], [0, 0, 1, 1], [], []>} : vector<256x4xbf16>, vector<4x4xbf16>, vector<256x4xf32> -> vector<256x4xf32>
    %74 = arith.addf %63, %73 : vector<256x4xf32>
    %75 = vector.extract_strided_slice %8 {offsets = [241, 0], sizes = [15, 4], strides = [1, 1]} : vector<256x4xbf16> to vector<15x4xbf16>
    %76 = vector.extract_strided_slice %8 {offsets = [0, 0], sizes = [241, 4], strides = [1, 1]} : vector<256x4xbf16> to vector<241x4xbf16>
    %77 = tpu.concatenate %75, %76 in 0 : vector<15x4xbf16>, vector<241x4xbf16> -> vector<256x4xbf16>
    %78 = arith.andi %43, %49 : vector<256x1xi1>
    %cst_27 = arith.constant 0.000000e+00 : bf16
    %79 = vector.shape_cast %78 : vector<256x1xi1> to vector<256x1xi1>
    %80 = vector.broadcast %79 : vector<256x1xi1> to vector<256x4xi1>
    %81 = vector.broadcast %cst_27 : bf16 to vector<256x4xbf16>
    %82 = arith.select %80, %77, %81 : vector<256x4xi1>, vector<256x4xbf16>
    %c2 = arith.constant 2 : index
    %c0_28 = arith.constant 0 : index
    %c0_29 = arith.constant 0 : index
    %83 = vector.load %arg4[%c2, %c0_28, %c0_29] : memref<9x4x4xbf16, #tpu.memory_space<vmem>>, vector<1x4x4xbf16>
    %84 = vector.shape_cast %83 : vector<1x4x4xbf16> to vector<4x4xbf16>
    %cst_30 = arith.constant dense<0.000000e+00> : vector<256x4xf32>
    %85 = tpu.matmul %82, %84, %cst_30 {dimension_numbers = #tpu.dot_dimension_numbers<[1], [0], [0], [1], [0, 0, 1, 1], [], []>} : vector<256x4xbf16>, vector<4x4xbf16>, vector<256x4xf32> -> vector<256x4xf32>
    %86 = arith.addf %74, %85 : vector<256x4xf32>
    %87 = vector.extract_strided_slice %8 {offsets = [255, 0], sizes = [1, 4], strides = [1, 1]} : vector<256x4xbf16> to vector<1x4xbf16>
    %88 = vector.extract_strided_slice %8 {offsets = [0, 0], sizes = [255, 4], strides = [1, 1]} : vector<256x4xbf16> to vector<255x4xbf16>
    %89 = tpu.concatenate %87, %88 in 0 : vector<1x4xbf16>, vector<255x4xbf16> -> vector<256x4xbf16>
    %cst_31 = arith.constant 0.000000e+00 : bf16
    %90 = vector.shape_cast %47 : vector<256x1xi1> to vector<256x1xi1>
    %91 = vector.broadcast %90 : vector<256x1xi1> to vector<256x4xi1>
    %92 = vector.broadcast %cst_31 : bf16 to vector<256x4xbf16>
    %93 = arith.select %91, %89, %92 : vector<256x4xi1>, vector<256x4xbf16>
    %c3 = arith.constant 3 : index
    %c0_32 = arith.constant 0 : index
    %c0_33 = arith.constant 0 : index
    %94 = vector.load %arg4[%c3, %c0_32, %c0_33] : memref<9x4x4xbf16, #tpu.memory_space<vmem>>, vector<1x4x4xbf16>
    %95 = vector.shape_cast %94 : vector<1x4x4xbf16> to vector<4x4xbf16>
    %cst_34 = arith.constant dense<0.000000e+00> : vector<256x4xf32>
    %96 = tpu.matmul %93, %95, %cst_34 {dimension_numbers = #tpu.dot_dimension_numbers<[1], [0], [0], [1], [0, 0, 1, 1], [], []>} : vector<256x4xbf16>, vector<4x4xbf16>, vector<256x4xf32> -> vector<256x4xf32>
    %97 = arith.addf %86, %96 : vector<256x4xf32>
    %c4 = arith.constant 4 : index
    %c0_35 = arith.constant 0 : index
    %c0_36 = arith.constant 0 : index
    %98 = vector.load %arg4[%c4, %c0_35, %c0_36] : memref<9x4x4xbf16, #tpu.memory_space<vmem>>, vector<1x4x4xbf16>
    %99 = vector.shape_cast %98 : vector<1x4x4xbf16> to vector<4x4xbf16>
    %cst_37 = arith.constant dense<0.000000e+00> : vector<256x4xf32>
    %100 = tpu.matmul %8, %99, %cst_37 {dimension_numbers = #tpu.dot_dimension_numbers<[1], [0], [0], [1], [0, 0, 1, 1], [], []>} : vector<256x4xbf16>, vector<4x4xbf16>, vector<256x4xf32> -> vector<256x4xf32>
    %101 = arith.addf %97, %100 : vector<256x4xf32>
    %102 = vector.extract_strided_slice %8 {offsets = [1, 0], sizes = [255, 4], strides = [1, 1]} : vector<256x4xbf16> to vector<255x4xbf16>
    %103 = vector.extract_strided_slice %8 {offsets = [0, 0], sizes = [1, 4], strides = [1, 1]} : vector<256x4xbf16> to vector<1x4xbf16>
    %104 = tpu.concatenate %102, %103 in 0 : vector<255x4xbf16>, vector<1x4xbf16> -> vector<256x4xbf16>
    %cst_38 = arith.constant 0.000000e+00 : bf16
    %105 = vector.shape_cast %49 : vector<256x1xi1> to vector<256x1xi1>
    %106 = vector.broadcast %105 : vector<256x1xi1> to vector<256x4xi1>
    %107 = vector.broadcast %cst_38 : bf16 to vector<256x4xbf16>
    %108 = arith.select %106, %104, %107 : vector<256x4xi1>, vector<256x4xbf16>
    %c5 = arith.constant 5 : index
    %c0_39 = arith.constant 0 : index
    %c0_40 = arith.constant 0 : index
    %109 = vector.load %arg4[%c5, %c0_39, %c0_40] : memref<9x4x4xbf16, #tpu.memory_space<vmem>>, vector<1x4x4xbf16>
    %110 = vector.shape_cast %109 : vector<1x4x4xbf16> to vector<4x4xbf16>
    %cst_41 = arith.constant dense<0.000000e+00> : vector<256x4xf32>
    %111 = tpu.matmul %108, %110, %cst_41 {dimension_numbers = #tpu.dot_dimension_numbers<[1], [0], [0], [1], [0, 0, 1, 1], [], []>} : vector<256x4xbf16>, vector<4x4xbf16>, vector<256x4xf32> -> vector<256x4xf32>
    %112 = arith.addf %101, %111 : vector<256x4xf32>
    %113 = vector.extract_strided_slice %8 {offsets = [15, 0], sizes = [241, 4], strides = [1, 1]} : vector<256x4xbf16> to vector<241x4xbf16>
    %114 = vector.extract_strided_slice %8 {offsets = [0, 0], sizes = [15, 4], strides = [1, 1]} : vector<256x4xbf16> to vector<15x4xbf16>
    %115 = tpu.concatenate %113, %114 in 0 : vector<241x4xbf16>, vector<15x4xbf16> -> vector<256x4xbf16>
    %116 = arith.andi %45, %47 : vector<256x1xi1>
    %cst_42 = arith.constant 0.000000e+00 : bf16
    %117 = vector.shape_cast %116 : vector<256x1xi1> to vector<256x1xi1>
    %118 = vector.broadcast %117 : vector<256x1xi1> to vector<256x4xi1>
    %119 = vector.broadcast %cst_42 : bf16 to vector<256x4xbf16>
    %120 = arith.select %118, %115, %119 : vector<256x4xi1>, vector<256x4xbf16>
    %c6 = arith.constant 6 : index
    %c0_43 = arith.constant 0 : index
    %c0_44 = arith.constant 0 : index
    %121 = vector.load %arg4[%c6, %c0_43, %c0_44] : memref<9x4x4xbf16, #tpu.memory_space<vmem>>, vector<1x4x4xbf16>
    %122 = vector.shape_cast %121 : vector<1x4x4xbf16> to vector<4x4xbf16>
    %cst_45 = arith.constant dense<0.000000e+00> : vector<256x4xf32>
    %123 = tpu.matmul %120, %122, %cst_45 {dimension_numbers = #tpu.dot_dimension_numbers<[1], [0], [0], [1], [0, 0, 1, 1], [], []>} : vector<256x4xbf16>, vector<4x4xbf16>, vector<256x4xf32> -> vector<256x4xf32>
    %124 = arith.addf %112, %123 : vector<256x4xf32>
    %125 = vector.extract_strided_slice %8 {offsets = [16, 0], sizes = [240, 4], strides = [1, 1]} : vector<256x4xbf16> to vector<240x4xbf16>
    %126 = vector.extract_strided_slice %8 {offsets = [0, 0], sizes = [16, 4], strides = [1, 1]} : vector<256x4xbf16> to vector<16x4xbf16>
    %127 = tpu.concatenate %125, %126 in 0 : vector<240x4xbf16>, vector<16x4xbf16> -> vector<256x4xbf16>
    %cst_46 = arith.constant 0.000000e+00 : bf16
    %128 = vector.shape_cast %45 : vector<256x1xi1> to vector<256x1xi1>
    %129 = vector.broadcast %128 : vector<256x1xi1> to vector<256x4xi1>
    %130 = vector.broadcast %cst_46 : bf16 to vector<256x4xbf16>
    %131 = arith.select %129, %127, %130 : vector<256x4xi1>, vector<256x4xbf16>
    %c7 = arith.constant 7 : index
    %c0_47 = arith.constant 0 : index
    %c0_48 = arith.constant 0 : index
    %132 = vector.load %arg4[%c7, %c0_47, %c0_48] : memref<9x4x4xbf16, #tpu.memory_space<vmem>>, vector<1x4x4xbf16>
    %133 = vector.shape_cast %132 : vector<1x4x4xbf16> to vector<4x4xbf16>
    %cst_49 = arith.constant dense<0.000000e+00> : vector<256x4xf32>
    %134 = tpu.matmul %131, %133, %cst_49 {dimension_numbers = #tpu.dot_dimension_numbers<[1], [0], [0], [1], [0, 0, 1, 1], [], []>} : vector<256x4xbf16>, vector<4x4xbf16>, vector<256x4xf32> -> vector<256x4xf32>
    %135 = arith.addf %124, %134 : vector<256x4xf32>
    %136 = vector.extract_strided_slice %8 {offsets = [17, 0], sizes = [239, 4], strides = [1, 1]} : vector<256x4xbf16> to vector<239x4xbf16>
    %137 = vector.extract_strided_slice %8 {offsets = [0, 0], sizes = [17, 4], strides = [1, 1]} : vector<256x4xbf16> to vector<17x4xbf16>
    %138 = tpu.concatenate %136, %137 in 0 : vector<239x4xbf16>, vector<17x4xbf16> -> vector<256x4xbf16>
    %139 = arith.andi %45, %49 : vector<256x1xi1>
    %cst_50 = arith.constant 0.000000e+00 : bf16
    %140 = vector.shape_cast %139 : vector<256x1xi1> to vector<256x1xi1>
    %141 = vector.broadcast %140 : vector<256x1xi1> to vector<256x4xi1>
    %142 = vector.broadcast %cst_50 : bf16 to vector<256x4xbf16>
    %143 = arith.select %141, %138, %142 : vector<256x4xi1>, vector<256x4xbf16>
    %c8 = arith.constant 8 : index
    %c0_51 = arith.constant 0 : index
    %c0_52 = arith.constant 0 : index
    %144 = vector.load %arg4[%c8, %c0_51, %c0_52] : memref<9x4x4xbf16, #tpu.memory_space<vmem>>, vector<1x4x4xbf16>
    %145 = vector.shape_cast %144 : vector<1x4x4xbf16> to vector<4x4xbf16>
    %cst_53 = arith.constant dense<0.000000e+00> : vector<256x4xf32>
    %146 = tpu.matmul %143, %145, %cst_53 {dimension_numbers = #tpu.dot_dimension_numbers<[1], [0], [0], [1], [0, 0, 1, 1], [], []>} : vector<256x4xbf16>, vector<4x4xbf16>, vector<256x4xf32> -> vector<256x4xf32>
    %147 = arith.addf %135, %146 : vector<256x4xf32>
    %cst_54 = arith.constant 0.000000e+00 : f32
    %148 = vector.broadcast %cst_54 : f32 to vector<256x4xf32>
    %149 = arith.maximumf %147, %148 : vector<256x4xf32>
    %150 = arith.truncf %149 : vector<256x4xf32> to vector<256x4xbf16>
    %c0_55 = arith.constant 0 : index
    %c0_56 = arith.constant 0 : index
    %151 = vector.load %arg6[%c0_55, %c0_56] : memref<4x16xbf16, #tpu.memory_space<vmem>>, vector<4x16xbf16>
    %cst_57 = arith.constant dense<0.000000e+00> : vector<256x16xf32>
    %152 = tpu.matmul %150, %151, %cst_57 {dimension_numbers = #tpu.dot_dimension_numbers<[1], [0], [0], [1], [0, 0, 1, 1], [], []>} : vector<256x4xbf16>, vector<4x16xbf16>, vector<256x16xf32> -> vector<256x16xf32>
    %c0_58 = arith.constant 0 : index
    %c0_59 = arith.constant 0 : index
    %153 = vector.load %arg7[%c0_58, %c0_59] : memref<1x16xf32, #tpu.memory_space<vmem>>, vector<1x16xf32>
    %154 = vector.broadcast %153 : vector<1x16xf32> to vector<256x16xf32>
    %155 = arith.addf %152, %154 : vector<256x16xf32>
    %156 = arith.extf %0 : vector<256x16xbf16> to vector<256x16xf32>
    %157 = arith.addf %155, %156 : vector<256x16xf32>
    %cst_60 = arith.constant 0.000000e+00 : f32
    %158 = vector.broadcast %cst_60 : f32 to vector<256x16xf32>
    %159 = arith.maximumf %157, %158 : vector<256x16xf32>
    %160 = arith.truncf %159 : vector<256x16xf32> to vector<256x16xbf16>
    %c0_61 = arith.constant 0 : index
    %c0_62 = arith.constant 0 : index
    %161 = vector.load %arg8[%c0_61, %c0_62] : memref<256x16xbf16, #tpu.memory_space<vmem>>, vector<256x16xbf16>
    tpu.vector_store %arg8[%c0_61, %c0_62], %160 {strides = array<i32>} : memref<256x16xbf16, #tpu.memory_space<vmem>>, vector<256x16xbf16>,
    return
  }
  func.func @transform_0(%arg0: i32) -> (i32, i32) {
    %c0_i32 = arith.constant 0 : i32
    %c0_i32_0 = arith.constant 0 : i32
    return %arg0, %c0_i32 : i32, i32
  }
  func.func @transform_1(%arg0: i32) -> (i32, i32) {
    %c0_i32 = arith.constant 0 : i32
    %c0_i32_0 = arith.constant 0 : i32
    %c0_i32_1 = arith.constant 0 : i32
    return %c0_i32, %c0_i32_0 : i32, i32
  }
  func.func @transform_2(%arg0: i32) -> (i32, i32) {
    %c0_i32 = arith.constant 0 : i32
    %c0_i32_0 = arith.constant 0 : i32
    %c0_i32_1 = arith.constant 0 : i32
    return %c0_i32, %c0_i32_0 : i32, i32
  }
  func.func @transform_3(%arg0: i32) -> (i32, i32, i32) {
    %c0_i32 = arith.constant 0 : i32
    %c0_i32_0 = arith.constant 0 : i32
    %c0_i32_1 = arith.constant 0 : i32
    %c0_i32_2 = arith.constant 0 : i32
    return %c0_i32, %c0_i32_0, %c0_i32_1 : i32, i32, i32
  }
  func.func @transform_4(%arg0: i32) -> (i32, i32) {
    %c0_i32 = arith.constant 0 : i32
    %c0_i32_0 = arith.constant 0 : i32
    %c0_i32_1 = arith.constant 0 : i32
    return %c0_i32, %c0_i32_0 : i32, i32
  }
  func.func @transform_5(%arg0: i32) -> (i32, i32) {
    %c0_i32 = arith.constant 0 : i32
    %c0_i32_0 = arith.constant 0 : i32
    %c0_i32_1 = arith.constant 0 : i32
    return %c0_i32, %c0_i32_0 : i32, i32
  }
  func.func @transform_6(%arg0: i32) -> (i32, i32) {
    %c0_i32 = arith.constant 0 : i32
    %c0_i32_0 = arith.constant 0 : i32
    %c0_i32_1 = arith.constant 0 : i32
    return %c0_i32, %c0_i32_0 : i32, i32
  }
  func.func @transform_7(%arg0: i32) -> (i32, i32) {
    %c0_i32 = arith.constant 0 : i32
    %c0_i32_0 = arith.constant 0 : i32
    return %arg0, %c0_i32 : i32, i32
  }
}

</mosaic_0001>

<bundles_post_ra>
// kernel: tpu_custom_call.1
= control target key start
LH: loop header
LB: loop body
LE: loop exit
PB: predicated region body
PF: predicated region fallthrough
CT: control target
= control target key end

     0   :  { %s7743_s24 = smov 0   ;;  %s9848_s0 = inlined_call_operand.vmem [shape: bf16[1024,16], index: 0, kind: input, shape index: {}]   ;;  %s9849_s1 = inlined_call_operand.vmem [shape: bf16[16,4], index: 1, kind: input, shape index: {}]   ;;  %s9850_s2 = inlined_call_operand.vmem [shape: f32[1,4], index: 2, kind: input, shape index: {}]   ;;  %s9851_s3 = inlined_call_operand.vmem [shape: bf16[9,4,4], index: 3, kind: input, shape index: {}]   ;;  %s9852_s4 = inlined_call_operand.vmem [shape: f32[1,4], index: 4, kind: input, shape index: {}]   ;;  %s9853_s5 = inlined_call_operand.vmem [shape: bf16[4,16], index: 5, kind: input, shape index: {}]   ;;  %s9854_s6 = inlined_call_operand.vmem [shape: f32[1,16], index: 6, kind: input, shape index: {}]   ;;  %s9855_s7 = inlined_call_operand.vmem [shape: bf16[1024,16], index: 7, kind: output, shape index: {}]  }
   0x1 LB: > { %s6362_s25 = sadd.s32 4294967295, %s7698_s24   ;;  %p6366_p0 = scmp.ge.s32.totalorder %s7698_s24, 1  ;;  %s7698_s24 = sphi %s7743_s24, %s17_s24  }
   0x2   : > { %p238_p1 = scmp.lt.s32.totalorder %s7698_s24, 5 }
   0x4   : > { %p239_p2 = pnand %p6366_p0, %p238_p1 }
   0x6   : > { %242 = sbr.rel (%p239_p2) target bundleno = 1101 (0x44d), region = 48 }
   0xd   : > { %v7642_v0 = vld [vmem:[%s9849_s1] sm:$0xff]   ;;  %s6367_s28 = sshll.u32 %s6362_s25, 5  ;;  %vm412_vm0 = vcmask 130048   ;;  %vm9856_vm1 = vcmask 1041408   ;;  %v7807_v19 = vld [vmem:[%s9851_s3 + $0x8] sm:$0x3]  ;;  %v670_v22 = vlaneseq }
   0xe   : > { %p271_p3 = scmp.lt.s32.totalorder %s6367_s28, 127  ;;  %6956 = vmatprep.subr.bf16.mxu0 %v7642_v0  ;;  %v6520_v17 = vld [vmem:[%s9851_s3 + $0x6] sm:$0x3]  ;;  %v1987_v20 = vld [vmem:[%s9851_s3] sm:$0x3]  ;;  %vm7700_vm3 = vmmov 1  }
   0xf   : > { %6957 = vmatpush3.bf16.msra.mxu0 %v7642_v0  ;;  %7624 = vmatprep.subr.msk.bf16.mxu1 %vm9856_vm1, %v6520_v17  ;;  %v7801_v18 = vsel %vm9856_vm1, %v6520_v17, 0  ;;  %v2046_v21 = vsel %vm9856_vm1, %v1987_v20, 0  ;;  %v7816_v23 = vshrl.u32 %v670_v22, 7  ;;  %vm7832_vm4 = vmpackc.low %vm7700_vm3, %vm7700_vm3  ;;  %vm7701_vm6 = vmmov 0   ;;  %v8058_v43 = vld [vmem:[%s9851_s3 + $0x2] sm:$0x3] }
  0x10   : > { %s10604_s28 = smov (!%p271_p3, %s6367_s28), 127  ;;  %10029 = vst [vmem:[#allocation2_spill] sm:$0xff] %v7801_v18  ;;  %7331 = vmatpush3.bf16.msra.mxu1 %v7801_v18  ;;  %7620 = vmatprep.subr.msk.bf16.mxu0 %vm9856_vm1, %v1987_v20  ;;  %vm7840_vm7 = vmpackc.low %vm7701_vm6, %vm7701_vm6  ;;  %v9863_v57 = vmov 0  }
  0x11   : > { %s6368_s29 = sshll.u32 %s10604_s28, 2  ;;  %7625 = vmatprep.subr.msk.bf16.mxu1 %vm9856_vm1, %v7807_v19  ;;  %10030 = vst [vmem:[#allocation3_spill] sm:$0xff] %v7816_v23  ;;  %v673_v24 = vadd.s32 16, %v7816_v23  ;;  %v675_v25 = vadd.s32 32, %v7816_v23  ;;  %v674_v26 = vadd.s32 24, %v7816_v23  ;;  %v677_v27 = vadd.s32 48, %v7816_v23 }
  0x12   : > { %s7762_s9 = scalar_lea.vmem %s9848_s0, %s6368_s29  ;;  %v679_v29 = vadd.s32 64, %v7816_v23  ;;  %v676_v31 = vadd.s32 40, %v7816_v23  ;;  %v681_v32 = vadd.s32 80, %v7816_v23  ;;  %v683_v35 = vadd.s32 96, %v7816_v23  ;;  %s9737_s21 = scalar_lea.vmem %s9855_s7, %s6368_s29 }
  0x13   : > { %v285_v1 = vld [vmem:[%s7762_s9] sm:$0xff]   ;;  %v287_v2 = vld [vmem:[%s7762_s9 + $0x8] sm:$0xff]   ;;  %v289_v3 = vld [vmem:[%s7762_s9 + $0x10] sm:$0xff]   ;;  %v721_v28 = vand.u32 15, %v673_v24  ;;  %v735_v30 = vand.u32 15, %v675_v25  ;;  %v728_v33 = vand.u32 15, %v674_v26 }
  0x14   : > { %6958 = vmatprep.mubr.msk.bf16.mxu0 %vm412_vm0, %v285_v1  ;;  %v291_v4 = vld [vmem:[%s7762_s9 + $0x18] sm:$0xff]   ;;  %v293_v5 = vld [vmem:[%s7762_s9 + $0x20] sm:$0xff]   ;;  %v295_v6 = vld [vmem:[%s7762_s9 + $0x28] sm:$0xff]   ;;  %v749_v34 = vand.u32 15, %v677_v27  ;;  %v763_v37 = vand.u32 15, %v679_v29  ;;  %v678_v38 = vadd.s32 56, %v7816_v23 }
  0x15   : > { %6959 = vmatmul.mubr.msk.bf16.vlgmr.msra.gmra.mrb[0].mxu0 %vm412_vm0, %v287_v2  ;;  %v297_v7 = vld [vmem:[%s7762_s9 + $0x30] sm:$0xff]   ;;  %v299_v8 = vld [vmem:[%s7762_s9 + $0x38] sm:$0xff]   ;;  %v301_v9 = vld [vmem:[%s7762_s9 + $0x40] sm:$0xff]   ;;  %vm7826_vm2 = vcmp.gt.s32.totalorder %v721_v28, 0  ;;  %v687_v39 = vadd.s32 128, %v7816_v23  ;;  %vm7836_vm5 = vcmp.gt.s32.totalorder %v735_v30, 0 }
  0x16   : > { %6962 = vmatprep.mubr.msk.bf16.mxu0 %vm412_vm0, %v289_v3  ;;  %v303_v10 = vld [vmem:[%s7762_s9 + $0x48] sm:$0xff]   ;;  %v305_v11 = vld [vmem:[%s7762_s9 + $0x50] sm:$0xff]   ;;  %v307_v12 = vld [vmem:[%s7762_s9 + $0x58] sm:$0xff]   ;;  %6991 = vmatpush3.bf16.msra.mxu0 %v2046_v21  ;;  %v742_v42 = vand.u32 15, %v676_v31  ;;  %v777_v44 = vand.u32 15, %v681_v32  ;;  %v685_v45 = vadd.s32 112, %v7816_v23 }
  0x17   : > { %v309_v13 = vld [vmem:[%s7762_s9 + $0x60] sm:$0xff]   ;;  %v311_v14 = vld [vmem:[%s7762_s9 + $0x68] sm:$0xff]   ;;  %v313_v15 = vld [vmem:[%s7762_s9 + $0x70] sm:$0xff]   ;;  %vm7845_vm8 = vcmp.lt.s32.totalorder %v728_v33, 15  ;;  %vm7852_vm10 = vcmp.gt.s32.totalorder %v749_v34, 0  ;;  %v791_v48 = vand.u32 15, %v683_v35 }
  0x18   : > { %v315_v16 = vld [vmem:[%s7762_s9 + $0x78] sm:$0xff]   ;;  %vm1845_vm9 = vmpackc.low %vm7826_vm2, %vm7826_vm2  ;;  %v680_v49 = vadd.s32 72, %v7816_v23  ;;  %vm7860_vm12 = vcmp.gt.s32.totalorder %v763_v37, 0  ;;  %v756_v51 = vand.u32 15, %v678_v38  ;;  %v682_v52 = vadd.s32 88, %v7816_v23 }
  0x19   : > { %vm1847_vm11 = vmpackc.low %vm7836_vm5, %vm7836_vm5  ;;  %v819_v53 = vand.u32 15, %v687_v39  ;;  %vm7868_vm14 = vcmp.lt.s32.totalorder %v742_v42, 15  ;;  %v805_v56 = vand.u32 15, %v685_v45  ;;  %v7882_v58 = vsel %vm7840_vm7, 65537, %v9863_v57 }
  0x1a   : > { %vm1849_vm15 = vmpackc.low %vm7852_vm10, %vm7852_vm10  ;;  %vm7887_vm6 = vcmp.gt.s32.totalorder %v791_v48, 0  ;;  %v770_v60 = vand.u32 15, %v680_v49  ;;  %v689_v61 = vadd.s32 144, %v7816_v23  ;;  %vm7895_vm13 = vcmp.lt.s32.totalorder %v756_v51, 15 }
  0x1b   : > { %vm2832_vm1 = vmpackc.low %vm7868_vm14, %vm7868_vm14  ;;  %v784_v63 = vand.u32 15, %v682_v52  ;;  %vm7899_vm7 = vcmp.gt.s32.totalorder %v819_v53, 0  ;;  %v7906_v1 = vsel %vm7832_vm4, 65537, %v9863_v57  ;;  %v1877_v3 = vsel %vm1845_vm9, 65537, %v9863_v57 }
  0x1c   : > { %vm1855_vm4 = vmpackc.low %vm7887_vm6, %vm7887_vm6  ;;  %vm7961_vm10 = vcmp.lt.s32.totalorder %v770_v60, 15  ;;  %v684_v26 = vadd.s32 104, %v7816_v23  ;;  %v686_v31 = vadd.s32 120, %v7816_v23  ;;  %v10065_v49 = vmov 0 }
  0x1d   : > { %6963 = vmatmul.mubr.msk.bf16.gmra.mrb[4].mxu0 %vm412_vm0, %v291_v4  ;;  %v7925_v4 = vsel %vm1847_vm11, 65537, %v9863_v57  ;;  %vm10057_vm2 = vmpackc.low %vm7860_vm12, %vm7860_vm12  ;;  %v7998_v20 = vsel %vm1855_vm4, 65537, %v9863_v57  ;;  %vm9909_vm4 = vsmask.f32 7424 }
  0x1e   : > { %6966 = vmatprep.mubr.msk.bf16.mxu0 %vm412_vm0, %v293_v5  ;;  %vm10058_vm5 = vmpackc.low %vm7845_vm8, %vm7845_vm8  ;;  %vm7984_vm8 = vcmp.lt.s32.totalorder %v784_v63, 15  ;;  %v798_v46 = vand.u32 15, %v684_v26  ;;  %v812_v51 = vand.u32 15, %v686_v31  ;;  %v695_v31 = vadd.s32 192, %v7816_v23 }
  0x1f   : > { %vm2834_vm9 = vmpackc.low %vm7895_vm13, %vm7895_vm13  ;;  %vm9913_vm13 = vsmask.f32 256 }
  0x20   : > { %vm1859_vm11 = vmpackc.low %vm7899_vm7, %vm7899_vm7  ;;  %v8035_v36 = vsel %vm2834_vm9, 65537, %v9863_v57  ;;  %vm10068_vm7 = vcmask 1041408  }
  0x21   : > { %vm2836_vm12 = vmpackc.low %vm7961_vm10, %vm7961_vm10  ;;  %v8044_v39 = vsel %vm1859_vm11, 65537, %v9863_v57  ;;  %7621 = vmatprep.subr.msk.bf16.mxu0 %vm10068_vm7, %v8058_v43 }
  0x22   : > { %vm2838_vm14 = vmpackc.low %vm7984_vm8, %vm7984_vm8 }
  0x23   : > { %v8074_v45 = vsel %vm2838_vm14, 65537, %v9863_v57 }
  0x25   : > { %6967 = vmatmul.mubr.msk.bf16.gmra.mrb[8].mxu0 %vm412_vm0, %v295_v6  ;;  %v7940_v6 = vsel %vm1849_vm15, 65537, %v9863_v57 }
  0x26   : > { %6970 = vmatprep.mubr.msk.bf16.mxu0 %vm412_vm0, %v297_v7  ;;  %v7948_v7 = vsel %vm10057_vm2, 65537, %v9863_v57  ;;  %vm8112_vm2 = vcmp.lt.s32.totalorder %v798_v46, 15 }
  0x27   : > { %vm2840_vm10 = vmpackc.low %vm8112_vm2, %vm8112_vm2 }
  0x2d   : > { %6971 = vmatmul.mubr.msk.bf16.gmra.mrb[12].mxu0 %vm412_vm0, %v299_v8  ;;  %v7956_v8 = vsel %vm10058_vm5, 65537, %v9863_v57  ;;  %vm8119_vm5 = vcmp.lt.s32.totalorder %v812_v51, 15 }
  0x2e   : > { %6974 = vmatprep.mubr.msk.bf16.mxu0 %vm412_vm0, %v301_v9  ;;  %v6472_v25 = vcombine.low %v7906_v1, %v7956_v8  ;;  %vm2842_vm11 = vmpackc.low %vm8119_vm5, %vm8119_vm5 }
  0x30   : > { %vm8209_vm14 = vcmp.ne.s16.totalorder %v6472_v25, 0 }
  0x35   : > { %6975 = vmatmul.mubr.msk.bf16.gmra.mrb[16].mxu0 %vm412_vm0, %v303_v10  ;;  %v7968_v10 = vld [vmem:[%s9850_s2] ss:$0 sm:$0xff] }
  0x36   : > { %6978 = vmatprep.mubr.msk.bf16.mxu0 %vm412_vm0, %v305_v11  ;;  %v833_v11 = vand.u32 15, %v689_v61 }
  0x38   : > { %vm8023_vm15 = vcmp.gt.s32.totalorder %v833_v11, 0 }
  0x3d   : > { %6979 = vmatmul.mubr.msk.bf16.gmra.mrb[20].mxu0 %vm412_vm0, %v307_v12 }
  0x3e   : > { %6982 = vmatprep.mubr.msk.bf16.mxu0 %vm412_vm0, %v309_v13  ;;  %v7982_v13 = vsel %vm2832_vm1, 65537, %v9863_v57 }
  0x45   : > { %6983 = vmatmul.mubr.msk.bf16.gmra.mrb[24].mxu0 %vm412_vm0, %v311_v14 }
  0x46   : > { %6986 = vmatprep.mubr.msk.bf16.mxu0 %vm412_vm0, %v313_v15  ;;  %v691_v15 = vadd.s32 160, %v7816_v23 }
  0x48   : > { %v847_v40 = vand.u32 15, %v691_v15 }
  0x4d   : > { %6987 = vmatmul.mubr.msk.bf16.gmra.mrb[28].mxu0 %vm412_vm0, %v315_v16  ;;  %vm7875_vm0 = vcmp.gt.s32.totalorder %v777_v44, 0  ;;  %v6406_v16 = vcombine.low %v1877_v3, %v7906_v1  ;;  %v8066_v44 = vsel %vm2836_vm12, 65537, %v9863_v57  ;;  %v693_v3 = vadd.s32 176, %v7816_v23 }
  0x4e   : > { %vm1853_vm3 = vmpackc.low %vm7875_vm0, %vm7875_vm0  ;;  %vm7930_vm0 = vcmp.gt.s32.totalorder %v805_v56, 0 }
  0x4f   : > { %v7974_v12 = vsel %vm1853_vm3, 65537, %v9863_v57  ;;  %vm1857_vm1 = vmpackc.low %vm7930_vm0, %vm7930_vm0  ;;  %vm8079_vm6 = vcmp.ne.s16.totalorder %v6406_v16, 0  ;;  %vm8093_vm0 = vcmp.gt.s32.totalorder %v847_v40, 0 }
  0x50   : > { %v8052_v41 = vsel %vm1857_vm1, 65537, %v9863_v57  ;;  %vm1861_vm3 = vmpackc.low %vm8023_vm15, %vm8023_vm15  ;;  %v10066_v49 = vsel %vm8079_vm6, 4294967295, %v10065_v49 }
  0x51   : > { %10067 = vst [vmem:[#allocation4_spill] sm:$0xff] %v10066_v49  ;;  %v8109_v0 = vsel %vm1861_vm3, 65537, %v9863_v57  ;;  %vm1863_vm9 = vmpackc.low %vm8093_vm0, %vm8093_vm0  ;;  %v10306_v49 = vmov 0 }
  0xe8   : > { %v6960_v21 = vpop.f32.mrb[0].mxu0 }
  0xe9   : > { %v504_v27 = vadd.f32 %v6960_v21, %v7968_v10  ;;  %v495_v28 = vpop.f32.mrb[1].mxu0 }
  0xea   : > { %v496_v32 = vadd.f32 %v7968_v10, %v495_v28  ;;  %v6961_v33 = vpop.f32.mrb[2].mxu0 }
  0xeb   : > { %v507_v37 = vadd.f32 %v6961_v33, %v7968_v10  ;;  %v498_v38 = vpop.f32.mrb[3].mxu0  ;;  %v624_v47 = vmax.f32 %v504_v27, 0.0 }
  0xec   : > { %v499_v42 = vadd.f32 %v7968_v10, %v498_v38  ;;  %v622_v52 = vmax.f32 %v496_v32, 0.0  ;;  %v688_v38 = vadd.s32 136, %v7816_v23 }
  0xed   : > { %v625_v48 = vmax.f32 %v507_v37, 0.0 }
  0xee   : > { %v623_v53 = vmax.f32 %v499_v42, 0.0  ;;  %v861_v42 = vand.u32 15, %v693_v3 }
  0xef   : > { %v8091_v56 = vpack.c.bf16 %v625_v48, %v624_v47 }
  0xf0   : > { %v8101_v62 = vpack.c.bf16 %v623_v53, %v622_v52  ;;  %v6964_v63 = vpop.f32.mrb[4].mxu0  ;;  %vm8189_vm8 = vcmp.gt.s32.totalorder %v861_v42, 0  ;;  %v697_v42 = vadd.s32 208, %v7816_v23 }
  0xf1   : > { %10069 = vst [vmem:[#allocation5_spill] sm:$0xff] %v8091_v56  ;;  %v1622_v9 = vshrl.u32 %v8091_v56, 16  ;;  %v1625_v11 = vshll.u32 %v8091_v56, 16  ;;  %v520_v14 = vadd.f32 %v6964_v63, %v7968_v10  ;;  %v511_v15 = vpop.f32.mrb[5].mxu0  ;;  %vm1865_vm15 = vmpackc.low %vm8189_vm8, %vm8189_vm8  ;;  %vm10106_vm8 = vcmask 1041408  }
  0xf2   : > { %10072 = vst [vmem:[#allocation6_spill] sm:$0xff] %v8101_v62  ;;  %v1615_v21 = vshrl.u32 %v8101_v62, 16  ;;  %v9858_v26 = vshll.u32 %v8101_v62, 16  ;;  %v512_v27 = vadd.f32 %v7968_v10, %v511_v15  ;;  %v6965_v28 = vpop.f32.mrb[6].mxu0 }
  0xf3   : > { %v523_v32 = vadd.f32 %v6965_v28, %v7968_v10  ;;  %v514_v33 = vpop.f32.mrb[7].mxu0  ;;  %v8128_v34 = vrot.slane %v1622_v9, 7  ;;  %v2669_v37 = vrot.slane %v1625_v11, 1  ;;  %v628_v48 = vmax.f32 %v520_v14, 0.0 }
  0xf4   : > { %v515_v40 = vadd.f32 %v7968_v10, %v514_v33  ;;  %v8135_v46 = vrot.slane %v1615_v21, 7  ;;  %v8139_v47 = vrot.slane %v9858_v26, 1  ;;  %v626_v63 = vmax.f32 %v512_v27, 0.0 }
  0xf5   : > { %v629_v51 = vmax.f32 %v523_v32, 0.0  ;;  %v1627_v52 = vor.u32 %v1625_v11, %v8128_v34  ;;  %v2671_v53 = vor.u32 %v2669_v37, %v1622_v9  ;;  %v875_v28 = vand.u32 15, %v695_v31 }
  0xf6   : > { %v627_v15 = vmax.f32 %v515_v40, 0.0  ;;  %v2668_v3 = vor.u32 %v8139_v47, %v1615_v21  ;;  %v826_v9 = vand.u32 15, %v688_v38  ;;  %v690_v11 = vadd.s32 152, %v7816_v23 }
  0xf7   : > { %v8149_v33 = vpack.c.bf16 %v629_v51, %v628_v48  ;;  %v8153_v14 = vsel %vm9913_vm13, %v8135_v46, %v1627_v52  ;;  %v8173_v38 = vsel %vm1863_vm9, 65537, %v9863_v57  ;;  %v8181_v51 = vsel %vm2840_vm10, 65537, %v9863_v57 }
  0xf8   : > { %10077 = vst [vmem:[#allocation7_spill] sm:$0xff] %v8153_v14  ;;  %v8156_v32 = vpack.c.bf16 %v627_v15, %v626_v63  ;;  %v6968_v27 = vpop.f32.mrb[8].mxu0  ;;  %v8164_v21 = vsel %vm9909_vm4, %v2668_v3, %v2669_v37  ;;  %v8184_v37 = vsel %vm2842_vm11, 65537, %v9863_v57  ;;  %vm8194_vm1 = vcmp.gt.s32.totalorder %v875_v28, 0 }
  0xf9   : > { %10079 = vst [vmem:[#allocation9_spill] sm:$0xff] %v8164_v21  ;;  %v536_v40 = vadd.f32 %v6968_v27, %v7968_v10  ;;  %v527_v48 = vpop.f32.mrb[9].mxu0  ;;  %10080 = vst [vmem:[#allocation10_spill] sm:$0xff] %v8184_v37  ;;  %vm8198_vm12 = vcmp.lt.s32.totalorder %v826_v9, 15  ;;  %v840_v60 = vand.u32 15, %v690_v11  ;;  %v10088_v28 = vmov 0 }
  0xfa   : > { %10078 = vst [vmem:[#allocation8_spill] sm:$0xff] %v8156_v32  ;;  %v1630_v52 = vshrl.u32 %v8156_v32, 16  ;;  %v1633_v63 = vshll.u32 %v8156_v32, 16  ;;  %v528_v59 = vadd.f32 %v7968_v10, %v527_v48  ;;  %v6969_v15 = vpop.f32.mrb[10].mxu0  ;;  %v10089_v28 = vsel %vm8209_vm14, 4294967295, %v10088_v28  ;;  %vm1867_vm3 = vmpackc.low %vm8194_vm1, %vm8194_vm1 }
  0xfb   : > { %v539_v27 = vadd.f32 %v6969_v15, %v7968_v10  ;;  %v530_v5 = vpop.f32.mrb[11].mxu0  ;;  %10090 = vst [vmem:[#allocation12_spill] sm:$0xff] %v10089_v28  ;;  %v9857_v9 = vshll.u32 %v8149_v33, 16  ;;  %v632_v15 = vmax.f32 %v536_v40, 0.0  ;;  %vm2844_vm7 = vmpackc.low %vm8198_vm12, %vm8198_vm12  ;;  %vm8266_vm0 = vcmp.lt.s32.totalorder %v840_v60, 15 }
  0xfc   : > { %v2672_v50 = vrot.slane %v1633_v63, 1  ;;  %v531_v48 = vadd.f32 %v7968_v10, %v530_v5  ;;  %v8204_v30 = vrot.slane %v1630_v52, 7  ;;  %v630_v55 = vmax.f32 %v528_v59, 0.0  ;;  %vm2846_vm5 = vmpackc.low %vm8266_vm0, %vm8266_vm0 }
  0xfd   : > { %v633_v35 = vmax.f32 %v539_v27, 0.0  ;;  %v8281_v16 = vsel %vm2844_vm7, 65537, %v9863_v57  ;;  %v9860_v60 = vshrl.u32 %v8149_v33, 16 }
  0xfe   : > { %10087 = vst [vmem:[#allocation11_spill] sm:$0xff] %v8204_v30  ;;  %v631_v11 = vmax.f32 %v531_v48, 0.0  ;;  %v1635_v5 = vor.u32 %v1633_v63, %v8204_v30  ;;  %v8219_v29 = vsel %vm9909_vm4, %v2671_v53, %v2672_v50  ;;  %v2674_v8 = vor.u32 %v2672_v50, %v1630_v52  ;;  %10097 = vst [vmem:[#allocation17_spill] sm:$0xff] %v8281_v16 }
  0xff   : > { %10091 = vst [vmem:[#allocation13_spill] sm:$0xff] %v8219_v29  ;;  %v8221_v25 = vpack.c.bf16 %v633_v35, %v632_v15  ;;  %v699_v50 = vadd.s32 224, %v7816_v23  ;;  %v692_v52 = vadd.s32 168, %v7816_v23  ;;  %v889_v15 = vand.u32 15, %v697_v42 }
 0x100   : > { %v8232_v63 = vpack.c.bf16 %v631_v11, %v630_v55  ;;  %v6972_v53 = vpop.f32.mrb[12].mxu0  ;;  %v8237_v35 = vsel %vm9913_vm13, %v8128_v34, %v1635_v5  ;;  %v8250_v55 = vsel %vm1865_vm15, 65537, %v9863_v57  ;;  %v2675_v34 = vrot.slane %v9857_v9, 1 }
 0x101   : > { %10092 = vst [vmem:[#allocation14_spill] sm:$0xff] %v8221_v25  ;;  %10093 = vst [vmem:[#allocation15_spill] sm:$0xff] %v8237_v35  ;;  %v552_v27 = vadd.f32 %v6972_v53, %v7968_v10  ;;  %v543_v48 = vpop.f32.mrb[13].mxu0  ;;  %v8261_v53 = vsel %vm1867_vm3, 65537, %v9863_v57  ;;  %v903_v22 = vand.u32 15, %v699_v50  ;;  %v854_v17 = vand.u32 15, %v692_v52 }
 0x102   : > { %v544_v11 = vadd.f32 %v7968_v10, %v543_v48  ;;  %v6973_v5 = vpop.f32.mrb[14].mxu0  ;;  %v9859_v59 = vshll.u32 %v8232_v63, 16  ;;  %v8273_v9 = vsel %vm9909_vm4, %v2674_v8, %v2675_v34  ;;  %vm8285_vm2 = vcmp.gt.s32.totalorder %v889_v15, 0 }
 0x103   : > { %v555_v48 = vadd.f32 %v6973_v5, %v7968_v10  ;;  %v546_v40 = vpop.f32.mrb[15].mxu0  ;;  %10096 = vst [vmem:[#allocation16_spill] sm:$0xff] %v8273_v9  ;;  %v636_v26 = vmax.f32 %v552_v27, 0.0  ;;  %v9861_v61 = vshll.u32 %v8221_v25, 16  ;;  %v2677_v50 = vor.u32 %v2675_v34, %v9860_v60  ;;  %vm1869_vm9 = vmpackc.low %vm8285_vm2, %vm8285_vm2 }
 0x104   : > { %v547_v3 = vadd.f32 %v7968_v10, %v546_v40  ;;  %v634_v24 = vmax.f32 %v544_v11, 0.0  ;;  %v2678_v42 = vrot.slane %v9859_v59, 1  ;;  %vm8320_vm10 = vcmp.gt.s32.totalorder %v903_v22, 0 }
 0x105   : > { %v637_v5 = vmax.f32 %v555_v48, 0.0  ;;  %vm8325_vm11 = vcmp.lt.s32.totalorder %v854_v17, 15  ;;  %v2681_v22 = vrot.slane %v9861_v61, 1  ;;  %v8340_v17 = vsel %vm10106_vm8, %v7807_v19, 0  ;;  %vm1871_vm1 = vmpackc.low %vm8320_vm10, %vm8320_vm10 }
 0x106   : > { %v635_v40 = vmax.f32 %v547_v3, 0.0  ;;  %v8311_v3 = vsel %vm2846_vm5, 65537, %v9863_v57  ;;  %v8332_v15 = vsel %vm9909_vm4, %v2677_v50, %v2678_v42  ;;  %v8352_v61 = vsel %vm1869_vm9, 65537, %v9863_v57  ;;  %vm2848_vm12 = vmpackc.low %vm8325_vm11, %vm8325_vm11 }
 0x107   : > { %v8298_v52 = vpack.c.bf16 %v637_v5, %v636_v26  ;;  %10100 = vst [vmem:[#allocation18_spill] sm:$0xff] %v8311_v3  ;;  %v8314_v26 = vadd.s32 184, %v7816_v23  ;;  %10105 = vst [vmem:[#allocation19_spill] sm:$0xff] %v8332_v15  ;;  %v10107_v19 = vshrl.u32 %v8232_v63, 16  ;;  %v10109_v9 = vshrl.u32 %v8221_v25, 16 }
 0x108   : > { %v8306_v48 = vpack.c.bf16 %v635_v40, %v634_v24  ;;  %v6976_v8 = vpop.f32.mrb[16].mxu0  ;;  %v701_v40 = vadd.s32 240, %v7816_v23  ;;  %vm9910_vm15 = vcmask 31744   ;;  %v8498_v24 = vadd.s32 216, %v7816_v23  ;;  %vm10145_vm10 = vmmov %vm10106_vm8 }
 0x109   : > { %v568_v34 = vadd.f32 %v6976_v8, %v7968_v10  ;;  %v559_v5 = vpop.f32.mrb[17].mxu0  ;;  %v9878_v59 = vshll.u32 %v8298_v52, 16  ;;  %v2683_v28 = vor.u32 %v2681_v22, %v10109_v9 }
 0x10a   : > { %v560_v60 = vadd.f32 %v7968_v10, %v559_v5  ;;  %v6977_v8 = vpop.f32.mrb[18].mxu0 }
 0x10b   : > { %v571_v54 = vadd.f32 %v6977_v8, %v7968_v10  ;;  %v562_v31 = vpop.f32.mrb[19].mxu0  ;;  %v2680_v8 = vor.u32 %v2678_v42, %v10107_v19  ;;  %v640_v27 = vmax.f32 %v568_v34, 0.0  ;;  %v10111_v42 = vcombine.low %v8109_v0, %v7906_v1 }
 0x10c   : > { %v563_v50 = vadd.f32 %v7968_v10, %v562_v31  ;;  %v917_v31 = vand.u32 15, %v701_v40  ;;  %v638_v2 = vmax.f32 %v560_v60, 0.0  ;;  %v10115_v34 = vshll.u32 %v8306_v48, 16 }
 0x10d   : > { %v641_v5 = vmax.f32 %v571_v54, 0.0  ;;  %v8364_v57 = vsel %vm9909_vm4, %v2680_v8, %v2681_v22  ;;  %vm8373_vm3 = vcmp.ne.s16.totalorder %v10111_v42, 0  ;;  %v10112_v54 = vmov 0 }
 0x10e   : > { %v639_v18 = vmax.f32 %v563_v50, 0.0  ;;  %10108 = vst [vmem:[#allocation20_spill] sm:$0xff] %v8364_v57  ;;  %v10113_v54 = vsel %vm8373_vm3, 4294967295, %v10112_v54  ;;  %v2684_v40 = vrot.slane %v10115_v34, 1  ;;  %v10117_v0 = vcombine.low %v8044_v39, %v7906_v1 }
 0x10f   : > { %v8368_v29 = vpack.c.bf16 %v641_v5, %v640_v27  ;;  %10114 = vst [vmem:[#allocation22_spill] sm:$0xff] %v10113_v54  ;;  %v1670_v27 = vshrl.u32 %v8298_v52, 16  ;;  %v10118_v22 = vmov 0  ;;  %v10121_v5 = vmov 0  }
 0x110   : > { %v8382_v19 = vpack.c.bf16 %v639_v18, %v638_v2  ;;  %v6980_v9 = vpop.f32.mrb[20].mxu0  ;;  %vm8388_vm7 = vcmp.ne.s16.totalorder %v10117_v0, 0  ;;  %v8398_v8 = vsel %vm1871_vm1, 65537, %v10121_v5  ;;  %v8406_v18 = vsel %vm2848_vm12, 65537, %v10121_v5 }
 0x111   : > { %10110 = vst [vmem:[#allocation21_spill] sm:$0xff] %v8368_v29  ;;  %v10119_v22 = vsel %vm8388_vm7, 4294967295, %v10118_v22  ;;  %10122 = vst [vmem:[#allocation25_spill] sm:$0xff] %v8406_v18  ;;  %v584_v42 = vadd.f32 %v6980_v9, %v7968_v10  ;;  %v575_v34 = vpop.f32.mrb[21].mxu0  ;;  %vm8411_vm0 = vcmp.gt.s32.totalorder %v917_v31, 0  ;;  %v8418_v11 = vsel %vm9909_vm4, %v2683_v28, %v2684_v40 }
 0x112   : > { %10116 = vst [vmem:[#allocation23_spill] sm:$0xff] %v8382_v19  ;;  %10120 = vst [vmem:[#allocation24_spill] sm:$0xff] %v10119_v22  ;;  %v1678_v0 = vshrl.u32 %v8382_v19, 16  ;;  %v576_v50 = vadd.f32 %v7968_v10, %v575_v34  ;;  %v6981_v60 = vpop.f32.mrb[22].mxu0  ;;  %v2687_v39 = vrot.slane %v9878_v59, 1  ;;  %v1689_v2 = vshll.u32 %v8368_v29, 16 }
 0x113   : > { %10125 = vst [vmem:[#allocation26_spill] sm:$0xff] %v8418_v11  ;;  %v587_v9 = vadd.f32 %v6981_v60, %v7968_v10  ;;  %v578_v21 = vpop.f32.mrb[23].mxu0  ;;  %v1681_v31 = vshll.u32 %v8382_v19, 16  ;;  %v10126_v57 = vshrl.u32 %v8368_v29, 16  ;;  %v8430_v32 = vrot.slane %v1670_v27, 7  ;;  %vm1873_vm2 = vmpackc.low %vm8411_vm0, %vm8411_vm0 }
 0x114   : > { %v579_v34 = vadd.f32 %v7968_v10, %v578_v21  ;;  %v1680_v28 = vrot.slane %v1678_v0, 7  ;;  %v10127_v11 = vshrl.u32 %v8306_v48, 16  ;;  %v644_v59 = vmax.f32 %v584_v42, 0.0 }
 0x115   : > { %v8427_v15 = vrot.slane %v10126_v57, 7  ;;  %v642_v35 = vmax.f32 %v576_v50, 0.0  ;;  %v645_v30 = vmax.f32 %v587_v9, 0.0  ;;  %v2689_v21 = vor.u32 %v2687_v39, %v1670_v27 }
 0x116   : > { %v2686_v56 = vor.u32 %v2684_v40, %v10127_v11  ;;  %v643_v3 = vmax.f32 %v579_v34, 0.0  ;;  %v1683_v16 = vor.u32 %v1681_v31, %v1680_v28  ;;  %v10131_v40 = vcombine.low %v8250_v55, %v7906_v1 }
 0x117   : > { %v1691_v60 = vor.u32 %v1689_v2, %v8427_v15  ;;  %v8441_v19 = vpack.c.bf16 %v645_v30, %v644_v59  ;;  %v10132_v50 = vmov 0  ;;  %v2690_v11 = vrot.slane %v1681_v31, 1 }
 0x118   : > { %v8439_v57 = vsel %vm9909_vm4, %v2686_v56, %v2687_v39  ;;  %vm8449_vm5 = vcmp.ne.s16.totalorder %v10131_v40, 0  ;;  %v8455_v9 = vpack.c.bf16 %v643_v3, %v642_v35  ;;  %v6984_v56 = vpop.f32.mrb[24].mxu0  ;;  %v8459_v30 = vsel %vm9913_vm13, %v8430_v32, %v1683_v16 }
 0x119   : > { %10128 = vst [vmem:[#allocation27_spill] sm:$0xff] %v8439_v57  ;;  %10129 = vst [vmem:[#allocation28_spill] sm:$0xff] %v8441_v19  ;;  %v8444_v37 = vsel %vm9913_vm13, %v1680_v28, %v1691_v60  ;;  %v10133_v50 = vsel %vm8449_vm5, 4294967295, %v10132_v50  ;;  %v10137_v59 = vcombine.low %v8173_v38, %v7906_v1  ;;  %v10138_v55 = vmov 0  ;;  %v591_v31 = vpop.f32.mrb[25].mxu0 }
 0x11a   : > { %10130 = vst [vmem:[#allocation29_spill] sm:$0xff] %v8444_v37  ;;  %10134 = vst [vmem:[#allocation30_spill] sm:$0xff] %v10133_v50  ;;  %v8471_v39 = vadd.s32 200, %v7816_v23  ;;  %v9894_v35 = vshrl.u32 %v8441_v19, 16  ;;  %v600_v3 = vadd.f32 %v6984_v56, %v7968_v10  ;;  %v3417_v16 = vsel %vm8388_vm7, %v8459_v30, 0  ;;  %v6985_v60 = vpop.f32.mrb[26].mxu0 }
 0x11b   : > { %10135 = vst [vmem:[#allocation31_spill] sm:$0xff] %v8455_v9  ;;  %10136 = vst [vmem:[#allocation32_spill] sm:$0xff] %v8459_v30  ;;  %vm8464_vm9 = vcmp.ne.s16.totalorder %v10137_v59, 0  ;;  %v8484_v38 = vsel %vm1873_vm2, 65537, %v10121_v5  ;;  %v592_v28 = vadd.f32 %v7968_v10, %v591_v31  ;;  %7110 = vmatprep.mubr.msk.bf16.mxu1 %vm9910_vm15, %v3417_v16  ;;  %v3418_v40 = vsel %vm8373_vm3, %v8444_v37, 0  ;;  %v594_v31 = vpop.f32.mrb[27].mxu0 }
 0x11c   : > { %v10139_v55 = vsel %vm8464_vm9, 4294967295, %v10138_v55  ;;  %v8495_v56 = vld [vmem:[%s9851_s3 + $0xa] sm:$0x3]  ;;  %v603_v27 = vadd.f32 %v6985_v60, %v7968_v10  ;;  %7111 = vmatmul.mubr.msk.bf16.vlgmr.msra.gmra.mrb[0].mxu1 %vm9910_vm15, %v3418_v40  ;;  %v8505_v16 = vrot.slane %v9894_v35, 7  ;;  %v8508_v42 = vsel %vm9909_vm4, %v2689_v21, %v2690_v11 }
 0x11d   : > { %10140 = vst [vmem:[#allocation33_spill] sm:$0xff] %v10139_v55  ;;  %10141 = vst [vmem:[#allocation34_spill] sm:$0xff] %v8495_v56  ;;  %v1697_v34 = vshll.u32 %v8455_v9, 16  ;;  %v648_v57 = vmax.f32 %v600_v3, 0.0  ;;  %v595_v54 = vadd.f32 %v7968_v10, %v594_v31  ;;  %7127 = vmatpush3.bf16.msra.mxu1 %v8340_v17  ;;  %v10143_v59 = vshrl.u32 %v8455_v9, 16 }
 0x11e   : > { %10142 = vst [vmem:[#allocation35_spill] sm:$0xff] %v8508_v42  ;;  %v649_v22 = vmax.f32 %v603_v27, 0.0  ;;  %v10144_v40 = vshll.u32 %v8441_v19, 16  ;;  %7626 = vmatprep.subr.msk.bf16.mxu1 %vm10145_vm10, %v8495_v56  ;;  %v2692_v21 = vor.u32 %v2690_v11, %v1678_v0  ;;  %v2693_v35 = vrot.slane %v1689_v2, 1 }
 0x11f   : > { %v1696_v60 = vrot.slane %v10143_v59, 7  ;;  %v646_v42 = vmax.f32 %v592_v28, 0.0  ;;  %v647_v30 = vmax.f32 %v595_v54, 0.0  ;;  %v700_v31 = vadd.s32 232, %v7816_v23 }
 0x120   : > { %v1707_v37 = vor.u32 %v10144_v40, %v8505_v16  ;;  %v8521_v18 = vpack.c.bf16 %v649_v22, %v648_v57  ;;  %v10146_v27 = vcombine.low %v8352_v61, %v7906_v1  ;;  %v10147_v59 = vmov 0  ;;  %v6988_v22 = vpop.f32.mrb[28].mxu0 }
 0x121   : > { %v1699_v3 = vor.u32 %v1697_v34, %v1696_v60  ;;  %v8534_v0 = vsel %vm9909_vm4, %v2692_v21, %v2693_v35  ;;  %v10151_v54 = vshrl.u32 %v8368_v29, 16  ;;  %v8538_v11 = vpack.c.bf16 %v647_v30, %v646_v42 }
 0x122   : > { %v8524_v17 = vsel %vm9913_vm13, %v1696_v60, %v1707_v37  ;;  %vm8529_vm11 = vcmp.ne.s16.totalorder %v10146_v27, 0  ;;  %10150 = vst [vmem:[#allocation37_spill] sm:$0xff] %v8534_v0  ;;  %v10152_v61 = vcombine.low %v8261_v53, %v7906_v1  ;;  %v10153_v57 = vmov 0  ;;  %v607_v60 = vpop.f32.mrb[29].mxu0 }
 0x123   : > { %v10148_v59 = vsel %vm8529_vm11, 4294967295, %v10147_v59  ;;  %v2695_v2 = vor.u32 %v2693_v35, %v10151_v54  ;;  %v8542_v37 = vsel %vm9913_vm13, %v8427_v15, %v1699_v3  ;;  %v6420_v28 = vcombine.low %v8484_v38, %v7906_v1  ;;  %v6989_v3 = vpop.f32.mrb[30].mxu0 }
 0x124   : > { %10149 = vst [vmem:[#allocation36_spill] sm:$0xff] %v10148_v59  ;;  %vm8547_vm8 = vcmp.ne.s16.totalorder %v10152_v61, 0  ;;  %v882_v35 = vand.u32 15, %v8471_v39  ;;  %v9903_v42 = vshrl.u32 %v8521_v18, 16  ;;  %v616_v30 = vadd.f32 %v6988_v22, %v7968_v10  ;;  %v610_v22 = vpop.f32.mrb[31].mxu0 }
 0x125   : > { %v10154_v57 = vsel %vm8547_vm8, 4294967295, %v10153_v57  ;;  %v3419_v15 = vsel %vm8464_vm9, %v8542_v37, 0  ;;  %v896_v53 = vand.u32 15, %v8498_v24  ;;  %v9908_v40 = vshrl.u32 %v8538_v11, 16 }
 0x126   : > { %10155 = vst [vmem:[#allocation38_spill] sm:$0xff] %v10154_v57  ;;  %v608_v21 = vadd.f32 %v7968_v10, %v607_v60  ;;  %7114 = vmatprep.mubr.msk.bf16.mxu1 %vm9910_vm15, %v3419_v15  ;;  %v3420_v39 = vsel %vm8449_vm5, %v8524_v17, 0  ;;  %v910_v38 = vand.u32 15, %v700_v31  ;;  %v1721_v27 = vshll.u32 %v8521_v18, 16 }
 0x127   : > { %v619_v54 = vadd.f32 %v6989_v3, %v7968_v10  ;;  %7115 = vmatmul.mubr.msk.bf16.gmra.mrb[4].mxu1 %vm9910_vm15, %v3420_v39  ;;  %v8571_v24 = vrot.slane %v9903_v42, 7  ;;  %v10156_v61 = vshrl.u32 %v8221_v25, 16  ;;  %v1713_v15 = vshll.u32 %v8538_v11, 16 }
 0x128   : > { %v611_v31 = vadd.f32 %v7968_v10, %v610_v22  ;;  %v1712_v23 = vrot.slane %v9908_v40, 7  ;;  %v2696_v3 = vrot.slane %v1697_v34, 1  ;;  %v10157_v29 = vand.u32 15, %v8314_v26 }
 0x129   : > { %v8575_v60 = vrot.slane %v10156_v61, 7  ;;  %v652_v42 = vmax.f32 %v616_v30, 0.0  ;;  %v650_v0 = vmax.f32 %v608_v21, 0.0  ;;  %v653_v50 = vmax.f32 %v619_v54, 0.0 }
 0x12a   : > { %vm8583_vm0 = vcmp.lt.s32.totalorder %v10157_v29, 15  ;;  %v1723_v61 = vor.u32 %v1721_v27, %v8571_v24  ;;  %vm8588_vm2 = vcmp.lt.s32.totalorder %v882_v35, 15  ;;  %v651_v10 = vmax.f32 %v611_v31, 0.0 }
 0x12b   : > { %v1715_v22 = vor.u32 %v1713_v15, %v1712_v23  ;;  %v8593_v40 = vsel %vm9909_vm4, %v2695_v2, %v2696_v3  ;;  %v10163_v26 = vshrl.u32 %v8455_v9, 16  ;;  %vm8597_vm10 = vcmp.lt.s32.totalorder %v896_v53, 15 }
 0x12c   : > { %10162 = vst [vmem:[#allocation39_spill] sm:$0xff] %v8593_v40  ;;  %v8601_v30 = vpack.c.bf16 %v653_v50, %v652_v42  ;;  %v8604_v21 = vsel %vm9913_vm13, %v1712_v23, %v1723_v61  ;;  %v10168_v35 = vcombine.low %v7882_v58, %v7882_v58  ;;  %v10169_v54 = vmov 0 }
 0x12d   : > { %v2698_v29 = vor.u32 %v2696_v3, %v10163_v26  ;;  %10167 = vst [vmem:[#allocation41_spill] sm:$0xff] %v8604_v21  ;;  %v10171_v2 = vshll.u32 %v8101_v62, 16  ;;  %v10172_v53 = vcombine.low %v7925_v4, %v7906_v1  ;;  %v10173_v50 = vmov 0 }
 0x12e   : > { %10166 = vst [vmem:[#allocation40_spill] sm:$0xff] %v8601_v30  ;;  %vm8609_vm12 = vcmp.ne.s16.totalorder %v10168_v35, 0  ;;  %vm8623_vm4 = vcmp.ne.s16.totalorder %v6420_v28, 0  ;;  %v10176_v23 = vmov 0  ;;  %v10178_v58 = vshll.u32 %v8441_v19, 16 }
 0x12f   : > { %v10170_v54 = vsel %vm8609_vm12, 4294967295, %v10169_v54  ;;  %v1620_v31 = vor.u32 %v10171_v2, %v8135_v46  ;;  %vm8619_vm1 = vcmp.ne.s16.totalorder %v10172_v53, 0  ;;  %v10177_v23 = vsel %vm8623_vm4, 4294967295, %v10176_v23 }
 0x130   : > { %v10174_v50 = vsel %vm8619_vm1, 4294967295, %v10173_v50  ;;  %v2699_v42 = vrot.slane %v10178_v58, 1  ;;  %vm8629_vm15 = vcmp.lt.s32.totalorder %v910_v38, 15  ;;  %v8633_v61 = vpack.c.bf16 %v651_v10, %v650_v0 }
 0x131   : > { %10175 = vst [vmem:[#allocation42_spill] sm:$0xff] %v10174_v50  ;;  %v8637_v4 = vsel %vm9913_vm13, %v8505_v16, %v1715_v22  ;;  %v10182_v46 = vcombine.low %v8398_v8, %v7906_v1  ;;  %v10183_v28 = vmov 0  ;;  %v10186_v26 = vshrl.u32 %v8149_v33, 16  ;;  %v10304_v50 = vld [vmem:[#allocation5_spill] sm:$0xff] }
 0x132   : > { %10181 = vst [vmem:[#allocation43_spill] sm:$0xff] %v8633_v61  ;;  %v10187_v38 = vshrl.u32 %v8232_v63, 16  ;;  %v3421_v0 = vsel %vm8547_vm8, %v8637_v4, 0  ;;  %v1605_v16 = vshrl.u32 %v8601_v30, 16  ;;  %v1608_v10 = vshll.u32 %v8601_v30, 16 }
 0x133   : > { %vm8642_vm14 = vcmp.ne.s16.totalorder %v10182_v46, 0  ;;  %v1640_v35 = vrot.slane %v10186_v26, 7  ;;  %v10188_v8 = vshll.u32 %v8221_v25, 16  ;;  %v1601_v53 = vshrl.u32 %v8633_v61, 16 }
 0x134   : > { %v10184_v28 = vsel %vm8642_vm14, 4294967295, %v10183_v28  ;;  %v1648_v2 = vrot.slane %v10187_v38, 7  ;;  %vm10189_vm13 = vcmask 31744   ;;  %v3422_v58 = vsel %vm8529_vm11, %v8604_v21, 0 }
 0x135   : > { %10185 = vst [vmem:[#allocation44_spill] sm:$0xff] %v10184_v28  ;;  %v1659_v22 = vor.u32 %v10188_v8, %v8575_v60  ;;  %7118 = vmatprep.mubr.msk.bf16.mxu1 %vm10189_vm13, %v3421_v0  ;;  %v10190_v46 = vshrl.u32 %v8306_v48, 16  ;;  %vm10191_vm8 = vsmask.f32 7424  ;;  %v1725_v30 = vshll.u32 %v8633_v61, 16  ;;  %vm10193_vm5 = vmmov %vm10189_vm13 }
 0x136   : > { %v8666_v38 = vsel %vm10191_vm8, %v2698_v29, %v2699_v42  ;;  %7119 = vmatmul.mubr.msk.bf16.gmra.mrb[8].mxu1 %vm10193_vm5, %v3422_v58  ;;  %v1607_v9 = vrot.slane %v1605_v16, 7  ;;  %vm10194_vm9 = vsmask.f32 256  ;;  %vm10195_vm3 = vcmask 1040384  }
 0x137   : > { %v1664_v26 = vrot.slane %v10190_v46, 7  ;;  %10192 = vst [vmem:[#allocation45_spill] sm:$0xff] %v8666_v38  ;;  %vm1745_vm7 = vmand %vm10195_vm3, %vm10194_vm9  ;;  %v10196_v0 = vcombine.low %v7940_v6, %v7906_v1  ;;  %v10197_v8 = vmov 0  ;;  %v10200_v46 = vshrl.u32 %v8441_v19, 16 }
 0x138   : > { %v2702_v29 = vrot.slane %v1713_v15, 1  ;;  %v1603_v38 = vrot.slane %v1601_v53, 7  ;;  %v10201_v61 = vcombine.low %v7948_v7, %v7906_v1  ;;  %v10202_v58 = vmov 0 }
 0x139   : > { %vm8675_vm13 = vcmp.ne.s16.totalorder %v10196_v0, 0  ;;  %v2701_v25 = vor.u32 %v2699_v42, %v10200_v46  ;;  %v10205_v40 = vshll.u32 %v8232_v63, 16  ;;  %v2705_v6 = vrot.slane %v1721_v27, 1 }
 0x13a   : > { %v10198_v8 = vsel %vm8675_vm13, 4294967295, %v10197_v8  ;;  %vm8684_vm5 = vcmp.ne.s16.totalorder %v10201_v61, 0  ;;  %v2663_v0 = vrot.slane %v1608_v10, 1  ;;  %v10206_v57 = vshll.u32 %v8298_v52, 16 }
 0x13b   : > { %10199 = vst [vmem:[#allocation46_spill] sm:$0xff] %v10198_v8  ;;  %v10203_v58 = vsel %vm8684_vm5, 4294967295, %v10202_v58  ;;  %v1651_v59 = vor.u32 %v10205_v40, %v1648_v2  ;;  %v1610_v19 = vor.u32 %v1608_v10, %v1607_v9  ;;  %v10207_v15 = vcombine.low %v7974_v12, %v7906_v1 }
 0x13c   : > { %10204 = vst [vmem:[#allocation47_spill] sm:$0xff] %v10203_v58  ;;  %v1675_v21 = vor.u32 %v10206_v57, %v8430_v32  ;;  %v10208_v42 = vmov 0  ;;  %v10210_v7 = vcombine.low %v7998_v20, %v7906_v1  ;;  %v10211_v61 = vmov 0 }
 0x13d   : > { %vm8696_vm3 = vcmp.ne.s16.totalorder %v10207_v15, 0  ;;  %v8708_v40 = vsel %vm10191_vm8, %v2701_v25, %v2702_v29  ;;  %v10213_v32 = vshrl.u32 %v8538_v11, 16  ;;  %v8712_v27 = vsel %vm1745_vm7, %v1607_v9, %v1620_v31 }
 0x13e   : > { %v10209_v42 = vsel %vm8696_vm3, 4294967295, %v10208_v42  ;;  %vm8703_vm9 = vcmp.ne.s16.totalorder %v10210_v7, 0  ;;  %10214 = vst [vmem:[#allocation48_spill] sm:$0xff] %v8712_v27  ;;  %v1727_v12 = vor.u32 %v1725_v30, %v1603_v38  ;;  %v10215_v10 = vshll.u32 %v8306_v48, 16 }
 0x13f   : > { %v10212_v61 = vsel %vm8703_vm9, 4294967295, %v10211_v61  ;;  %v2704_v57 = vor.u32 %v2702_v29, %v10213_v32  ;;  %v10216_v15 = vcombine.low %v8052_v41, %v7906_v1  ;;  %v10217_v20 = vmov 0  ;;  %vm10219_vm9 = vmmov %vm10191_vm8 }
 0x140   : > { %v1667_v46 = vor.u32 %v10215_v10, %v1664_v26  ;;  %v2664_v7 = vor.u32 %v2663_v0, %v1605_v16  ;;  %vm10220_vm8 = vcmask 1047552   ;;  %vm10221_vm5 = vsmask.f32 256  ;;  %vm10223_vm13 = vmmov %vm10219_vm9  ;;  %v8784_v10 = vld [vmem:[%s9851_s3 + $0x4] sm:$0x3] }
 0x141   : > { %vm8719_vm11 = vcmp.ne.s16.totalorder %v10216_v15, 0  ;;  %vm2729_vm3 = vmand %vm10220_vm8, %vm10219_vm9  ;;  %v8726_v25 = vsel %vm10221_vm5, %v1603_v38, %v1610_v19  ;;  %v8732_v9 = vsel %vm10223_vm13, %v2704_v57, %v2705_v6  ;;  %v10224_v41 = vshrl.u32 %v8521_v18, 16 }
 0x142   : > { %v10218_v20 = vsel %vm8719_vm11, 4294967295, %v10217_v20  ;;  %10222 = vst [vmem:[#allocation49_spill] sm:$0xff] %v8726_v25  ;;  %v2708_v29 = vrot.slane %v1725_v30, 1  ;;  %v1971_v16 = vsel %vm8609_vm12, %v8726_v25, 0  ;;  %vm10225_vm9 = vmmov %vm10221_vm5  ;;  %v8744_v19 = vsel %vm10221_vm5, %v1640_v35, %v1651_v59 }
 0x143   : > { %v2707_v31 = vor.u32 %v2705_v6, %v10224_v41  ;;  %v8741_v32 = vsel %vm10225_vm9, %v8571_v24, %v1727_v12  ;;  %vm10227_vm8 = vcmask 1041408   ;;  %vm2852_vm13 = vmpackc.low %vm8588_vm2, %vm8588_vm2  ;;  %vm10228_vm7 = vcmask 31744  }
 0x144   : > { %10226 = vst [vmem:[#allocation50_spill] sm:$0xff] %v8741_v32  ;;  %v2468_v38 = vsel %vm10227_vm8, %v8058_v43, 0  ;;  %6992 = vmatprep.mubr.msk.bf16.mxu0 %vm10228_vm7, %v1971_v16  ;;  %v1972_v30 = vsel %vm8079_vm6, %v8712_v27, 0  ;;  %v3423_v24 = vsel %vm8642_vm14, %v8741_v32, 0  ;;  %v8759_v59 = vsel %vm2729_vm3, %v2664_v7, %v8139_v47  ;;  %vm10231_vm8 = vmmov %vm10228_vm7  ;;  %v10256_v16 = vld [vmem:[#allocation10_spill] sm:$0xff] }
 0x145   : > { %10229 = vst [vmem:[#allocation51_spill] sm:$0xff] %v8759_v59  ;;  %vm10230_vm9 = vsmask.f32 7424  ;;  %6993 = vmatmul.mubr.msk.bf16.vlgmr.msra.gmra.mrb[32].mxu0 %vm10231_vm8, %v1972_v30  ;;  %7122 = vmatprep.mubr.msk.bf16.mxu1 %vm10228_vm7, %v3423_v24  ;;  %v1973_v43 = vsel %vm8619_vm1, %v8153_v14, 0  ;;  %v3424_v47 = vsel %vm8623_vm4, %v8726_v25, 0  ;;  %vm10232_vm3 = vmmov %vm10221_vm5  ;;  %v2710_v12 = vor.u32 %v2708_v29, %v1601_v53  ;;  %v10296_v27 = vld [vmem:[#allocation38_spill] sm:$0xff] }
 0x146   : > { %v8762_v6 = vsel %vm10230_vm9, %v2707_v31, %v2708_v29  ;;  %v8776_v57 = vsel %vm10232_vm3, %v1648_v2, %v1659_v22  ;;  %vm10233_vm8 = vmmov %vm10228_vm7  ;;  %7123 = vmatmul.mubr.msk.bf16.gmra.mrb[12].mxu1 %vm10228_vm7, %v3424_v47  ;;  %v10234_v15 = vshll.u32 %v8149_v33, 16  ;;  %v8792_v2 = vsel %vm10232_vm3, %v8575_v60, %v1667_v46  ;;  %7025 = vmatpush3.bf16.msra.mxu0 %v2468_v38 }
 0x147   : > { %6996 = vmatprep.mubr.msk.bf16.mxu0 %vm10233_vm8, %v1973_v43  ;;  %vm10235_vm5 = vmmov %vm10232_vm3  ;;  %v10239_v60 = vmov 0  ;;  %v10244_v39 = vcombine.low %v7906_v1, %v8066_v44  ;;  %v10245_v46 = vmov 0  ;;  %v10249_v41 = vmov 0 }
 0x148   : > { %v1643_v7 = vor.u32 %v10234_v15, %v1640_v35  ;;  %v8795_v22 = vsel %vm10235_vm5, %v1664_v26, %v1675_v21  ;;  %vm10236_vm9 = vmpackc.low %vm8583_vm0, %vm8583_vm0  ;;  %v10238_v35 = vcombine.low %v7906_v1, %v7982_v13  ;;  %v10241_v21 = vcombine.low %v7906_v1, %v8035_v36 }
 0x149   : > { %v2882_v53 = vsel %vm10236_vm9, 65537, %v10121_v5  ;;  %vm10237_vm8 = vmmov %vm10228_vm7  ;;  %v10242_v26 = vmov 0  ;;  %vm8822_vm0 = vcmp.ne.s16.totalorder %v10244_v39, 0  ;;  %v10248_v13 = vcombine.low %v7906_v1, %v8074_v45 }
 0x14a   : > { %7128 = vmatprep.mubr.msk.bf16.mxu1 %vm10237_vm8, %v8101_v62  ;;  %vm8808_vm7 = vcmp.ne.s16.totalorder %v10238_v35, 0  ;;  %vm8815_vm5 = vcmp.ne.s16.totalorder %v10241_v21, 0  ;;  %v10246_v46 = vsel %vm8822_vm0, 4294967295, %v10245_v46  ;;  %v2884_v36 = vsel %vm2852_vm13, 65537, %v10121_v5  ;;  %vm10271_vm12 = vmpackc.low %vm8629_vm15, %vm8629_vm15  ;;  %v10274_v21 = vld [vmem:[#allocation25_spill] sm:$0xff] }
 0x14b   : > { %v10240_v60 = vsel %vm8808_vm7, 4294967295, %v10239_v60  ;;  %v10243_v26 = vsel %vm8815_vm5, 4294967295, %v10242_v26  ;;  %10247 = vst [vmem:[#allocation52_spill] sm:$0xff] %v10246_v46  ;;  %vm8829_vm9 = vcmp.ne.s16.totalorder %v10248_v13, 0  ;;  %vm10251_vm3 = vsmask.f32 7424 }
 0x14c   : > { %v10250_v41 = vsel %vm8829_vm9, 4294967295, %v10249_v41  ;;  %v8840_v44 = vsel %vm10251_vm3, %v2710_v12, %v2663_v0  ;;  %vm10252_vm8 = vnez %v10198_v8  ;;  %v10253_v45 = vcombine.low %v7906_v1, %v8181_v51  ;;  %v10261_v0 = vld [vmem:[#allocation17_spill] sm:$0xff]  ;;  %v10266_v51 = vld [vmem:[#allocation18_spill] sm:$0xff]  ;;  %vm10270_vm3 = vmpackc.low %vm8597_vm10, %vm8597_vm10 }
 0x14d   : > { %v10254_v29 = vmov 0  ;;  %v10257_v38 = vcombine.low %v7906_v1, %v10256_v16  ;;  %v10258_v56 = vmov 0  ;;  %v10262_v30 = vcombine.low %v7906_v1, %v10261_v0  ;;  %v10280_v16 = vld [vmem:[#allocation11_spill] sm:$0xff] }
 0x14e   : > { %vm8848_vm1 = vcmp.ne.s16.totalorder %v10253_v45, 0  ;;  %v10263_v24 = vmov 0  ;;  %v10267_v43 = vcombine.low %v7906_v1, %v10266_v51  ;;  %v10268_v47 = vmov 0  ;;  %v10287_v45 = vld [vmem:[#allocation22_spill] sm:$0xff]  ;;  %v8941_v35 = vld [vmem:[%s9851_s3 + $0xc] sm:$0x3] }
 0x14f   : > { %v10255_v29 = vsel %vm8848_vm1, 4294967295, %v10254_v29  ;;  %vm8855_vm6 = vcmp.ne.s16.totalorder %v10257_v38, 0  ;;  %vm8862_vm2 = vcmp.ne.s16.totalorder %v10262_v30, 0  ;;  %v2886_v12 = vsel %vm10270_vm3, 65537, %v10121_v5  ;;  %v10283_v30 = vld [vmem:[#allocation32_spill] sm:$0xff]  ;;  %v10291_v51 = vld [vmem:[#allocation34_spill] sm:$0xff] }
 0x150   : > { %v10259_v56 = vsel %vm8855_vm6, 4294967295, %v10258_v56  ;;  %v10264_v24 = vsel %vm8862_vm2, 4294967295, %v10263_v24  ;;  %vm8869_vm13 = vcmp.ne.s16.totalorder %v10267_v43, 0  ;;  %v2888_v15 = vsel %vm10271_vm12, 65537, %v10121_v5  ;;  %v10284_v43 = vld [vmem:[#allocation29_spill] sm:$0xff]  ;;  %10299 = vst [vmem:[#allocation25_spill] sm:$0xff] %v8941_v35 }
 0x151   : > { %10260 = vst [vmem:[#allocation10_spill] sm:$0xff] %v10259_v56  ;;  %10265 = vst [vmem:[#allocation17_spill] sm:$0xff] %v10264_v24  ;;  %v10269_v47 = vsel %vm8869_vm13, 4294967295, %v10268_v47  ;;  %vm10272_vm4 = vcmask 1041408   ;;  %vm10273_vm13 = vnez %v10203_v58  ;;  %v10275_v39 = vcombine.low %v7906_v1, %v10274_v21  ;;  %v10293_v21 = vld [vmem:[#allocation30_spill] sm:$0xff] }
 0x152   : > { %7622 = vmatprep.subr.msk.bf16.mxu0 %vm10272_vm4, %v8784_v10  ;;  %v10276_v34 = vmov 0  ;;  %v6482_v13 = vcombine.low %v7906_v1, %v2882_v53  ;;  %vm10278_vm15 = vnez %v10209_v42  ;;  %vm10279_vm4 = vnez %v10212_v61  ;;  %v10285_v53 = vld [vmem:[#allocation24_spill] sm:$0xff]  ;;  %v10316_v58 = vld [vmem:[#allocation26_spill] sm:$0xff] }
 0x153   : > { %vm8893_vm2 = vcmp.ne.s16.totalorder %v10275_v39, 0  ;;  %vm10281_vm12 = vsmask.f32 256  ;;  %v6483_v0 = vcombine.low %v7906_v1, %v2884_v36  ;;  %v6484_v39 = vcombine.low %v7906_v1, %v2886_v12  ;;  %v10290_v36 = vld [vmem:[#allocation15_spill] sm:$0xff]  ;;  %v10302_v12 = vld [vmem:[#allocation36_spill] sm:$0xff] }
 0x154   : > { %v10277_v34 = vsel %vm8893_vm2, 4294967295, %v10276_v34  ;;  %v8906_v38 = vsel %vm10281_vm12, %v10280_v16, %v1643_v7  ;;  %v6485_v3 = vcombine.low %v7906_v1, %v2888_v15  ;;  %v1974_v16 = vsel %vm10252_vm8, %v10290_v36, 0  ;;  %v10295_v15 = vld [vmem:[#allocation41_spill] sm:$0xff]  ;;  %v10317_v36 = vld [vmem:[#allocation27_spill] sm:$0xff] }
 0x155   : > { %10282 = vst [vmem:[#allocation18_spill] sm:$0xff] %v8906_v38  ;;  %vm10292_vm2 = vcmask 1041408   ;;  %vm10298_vm3 = vcmask 31744   ;;  %v1975_v7 = vsel %vm10273_vm13, %v8906_v38, 0  ;;  %vm10303_vm10 = vnez %v10302_v12 }
 0x156   : > { %v4160_v31 = vsel %vm10292_vm2, %v10291_v51, 0  ;;  %6997 = vmatmul.mubr.msk.bf16.gmra.mrb[36].mxu0 %vm10298_vm3, %v1974_v16  ;;  %vm8943_vm2 = vcmp.ne.s16.totalorder %v6482_v13, 0  ;;  %v10300_v51 = vmov 0  ;;  %vm10305_vm6 = vmmov %vm10298_vm3  ;;  %vm8956_vm12 = vcmp.ne.s16.totalorder %v6483_v0, 0  ;;  %v10318_v16 = vld [vmem:[#allocation35_spill] sm:$0xff]  ;;  %v10323_v13 = vld [vmem:[#allocation45_spill] sm:$0xff] }
 0x157   : > { %v10301_v51 = vsel %vm8943_vm2, 4294967295, %v10300_v51  ;;  %7000 = vmatprep.mubr.msk.bf16.mxu0 %vm10298_vm3, %v1975_v7  ;;  %7129 = vmatmul.mubr.msk.bf16.vlgmr.msra.gmra.mrb[16].mxu1 %vm10305_vm6, %v10304_v50  ;;  %v10307_v49 = vsel %vm8956_vm12, 4294967295, %v10306_v49  ;;  %v10308_v7 = vld [vmem:[#allocation8_spill] sm:$0xff]  ;;  %vm8971_vm6 = vcmp.ne.s16.totalorder %v6484_v39, 0  ;;  %v10309_v0 = vmov 0 }
 0x158   : > { %7161 = vmatpush3.bf16.msra.mxu1 %v4160_v31  ;;  %7132 = vmatprep.mubr.msk.bf16.mxu1 %vm10298_vm3, %v10308_v7  ;;  %v10310_v0 = vsel %vm8971_vm6, 4294967295, %v10309_v0  ;;  %vm8975_vm14 = vcmp.ne.s16.totalorder %v6485_v3, 0  ;;  %v10311_v25 = vmov 0  ;;  %vm10313_vm13 = vcmask 1041408   ;;  %v10321_v31 = vld [vmem:[#allocation39_spill] sm:$0xff]  ;;  %v10333_v3 = vld [vmem:[#allocation14_spill] sm:$0xff] }
 0x159   : > { %v10312_v25 = vsel %vm8975_vm14, 4294967295, %v10311_v25  ;;  %7627 = vmatprep.subr.msk.bf16.mxu1 %vm10313_vm13, %v8941_v35  ;;  %v10319_v35 = vld [vmem:[#allocation37_spill] sm:$0xff]  ;;  %vm10320_vm13 = vnez %v10259_v56  ;;  %vm10322_vm3 = vnez %v10264_v24  ;;  %vm10324_vm8 = vnez %v10269_v47 }
 0x15a   : > { %v1976_v38 = vsel %vm10278_vm15, %v8744_v19, 0  ;;  %vm10326_vm0 = vcmask 31744   ;;  %v1977_v14 = vsel %vm10279_vm4, %v8776_v57, 0  ;;  %v1978_v8 = vsel %vm8719_vm11, %v8792_v2, 0 }
 0x15b   : > { %vm10327_vm2 = vmmov %vm10326_vm0  ;;  %v6439_v12 = vcombine.low %v7906_v1, %v7906_v1 }
 0x15c   : > { %vm10328_vm12 = vmmov %vm10326_vm0 }
 0x15d   : > { %vm10329_vm6 = vmmov %vm10326_vm0 }
 0x15e   : > { %7001 = vmatmul.mubr.msk.bf16.gmra.mrb[40].mxu0 %vm10326_vm0, %v1976_v38  ;;  %vm10330_vm14 = vmmov %vm10326_vm0  ;;  %vm10331_vm0 = vnez %v10285_v53 }
 0x15f   : > { %7004 = vmatprep.mubr.msk.bf16.mxu0 %vm10327_vm2, %v1977_v14  ;;  %7133 = vmatmul.mubr.msk.bf16.gmra.mrb[20].mxu1 %vm10328_vm12, %v8149_v33  ;;  %v1979_v38 = vsel %vm10331_vm0, %v8795_v22, 0  ;;  %vm10332_vm15 = vmmov %vm10327_vm2 }
 0x160   : > { %7136 = vmatprep.mubr.msk.bf16.mxu1 %vm10329_vm6, %v8232_v63  ;;  %vm10334_vm12 = vmmov %vm10327_vm2  ;;  %vm10335_vm6 = vnez %v10287_v45 }
 0x161   : > { %v1980_v14 = vsel %vm10335_vm6, %v10283_v30, 0  ;;  %vm10336_vm4 = vmmov %vm10327_vm2 }
 0x162   : > { %vm10338_vm11 = vmmov %vm10327_vm2 }
 0x163   : > { %vm10342_vm0 = vmmov %vm10327_vm2 }
 0x164   : > { %vm10344_vm6 = vmmov %vm10342_vm0 }
 0x166   : > { %7005 = vmatmul.mubr.msk.bf16.gmra.mrb[44].mxu0 %vm10330_vm14, %v1978_v8  ;;  %vm10337_vm14 = vnez %v10139_v55  ;;  %v10345_v55 = vld [vmem:[#allocation21_spill] sm:$0xff] }
 0x167   : > { %7008 = vmatprep.mubr.msk.bf16.mxu0 %vm10332_vm15, %v1979_v38  ;;  %7137 = vmatmul.mubr.msk.bf16.gmra.mrb[24].mxu1 %vm10327_vm2, %v10333_v3  ;;  %v1981_v8 = vsel %vm10337_vm14, %v10284_v43, 0  ;;  %vm10339_vm15 = vmmov %vm10327_vm2  ;;  %v10340_v38 = vld [vmem:[#allocation23_spill] sm:$0xff]  ;;  %vm10355_vm14 = vnez %v10177_v23 }
 0x168   : > { %7140 = vmatprep.mubr.msk.bf16.mxu1 %vm10334_vm12, %v8306_v48  ;;  %vm10341_vm12 = vnez %v10293_v21  ;;  %v10348_v43 = vld [vmem:[#allocation31_spill] sm:$0xff]  ;;  %v1984_v21 = vsel %vm10303_vm10, %v8637_v4, 0 }
 0x169   : > { %v1982_v39 = vsel %vm10341_vm12, %v8542_v37, 0  ;;  %vm10354_vm12 = vmmov %vm10342_vm0 }
 0x16e   : > { %7009 = vmatmul.mubr.msk.bf16.gmra.mrb[48].mxu0 %vm10336_vm4, %v1980_v14  ;;  %vm10343_vm4 = vnez %v10296_v27 }
 0x16f   : > { %7012 = vmatprep.mubr.msk.bf16.mxu0 %vm10338_vm11, %v1981_v8  ;;  %7141 = vmatmul.mubr.msk.bf16.gmra.mrb[28].mxu1 %vm10339_vm15, %v8298_v52  ;;  %v1983_v14 = vsel %vm10343_vm4, %v8524_v17, 0  ;;  %vm10346_vm11 = vmmov %vm10342_vm0  ;;  %v10347_v8 = vld [vmem:[#allocation3_spill] sm:$0xff] }
 0x170   : > { %7144 = vmatprep.mubr.msk.bf16.mxu1 %vm10327_vm2, %v10340_v38  ;;  %v672_v45 = vadd.s32 8, %v10347_v8  ;;  %vm10349_vm15 = vmmov %vm10342_vm0  ;;  %vm10350_vm2 = vnez %v10184_v28  ;;  %v10356_v28 = vld [vmem:[#allocation40_spill] sm:$0xff] }
 0x172   : > { %v714_v53 = vand.u32 15, %v672_v45  ;;  %v1986_v45 = vsel %vm10355_vm14, %v8741_v32, 0  ;;  %vm9103_vm14 = vcmp.ne.s16.totalorder %v6439_v12, 0  ;;  %v10362_v32 = vmov 0 }
 0x173   : > { %v10363_v32 = vsel %vm9103_vm14, 4294967295, %v10362_v32  ;;  %v9120_v12 = vsel %vm9103_vm14, %v10304_v50, 0  ;;  %v9137_v50 = vsel %vm9103_vm14, %v10308_v7, 0  ;;  %v9154_v7 = vld [vmem:[%s9851_s3 + $0xe] sm:$0x3] }
 0x174   : > { %vm1568_vm4 = vcmp.lt.s32.totalorder %v714_v53, 15  ;;  %v10360_v53 = vld [vmem:[#allocation43_spill] sm:$0xff]  ;;  %10364 = vst [vmem:[#allocation11_spill] sm:$0xff] %v10363_v32 }
 0x176   : > { %7013 = vmatmul.mubr.msk.bf16.gmra.mrb[52].mxu0 %vm10342_vm0, %v1982_v39  ;;  %v1985_v39 = vsel %vm10350_vm2, %v10295_v15, 0  ;;  %vm10357_vm2 = vnez %v10170_v54 }
 0x177   : > { %7016 = vmatprep.mubr.msk.bf16.mxu0 %vm10344_vm6, %v1983_v14  ;;  %7145 = vmatmul.mubr.msk.bf16.gmra.mrb[0].mxu1 %vm10346_vm11, %v10345_v55  ;;  %vm10351_vm6 = vmmov %vm10342_vm0  ;;  %v10352_v14 = vld [vmem:[#allocation28_spill] sm:$0xff] }
 0x178   : > { %7148 = vmatprep.mubr.msk.bf16.mxu1 %vm10349_vm15, %v10348_v43  ;;  %vm10353_vm11 = vmmov %vm10342_vm0 }
 0x179   : > { %vm3966_vm15 = vmpackc.low %vm1568_vm4, %vm1568_vm4 }
 0x17a   : > { %vm10361_vm4 = vmmov %vm10342_vm0 }
 0x17e   : > { %7017 = vmatmul.mubr.msk.bf16.gmra.mrb[56].mxu0 %vm10342_vm0, %v1984_v21  ;;  %v3998_v21 = vsel %vm3966_vm15, 65537, %v10121_v5  ;;  %vm10368_vm15 = vcmask 1041408  }
 0x17f   : > { %7020 = vmatprep.mubr.msk.bf16.mxu0 %vm10351_vm6, %v1985_v39  ;;  %7149 = vmatmul.mubr.msk.bf16.gmra.mrb[4].mxu1 %vm10353_vm11, %v10352_v14  ;;  %v2401_v39 = vsel %vm10357_vm2, %v10356_v28, 0  ;;  %vm10358_vm6 = vmmov %vm10342_vm0  ;;  %v6554_v23 = vcombine.low %v7906_v1, %v3998_v21  ;;  %v3022_v15 = vsel %vm10368_vm15, %v8784_v10, 0  ;;  %v10371_v21 = vld [vmem:[#allocation9_spill] sm:$0xff]  ;;  %v7675_v10 = vld [vmem:[%s9851_s3 + $0x6] sm:$0x3] }
 0x180   : > { %7152 = vmatprep.mubr.msk.bf16.mxu1 %vm10354_vm12, %v8538_v11  ;;  %vm10359_vm12 = vmmov %vm10342_vm0 }
 0x181   : > { %vm9107_vm11 = vcmp.ne.s16.totalorder %v6554_v23, 0 }
 0x182   : > { %v4093_v23 = vsel %vm9107_vm11, %v10371_v21, 0 }
 0x186   : > { %7021 = vmatmul.mubr.msk.bf16.gmra.mrb[60].mxu0 %vm10342_vm0, %v1986_v45  ;;  %v10365_v45 = vmov 0 }
 0x187   : > { %7026 = vmatprep.mubr.msk.bf16.mxu0 %vm10358_vm6, %v2401_v39  ;;  %7153 = vmatmul.mubr.msk.bf16.gmra.mrb[8].mxu1 %vm10359_vm12, %v8521_v18  ;;  %v10366_v45 = vsel %vm9107_vm11, 4294967295, %v10365_v45  ;;  %v2402_v39 = vsel %vm9103_vm14, %v8101_v62, 0  ;;  %vm10369_vm6 = vmmov %vm10342_vm0 }
 0x188   : > { %7156 = vmatprep.mubr.msk.bf16.mxu1 %vm10361_vm4, %v10360_v53  ;;  %10367 = vst [vmem:[#allocation32_spill] sm:$0xff] %v10366_v45  ;;  %vm10370_vm12 = vmmov %vm10342_vm0  ;;  %v10378_v45 = vld [vmem:[#allocation12_spill] sm:$0xff] }
 0x189   : > { %vm10372_vm4 = vmmov %vm10342_vm0 }
 0x18e   : > { %7027 = vmatmul.mubr.msk.bf16.vlgmr.msra.gmra.mrb[32].mxu0 %vm10342_vm0, %v2402_v39  ;;  %v10373_v39 = vld [vmem:[#allocation25_spill] sm:$0xff]  ;;  %vm10374_vm0 = vmmov %vm10368_vm15 }
 0x18f   : > { %7030 = vmatprep.mubr.msk.bf16.mxu0 %vm10369_vm6, %v9120_v12  ;;  %7157 = vmatmul.mubr.msk.bf16.gmra.mrb[12].mxu1 %vm10370_vm12, %v10356_v28  ;;  %v4646_v62 = vsel %vm10374_vm0, %v10373_v39, 0  ;;  %vm10375_vm6 = vmmov %vm10372_vm4  ;;  %vm10379_vm12 = vnez %v10378_v45  ;;  %v10381_v39 = vld [vmem:[#allocation16_spill] sm:$0xff] }
 0x190   : > { %7162 = vmatprep.mubr.msk.bf16.mxu1 %vm10372_vm4, %v4093_v23  ;;  %7059 = vmatpush3.bf16.msra.mxu0 %v3022_v15  ;;  %v9146_v15 = vsel %vm9103_vm14, %v8149_v33, 0  ;;  %v10377_v23 = vld [vmem:[#allocation13_spill] sm:$0xff]  ;;  %v4095_v28 = vsel %vm8808_vm7, %v10381_v39, 0  ;;  %vm10382_vm0 = vmmov %vm10372_vm4  ;;  %v9168_v33 = vsel %vm9103_vm14, %v8232_v63, 0 }
 0x191   : > { %7623 = vmatprep.subr.msk.bf16.mxu0 %vm10368_vm15, %v7675_v10  ;;  %10376 = vst [vmem:[#allocation34_spill] sm:$0xff] %v9146_v15  ;;  %v4094_v10 = vsel %vm10379_vm12, %v10377_v23, 0  ;;  %vm10380_vm15 = vmmov %vm10372_vm4 }
 0x192   : > { %vm10384_vm11 = vmmov %vm10382_vm0 }
 0x196   : > { %7031 = vmatmul.mubr.msk.bf16.gmra.mrb[36].mxu0 %vm10375_vm6, %v9137_v50  ;;  %vm10383_vm6 = vcmask 1041408  }
 0x197   : > { %7034 = vmatprep.mubr.msk.bf16.mxu0 %vm10372_vm4, %v9146_v15  ;;  %7163 = vmatmul.mubr.msk.bf16.vlgmr.msra.gmra.mrb[16].mxu1 %vm10380_vm15, %v4094_v10  ;;  %v9175_v10 = vsel %vm9103_vm14, %v10333_v3, 0  ;;  %v10386_v15 = vld [vmem:[#allocation19_spill] sm:$0xff]  ;;  %vm10387_vm4 = vmmov %vm10382_vm0  ;;  %v9190_v3 = vsel %vm9103_vm14, %v8306_v48, 0  ;;  %v4099_v48 = vsel %vm8848_vm1, %v10317_v36, 0 }
 0x198   : > { %7195 = vmatpush3.bf16.msra.mxu1 %v4646_v62  ;;  %7166 = vmatprep.mubr.msk.bf16.mxu1 %vm10382_vm0, %v4095_v28  ;;  %10385 = vst [vmem:[#allocation38_spill] sm:$0xff] %v9175_v10  ;;  %v4096_v62 = vsel %vm8815_vm5, %v10386_v15, 0  ;;  %vm10388_vm15 = vmmov %vm10382_vm0  ;;  %v10389_v28 = vld [vmem:[#allocation20_spill] sm:$0xff]  ;;  %vm10390_vm0 = vnez %v10246_v46 }
 0x199   : > { %7628 = vmatprep.subr.msk.bf16.mxu1 %vm10383_vm6, %v9154_v7  ;;  %v4097_v63 = vsel %vm10390_vm0, %v10389_v28, 0  ;;  %vm10391_vm6 = vmmov %vm10387_vm4 }
 0x19a   : > { %vm10404_vm10 = vmmov %vm10387_vm4 }
 0x19e   : > { %7035 = vmatmul.mubr.msk.bf16.gmra.mrb[40].mxu0 %vm10384_vm11, %v9168_v33  ;;  %vm10392_vm11 = vmmov %vm10387_vm4 }
 0x19f   : > { %7038 = vmatprep.mubr.msk.bf16.mxu0 %vm10387_vm4, %v9175_v10  ;;  %7167 = vmatmul.mubr.msk.bf16.gmra.mrb[20].mxu1 %vm10388_vm15, %v4096_v62  ;;  %v9197_v10 = vsel %vm9103_vm14, %v8298_v52, 0  ;;  %v4098_v62 = vsel %vm8829_vm9, %v10316_v58, 0  ;;  %vm10393_vm15 = vmmov %vm10387_vm4  ;;  %v9212_v52 = vsel %vm9103_vm14, %v10340_v38, 0  ;;  %v4101_v38 = vsel %vm10322_vm3, %v10319_v35, 0 }
 0x1a0   : > { %7170 = vmatprep.mubr.msk.bf16.mxu1 %vm10391_vm6, %v4097_v63  ;;  %vm10394_vm6 = vmmov %vm10387_vm4  ;;  %v9219_v63 = vsel %vm9103_vm14, %v10345_v55, 0  ;;  %v9234_v55 = vsel %vm9103_vm14, %v10348_v43, 0 }
 0x1a1   : > { %10396 = vst [vmem:[#allocation5_spill] sm:$0xff] %v9219_v63  ;;  %10399 = vst [vmem:[#allocation8_spill] sm:$0xff] %v9234_v55 }
 0x1a6   : > { %7039 = vmatmul.mubr.msk.bf16.gmra.mrb[44].mxu0 %vm10392_vm11, %v9190_v3  ;;  %vm10395_vm11 = vmmov %vm10387_vm4 }
 0x1a7   : > { %7042 = vmatprep.mubr.msk.bf16.mxu0 %vm10387_vm4, %v9197_v10  ;;  %7171 = vmatmul.mubr.msk.bf16.gmra.mrb[24].mxu1 %vm10393_vm15, %v4098_v62  ;;  %v4100_v62 = vsel %vm10320_vm13, %v10318_v16, 0  ;;  %vm10397_vm15 = vmmov %vm10387_vm4 }
 0x1a8   : > { %7174 = vmatprep.mubr.msk.bf16.mxu1 %vm10394_vm6, %v4099_v48  ;;  %vm10398_vm6 = vmmov %vm10387_vm4  ;;  %v9241_v48 = vsel %vm9103_vm14, %v10352_v14, 0  ;;  %v707_v14 = vand.u32 15, %v10347_v8 }
 0x1ae   : > { %7043 = vmatmul.mubr.msk.bf16.gmra.mrb[48].mxu0 %vm10395_vm11, %v9212_v52  ;;  %vm10400_vm11 = vmmov %vm10387_vm4 }
 0x1af   : > { %7046 = vmatprep.mubr.msk.bf16.mxu0 %vm10387_vm4, %v9219_v63  ;;  %7175 = vmatmul.mubr.msk.bf16.gmra.mrb[28].mxu1 %vm10397_vm15, %v4100_v62  ;;  %v4102_v62 = vsel %vm10324_vm8, %v10321_v31, 0  ;;  %v702_v63 = vadd.s32 248, %v10347_v8  ;;  %vm10401_vm15 = vmmov %vm10387_vm4  ;;  %vm10408_vm8 = vnez %v10307_v49  ;;  %v9281_v8 = vsel %vm9103_vm14, %v10360_v53, 0 }
 0x1b0   : > { %7178 = vmatprep.mubr.msk.bf16.mxu1 %vm10398_vm6, %v4101_v38  ;;  %vm10402_vm6 = vnez %v10277_v34 }
 0x1b1   : > { %v4103_v43 = vsel %vm10402_vm6, %v10323_v13, 0  ;;  %v924_v38 = vand.u32 15, %v702_v63  ;;  %vm10407_vm6 = vmmov %vm10404_vm10 }
 0x1b2   : > { %vm10409_vm3 = vmmov %vm10407_vm6 }
 0x1b6   : > { %7047 = vmatmul.mubr.msk.bf16.gmra.mrb[52].mxu0 %vm10400_vm11, %v9234_v55  ;;  %vm10403_vm11 = vmmov %vm10387_vm4  ;;  %v9258_v55 = vsel %vm9103_vm14, %v8538_v11, 0  ;;  %v4105_v11 = vsel %vm10408_vm8, %v8732_v9, 0 }
 0x1b7   : > { %7050 = vmatprep.mubr.msk.bf16.mxu0 %vm10387_vm4, %v9241_v48  ;;  %7179 = vmatmul.mubr.msk.bf16.gmra.mrb[0].mxu1 %vm10401_vm15, %v4102_v62  ;;  %v9265_v62 = vsel %vm9103_vm14, %v8521_v18, 0  ;;  %vm10405_vm4 = vnez %v10301_v51  ;;  %vm1598_vm15 = vcmp.lt.s32.totalorder %v924_v38, 15  ;;  %v2955_v38 = vsel %vm10357_vm2, %v8759_v59, 0  ;;  %v10583_v51 = vld [vmem:[#allocation51_spill] sm:$0xff] }
 0x1b8   : > { %7182 = vmatprep.mubr.msk.bf16.mxu1 %vm10403_vm11, %v4103_v43  ;;  %v4104_v43 = vsel %vm10405_vm4, %v8708_v40, 0  ;;  %vm10406_vm11 = vmmov %vm10404_vm10 }
 0x1b9   : > { %vm2858_vm13 = vmpackc.low %vm1598_vm15, %vm1598_vm15 }
 0x1ba   : > { %v2890_v18 = vsel %vm2858_vm13, 65537, %v10121_v5 }
 0x1be   : > { %7051 = vmatmul.mubr.msk.bf16.gmra.mrb[56].mxu0 %vm10404_vm10, %v9258_v55  ;;  %vm1535_vm10 = vcmp.gt.s32.totalorder %v707_v14, 0 }
 0x1bf   : > { %7054 = vmatprep.mubr.msk.bf16.mxu0 %vm10406_vm11, %v9265_v62  ;;  %7183 = vmatmul.mubr.msk.bf16.gmra.mrb[4].mxu1 %vm10407_vm6, %v4104_v43  ;;  %vm3281_vm1 = vmpackc.low %vm1535_vm10, %vm1535_vm10  ;;  %vm10414_vm11 = vnez %v10312_v25 }
 0x1c0   : > { %7186 = vmatprep.mubr.msk.bf16.mxu1 %vm10409_vm3, %v4105_v11  ;;  %v3313_v63 = vsel %vm3281_vm1, 65537, %v10121_v5  ;;  %vm10410_vm6 = vmmov %vm10409_vm3  ;;  %vm10411_vm3 = vnez %v10310_v0  ;;  %v4107_v53 = vsel %vm10414_vm11, %v8840_v44, 0  ;;  %v6486_v5 = vcombine.low %v7906_v1, %v2890_v18 }
 0x1c1   : > { %v4106_v14 = vsel %vm10411_vm3, %v8762_v6, 0  ;;  %vm10412_vm15 = vmmov %vm10410_vm6  ;;  %v6504_v43 = vcombine.low %v3313_v63, %v7906_v1  ;;  %v2957_v18 = vsel %vm8808_vm7, %v10377_v23, 0  ;;  %v10422_v63 = vld [vmem:[#allocation7_spill] sm:$0xff] }
 0x1c2   : > { %vm10413_vm13 = vmmov %vm10410_vm6  ;;  %vm9300_vm10 = vcmp.ne.s16.totalorder %v6486_v5, 0  ;;  %v2958_v5 = vsel %vm8815_vm5, %v10381_v39, 0  ;;  %vm10438_vm5 = vnez %v10255_v29 }
 0x1c3   : > { %vm10415_vm1 = vmmov %vm10410_vm6  ;;  %v4108_v1 = vsel %vm9300_vm10, %v8759_v59, 0  ;;  %v2960_v59 = vsel %vm8829_vm9, %v10389_v28, 0 }
 0x1c4   : > { %vm10423_vm14 = vmmov %vm10415_vm1 }
 0x1c5   : > { %vm10426_vm7 = vmmov %vm10415_vm1 }
 0x1c6   : > { %7055 = vmatmul.mubr.msk.bf16.gmra.mrb[60].mxu0 %vm10410_vm6, %v9281_v8  ;;  %vm9304_vm6 = vcmp.ne.s16.totalorder %v6504_v43, 0  ;;  %vm10442_vm2 = vmmov %vm10415_vm1 }
 0x1c7   : > { %7060 = vmatprep.mubr.msk.bf16.mxu0 %vm10412_vm15, %v2955_v38  ;;  %7187 = vmatmul.mubr.msk.bf16.gmra.mrb[8].mxu1 %vm10413_vm13, %v4106_v14  ;;  %v2956_v38 = vsel %vm10379_vm12, %v10371_v21, 0  ;;  %vm10420_vm15 = vmmov %vm10415_vm1  ;;  %v4579_v14 = vsel %vm9304_vm6, %v10422_v63, 0  ;;  %v10432_v21 = vld [vmem:[#allocation18_spill] sm:$0xff] }
 0x1c8   : > { %7190 = vmatprep.mubr.msk.bf16.mxu1 %vm10415_vm1, %v4107_v53  ;;  %vm10421_vm13 = vmmov %vm10415_vm1  ;;  %v10424_v53 = vld [vmem:[#allocation2_spill] sm:$0xff] }
 0x1c9   : > { %vm10448_vm9 = vmmov %vm10415_vm1 }
 0x1ce   : > { %7061 = vmatmul.mubr.msk.bf16.vlgmr.msra.gmra.mrb[32].mxu0 %vm10420_vm15, %v2956_v38  ;;  %vm10425_vm15 = vcmask 1041408   ;;  %v2959_v38 = vsel %vm10390_vm0, %v10386_v15, 0  ;;  %vm10436_vm0 = vcmask 1041408  }
 0x1cf   : > { %7064 = vmatprep.mubr.msk.bf16.mxu0 %vm10421_vm13, %v2957_v18  ;;  %7191 = vmatmul.mubr.msk.bf16.gmra.mrb[12].mxu1 %vm10415_vm1, %v4108_v1  ;;  %v5100_v43 = vsel %vm10425_vm15, %v9154_v7, 0  ;;  %v6669_v18 = vld [vmem:[%s9851_s3 + $0x10] sm:$0x3]  ;;  %v10433_v7 = vld [vmem:[#allocation42_spill] sm:$0xff] }
 0x1d0   : > { %7196 = vmatprep.mubr.msk.bf16.mxu1 %vm10423_vm14, %v4579_v14  ;;  %7093 = vmatpush3.bf16.msra.mxu0 %v10424_v53  ;;  %vm10427_vm14 = vmmov %vm10415_vm1  ;;  %v10428_v1 = vld [vmem:[#allocation4_spill] sm:$0xff]  ;;  %v10430_v14 = vld [vmem:[#allocation15_spill] sm:$0xff]  ;;  %vm10434_vm15 = vnez %v10433_v7 }
 0x1d1   : > { %vm10429_vm13 = vnez %v10428_v1  ;;  %v3411_v32 = vsel %vm10434_vm15, %v10430_v14, 0  ;;  %v10512_v7 = vld [vmem:[#allocation34_spill] sm:$0xff] }
 0x1d2   : > { %v10431_v53 = vsel %vm10429_vm13, %v10430_v14, 0  ;;  %v10499_v11 = vsel %vm10429_vm13, %v10422_v63, 0 }
 0x1d6   : > { %7065 = vmatmul.mubr.msk.bf16.gmra.mrb[36].mxu0 %vm10426_vm7, %v2958_v5  ;;  %v4581_v5 = vsel %vm10434_vm15, %v10432_v21, 0  ;;  %vm10435_vm7 = vmmov %vm10415_vm1 }
 0x1d7   : > { %7068 = vmatprep.mubr.msk.bf16.mxu0 %vm10427_vm14, %v2959_v38  ;;  %7197 = vmatmul.mubr.msk.bf16.vlgmr.msra.gmra.mrb[16].mxu1 %vm10415_vm1, %v10431_v53  ;;  %vm10437_vm14 = vmmov %vm10415_vm1  ;;  %v2961_v38 = vsel %vm10438_vm5, %v10316_v58, 0  ;;  %v10439_v53 = vld [vmem:[#allocation46_spill] sm:$0xff] }
 0x1d8   : > { %7229 = vmatpush3.bf16.msra.mxu1 %v5100_v43  ;;  %7200 = vmatprep.mubr.msk.bf16.mxu1 %vm10435_vm7, %v4581_v5  ;;  %vm10440_vm12 = vnez %v10439_v53  ;;  %v10443_v5 = vld [vmem:[#allocation47_spill] sm:$0xff]  ;;  %vm10446_vm7 = vmmov %vm10415_vm1  ;;  %vm10506_vm13 = vnez %v10439_v53 }
 0x1d9   : > { %7629 = vmatprep.subr.msk.bf16.mxu1 %vm10436_vm0, %v6669_v18  ;;  %v10441_v43 = vsel %vm10440_vm12, %v8744_v19, 0  ;;  %vm10444_vm0 = vnez %v10443_v5  ;;  %vm10450_vm5 = vmmov %vm10442_vm2  ;;  %v10507_v63 = vsel %vm10506_vm13, %v10432_v21, 0  ;;  %vm10509_vm15 = vnez %v10443_v5 }
 0x1da   : > { %v10445_v46 = vsel %vm10444_vm0, %v8776_v57, 0  ;;  %vm10453_vm12 = vmmov %vm10450_vm5  ;;  %v10510_v14 = vsel %vm10509_vm15, %v8744_v19, 0  ;;  %v10521_v19 = vld [vmem:[#allocation38_spill] sm:$0xff] }
 0x1db   : > { %vm10456_vm0 = vmmov %vm10450_vm5 }
 0x1de   : > { %7069 = vmatmul.mubr.msk.bf16.gmra.mrb[40].mxu0 %vm10437_vm14, %v2960_v59  ;;  %vm10447_vm14 = vnez %v10259_v56 }
 0x1df   : > { %7072 = vmatprep.mubr.msk.bf16.mxu0 %vm10415_vm1, %v2961_v38  ;;  %7201 = vmatmul.mubr.msk.bf16.gmra.mrb[20].mxu1 %vm10442_vm2, %v10441_v43  ;;  %v2962_v59 = vsel %vm10447_vm14, %v10317_v36, 0  ;;  %vm10449_vm1 = vnez %v10264_v24  ;;  %vm10451_vm2 = vnez %v10209_v42  ;;  %vm10458_vm14 = vmmov %vm10456_vm0  ;;  %v10464_v24 = vld [vmem:[#allocation24_spill] sm:$0xff] }
 0x1e0   : > { %7204 = vmatprep.mubr.msk.bf16.mxu1 %vm10446_vm7, %v10445_v46  ;;  %v2963_v38 = vsel %vm10449_vm1, %v10318_v16, 0  ;;  %v10452_v43 = vsel %vm10451_vm2, %v8792_v2, 0  ;;  %vm10454_vm7 = vnez %v10212_v61  ;;  %vm10460_vm1 = vmmov %vm10456_vm0 }
 0x1e1   : > { %v10455_v46 = vsel %vm10454_vm7, %v8795_v22, 0  ;;  %vm10463_vm2 = vmmov %vm10456_vm0 }
 0x1e2   : > { %vm10468_vm7 = vmmov %vm10460_vm1 }
 0x1e6   : > { %7073 = vmatmul.mubr.msk.bf16.gmra.mrb[44].mxu0 %vm10448_vm9, %v2962_v59  ;;  %vm10457_vm9 = vnez %v10269_v47  ;;  %v10577_v47 = vsel %vm10405_vm4, %v8732_v9, 0 }
 0x1e7   : > { %7076 = vmatprep.mubr.msk.bf16.mxu0 %vm10450_vm5, %v2963_v38  ;;  %7205 = vmatmul.mubr.msk.bf16.gmra.mrb[24].mxu1 %vm10453_vm12, %v10452_v43  ;;  %v2964_v59 = vsel %vm10457_vm9, %v10319_v35, 0  ;;  %vm10459_vm5 = vnez %v10277_v34  ;;  %vm10461_vm12 = vnez %v10218_v20  ;;  %v10535_v20 = vld [vmem:[#allocation40_spill] sm:$0xff] }
 0x1e8   : > { %7208 = vmatprep.mubr.msk.bf16.mxu1 %vm10456_vm0, %v10455_v46  ;;  %v2965_v38 = vsel %vm10459_vm5, %v10321_v31, 0  ;;  %v10462_v43 = vsel %vm10461_vm12, %v10283_v30, 0  ;;  %vm10465_vm0 = vnez %v10464_v24  ;;  %v10466_v46 = vld [vmem:[#allocation29_spill] sm:$0xff]  ;;  %v10470_v30 = vld [vmem:[#allocation22_spill] sm:$0xff]  ;;  %vm10473_vm5 = vmmov %vm10460_vm1 }
 0x1e9   : > { %v10467_v56 = vsel %vm10465_vm0, %v10466_v46, 0  ;;  %vm10477_vm0 = vmmov %vm10460_vm1  ;;  %v2968_v46 = vsel %vm10411_vm3, %v8732_v9, 0  ;;  %v10586_v9 = vld [vmem:[#allocation9_spill] sm:$0xff] }
 0x1ea   : > { %vm10519_vm13 = vmmov %vm10477_vm0 }
 0x1eb   : > { %vm10522_vm15 = vmmov %vm10477_vm0 }
 0x1ee   : > { %7077 = vmatmul.mubr.msk.bf16.gmra.mrb[48].mxu0 %vm10458_vm14, %v2964_v59  ;;  %v2966_v59 = vsel %vm10405_vm4, %v10323_v13, 0  ;;  %vm10469_vm14 = vmmov %vm10460_vm1 }
 0x1ef   : > { %7080 = vmatprep.mubr.msk.bf16.mxu0 %vm10460_vm1, %v2965_v38  ;;  %7209 = vmatmul.mubr.msk.bf16.gmra.mrb[28].mxu1 %vm10463_vm2, %v10462_v43  ;;  %v2967_v38 = vsel %vm10408_vm8, %v8708_v40, 0  ;;  %vm10471_vm2 = vnez %v10470_v30  ;;  %v10474_v43 = vld [vmem:[#allocation33_spill] sm:$0xff] }
 0x1f0   : > { %7212 = vmatprep.mubr.msk.bf16.mxu1 %vm10468_vm7, %v10467_v56  ;;  %v10472_v24 = vsel %vm10471_vm2, %v8542_v37, 0  ;;  %vm10475_vm7 = vnez %v10474_v43  ;;  %v10480_v37 = vld [vmem:[#allocation30_spill] sm:$0xff]  ;;  %vm10483_vm2 = vmmov %vm10477_vm0  ;;  %v10488_v43 = vld [vmem:[#allocation48_spill] sm:$0xff] }
 0x1f1   : > { %v10476_v56 = vsel %vm10475_vm7, %v8524_v17, 0  ;;  %vm10484_vm7 = vnez %v10296_v27  ;;  %v10485_v17 = vld [vmem:[#allocation41_spill] sm:$0xff] }
 0x1f2   : > { %v10486_v30 = vsel %vm10484_vm7, %v10485_v17, 0 }
 0x1f6   : > { %7081 = vmatmul.mubr.msk.bf16.gmra.mrb[52].mxu0 %vm10469_vm14, %v2966_v59  ;;  %vm10478_vm14 = vmmov %vm10477_vm0  ;;  %v2969_v59 = vsel %vm10414_vm11, %v8762_v6, 0 }
 0x1f7   : > { %7084 = vmatprep.mubr.msk.bf16.mxu0 %vm10460_vm1, %v2967_v38  ;;  %7213 = vmatmul.mubr.msk.bf16.gmra.mrb[0].mxu1 %vm10473_vm5, %v10472_v24  ;;  %vm10479_vm1 = vmmov %vm10477_vm0  ;;  %vm10481_vm5 = vnez %v10480_v37  ;;  %v2970_v24 = vsel %vm9300_vm10, %v8840_v44, 0  ;;  %v10497_v37 = vld [vmem:[#allocation49_spill] sm:$0xff] }
 0x1f8   : > { %7216 = vmatprep.mubr.msk.bf16.mxu1 %vm10477_vm0, %v10476_v56  ;;  %v10482_v38 = vsel %vm10481_vm5, %v8637_v4, 0  ;;  %v3409_v56 = vsel %vm9304_vm6, %v10488_v43, 0  ;;  %v10490_v4 = vld [vmem:[#allocation36_spill] sm:$0xff]  ;;  %vm10500_vm10 = vmmov %vm10477_vm0  ;;  %vm10501_vm6 = vnez %v10170_v54 }
 0x1f9   : > { %vm10491_vm5 = vnez %v10490_v4  ;;  %v4594_v17 = vsel %vm10501_vm6, %v10488_v43, 0  ;;  %v5534_v49 = vsel %vm10501_vm6, %v10586_v9, 0 }
 0x1fe   : > { %7085 = vmatmul.mubr.msk.bf16.gmra.mrb[56].mxu0 %vm10478_vm14, %v2968_v46  ;;  %vm10487_vm14 = vmmov %vm10477_vm0  ;;  %v10492_v46 = vld [vmem:[#allocation50_spill] sm:$0xff] }
 0x1ff   : > { %7088 = vmatprep.mubr.msk.bf16.mxu0 %vm10479_vm1, %v2969_v59  ;;  %7217 = vmatmul.mubr.msk.bf16.gmra.mrb[4].mxu1 %vm10483_vm2, %v10482_v38  ;;  %vm10489_vm1 = vmmov %vm10477_vm0  ;;  %v10493_v27 = vsel %vm10491_vm5, %v10492_v46, 0  ;;  %v10495_v59 = vld [vmem:[#allocation44_spill] sm:$0xff] }
 0x200   : > { %7220 = vmatprep.mubr.msk.bf16.mxu1 %vm10477_vm0, %v10486_v30  ;;  %vm10494_vm2 = vmmov %vm10477_vm0  ;;  %vm10496_vm7 = vnez %v10495_v59 }
 0x201   : > { %v10498_v38 = vsel %vm10496_vm7, %v10497_v37, 0  ;;  %vm10504_vm5 = vmmov %vm10477_vm0 }
 0x202   : > { %vm10508_vm7 = vmmov %vm10477_vm0 }
 0x206   : > { %7089 = vmatmul.mubr.msk.bf16.gmra.mrb[60].mxu0 %vm10487_vm14, %v2970_v24  ;;  %vm10502_vm14 = vmmov %vm10477_vm0 }
 0x207   : > { %7094 = vmatprep.mubr.msk.bf16.mxu0 %vm10489_vm1, %v3409_v56  ;;  %7221 = vmatmul.mubr.msk.bf16.gmra.mrb[8].mxu1 %vm10494_vm2, %v10493_v27  ;;  %vm10503_vm1 = vmmov %vm10477_vm0  ;;  %vm10505_vm2 = vcmask 1041408  }
 0x208   : > { %7224 = vmatprep.mubr.msk.bf16.mxu1 %vm10477_vm0, %v10498_v38  ;;  %v5586_v1 = vsel %vm10505_vm2, %v6669_v18, 0  ;;  %vm10517_vm2 = vnez %v10212_v61  ;;  %v10527_v61 = vld [vmem:[#allocation5_spill] sm:$0xff] }
 0x209   : > { %v10518_v21 = vsel %vm10517_vm2, %v8792_v2, 0  ;;  %vm10530_vm2 = vmmov %vm10477_vm0  ;;  %v10536_v2 = vld [vmem:[#allocation11_spill] sm:$0xff] }
 0x20e   : > { %7095 = vmatmul.mubr.msk.bf16.vlgmr.msra.gmra.mrb[32].mxu0 %vm10500_vm10, %v10499_v11  ;;  %vm10511_vm10 = vmmov %vm10477_vm0 }
 0x20f   : > { %7098 = vmatprep.mubr.msk.bf16.mxu0 %vm10502_vm14, %v3411_v32  ;;  %7225 = vmatmul.mubr.msk.bf16.gmra.mrb[12].mxu1 %vm10503_vm1, %v4594_v17  ;;  %vm10513_vm14 = vmmov %vm10477_vm0  ;;  %vm10514_vm1 = vnez %v10209_v42  ;;  %v10523_v42 = vsel %vm10461_vm12, %v8795_v22, 0 }
 0x210   : > { %7230 = vmatprep.mubr.msk.bf16.mxu1 %vm10504_vm5, %v9120_v12  ;;  %v10515_v12 = vsel %vm10514_vm1, %v8776_v57, 0  ;;  %vm10516_vm5 = vmmov %vm10477_vm0  ;;  %v10529_v57 = vld [vmem:[#allocation8_spill] sm:$0xff] }
 0x211   : > { %vm10526_vm1 = vmmov %vm10477_vm0 }
 0x212   : > { %vm10532_vm12 = vmmov %vm10477_vm0 }
 0x216   : > { %7099 = vmatmul.mubr.msk.bf16.gmra.mrb[36].mxu0 %vm10508_vm7, %v10507_v63  ;;  %vm10520_vm7 = vmmov %vm10477_vm0 }
 0x217   : > { %7102 = vmatprep.mubr.msk.bf16.mxu0 %vm10477_vm0, %v10510_v14  ;;  %7231 = vmatmul.mubr.msk.bf16.vlgmr.msra.gmra.mrb[16].mxu1 %vm10511_vm10, %v9137_v50  ;;  %vm10524_vm10 = vmmov %vm10477_vm0  ;;  %v10539_v50 = vld [vmem:[#allocation6_spill] sm:$0xff] }
 0x218   : > { %7263 = vmatpush3.bf16.msra.mxu1 %v5586_v1  ;;  %7234 = vmatprep.mubr.msk.bf16.mxu1 %vm10513_vm14, %v10512_v7  ;;  %vm10525_vm14 = vmmov %vm10477_vm0 }
 0x21e   : > { %7103 = vmatmul.mubr.msk.bf16.gmra.mrb[40].mxu0 %vm10516_vm5, %v10515_v12  ;;  %vm10528_vm5 = vmmov %vm10477_vm0 }
 0x21f   : > { %7106 = vmatprep.mubr.msk.bf16.mxu0 %vm10519_vm13, %v10518_v21  ;;  %7235 = vmatmul.mubr.msk.bf16.gmra.mrb[20].mxu1 %vm10520_vm7, %v9168_v33  ;;  %vm10531_vm13 = vmmov %vm10477_vm0  ;;  %v5048_v33 = vsel %vm10501_vm6, %v10539_v50, 0 }
 0x220   : > { %7238 = vmatprep.mubr.msk.bf16.mxu1 %vm10522_vm15, %v10521_v19  ;;  %vm10533_vm7 = vmmov %vm10477_vm0 }
 0x221   : > { %vm10534_vm15 = vmmov %vm10477_vm0 }
 0x226   : > { %7107 = vmatmul.mubr.msk.bf16.gmra.mrb[44].mxu0 %vm10477_vm0, %v10523_v42  ;;  %vm10537_vm0 = vnez %v10536_v2  ;;  %v9653_v42 = vld [vmem:[%s9852_s4] ss:$0 sm:$0xff] }
 0x227   : > { %7239 = vmatmul.mubr.msk.bf16.gmra.mrb[24].mxu1 %vm10524_vm10, %v9190_v3  ;;  %v5047_v22 = vsel %vm10537_vm0, %v10535_v20, 0  ;;  %vm10538_vm10 = vmmov %vm10526_vm1 }
 0x228   : > { %7242 = vmatprep.mubr.msk.bf16.mxu1 %vm10525_vm14, %v9197_v10  ;;  %vm10540_vm14 = vmmov %vm10526_vm1  ;;  %v10541_v10 = vld [vmem:[#allocation32_spill] sm:$0xff] }
 0x22f   : > { %7243 = vmatmul.mubr.msk.bf16.gmra.mrb[28].mxu1 %vm10526_vm1, %v9212_v52  ;;  %vm10542_vm1 = vnez %v10541_v10 }
 0x230   : > { %7246 = vmatprep.mubr.msk.bf16.mxu1 %vm10528_vm5, %v10527_v61  ;;  %v5519_v3 = vsel %vm10542_vm1, %v10377_v23, 0  ;;  %vm10543_vm5 = vmmov %vm10530_vm2  ;;  %v10553_v23 = vld [vmem:[#allocation52_spill] sm:$0xff]  ;;  %vm10557_vm1 = vnez %v10250_v41 }
 0x231   : > { %vm10552_vm0 = vmmov %vm10543_vm5 }
 0x232   : > { %vm10585_vm4 = vmmov %vm10552_vm0 }
 0x233   : > { %vm10591_vm6 = vmmov %vm10552_vm0 }
 0x237   : > { %7247 = vmatmul.mubr.msk.bf16.gmra.mrb[0].mxu1 %vm10530_vm2, %v10529_v57  ;;  %vm10544_vm2 = vnez %v10378_v45 }
 0x238   : > { %7250 = vmatprep.mubr.msk.bf16.mxu1 %vm10531_vm13, %v9241_v48  ;;  %v10545_v52 = vsel %vm10544_vm2, %v10381_v39, 0  ;;  %vm10546_vm13 = vmmov %vm10543_vm5  ;;  %vm10560_vm2 = vnez %v10255_v29  ;;  %v10570_v29 = vsel %vm10457_vm9, %v10323_v13, 0  ;;  %v10584_v13 = vsel %vm10414_vm11, %v10583_v51, 0 }
 0x239   : > { %vm10578_vm9 = vmmov %vm10552_vm0 }
 0x23a   : > { %vm10590_vm11 = vmmov %vm10552_vm0 }
 0x23f   : > { %7251 = vmatmul.mubr.msk.bf16.gmra.mrb[4].mxu1 %vm10532_vm12, %v9258_v55  ;;  %vm10547_vm12 = vnez %v10240_v60  ;;  %v10558_v60 = vsel %vm10557_vm1, %v10317_v36, 0  ;;  %vm10574_vm1 = vmmov %vm10552_vm0 }
 0x240   : > { %7254 = vmatprep.mubr.msk.bf16.mxu1 %vm10533_vm7, %v9265_v62  ;;  %v10548_v55 = vsel %vm10547_vm12, %v10386_v15, 0  ;;  %vm10549_vm7 = vmmov %vm10543_vm5  ;;  %v10563_v15 = vld [vmem:[#allocation10_spill] sm:$0xff] }
 0x241   : > { %vm10564_vm12 = vnez %v10563_v15 }
 0x242   : > { %v10565_v39 = vsel %vm10564_vm12, %v10319_v35, 0  ;;  %v5829_v35 = vld [vmem:[%s9853_s5] sm:$0x3]  ;;  %vm10582_vm12 = vmmov %vm10552_vm0 }
 0x247   : > { %7255 = vmatmul.mubr.msk.bf16.gmra.mrb[8].mxu1 %vm10534_vm15, %v9281_v8  ;;  %vm10550_vm15 = vnez %v10243_v26  ;;  %v10561_v26 = vsel %vm10560_vm2, %v10318_v16, 0 }
 0x248   : > { %7258 = vmatprep.mubr.msk.bf16.mxu1 %vm10538_vm10, %v5047_v22  ;;  %v10551_v48 = vsel %vm10550_vm15, %v10389_v28, 0  ;;  %vm10554_vm10 = vnez %v10553_v23 }
 0x249   : > { %v10555_v45 = vsel %vm10554_vm10, %v10316_v58, 0  ;;  %v10567_v58 = vld [vmem:[#allocation17_spill] sm:$0xff]  ;;  %vm10571_vm10 = vmmov %vm10552_vm0 }
 0x24a   : > { %vm10568_vm15 = vnez %v10567_v58 }
 0x24b   : > { %v10569_v41 = vsel %vm10568_vm15, %v10321_v31, 0  ;;  %vm10592_vm15 = vmmov %vm10552_vm0 }
 0x24f   : > { %7259 = vmatmul.mubr.msk.bf16.gmra.mrb[12].mxu1 %vm10540_vm14, %v5048_v33  ;;  %vm10556_vm14 = vmmov %vm10552_vm0 }
 0x250   : > { %7264 = vmatprep.mubr.msk.bf16.mxu1 %vm10543_vm5, %v5519_v3  ;;  %vm10559_vm5 = vmmov %vm10552_vm0 }
 0x257   : > { %7265 = vmatmul.mubr.msk.bf16.vlgmr.msra.gmra.mrb[16].mxu1 %vm10546_vm13, %v10545_v52  ;;  %vm10562_vm13 = vmmov %vm10552_vm0 }
 0x258   : > { %7268 = vmatprep.mubr.msk.bf16.mxu1 %vm10549_vm7, %v10548_v55  ;;  %vm10566_vm7 = vmmov %vm10552_vm0 }
 0x25f   : > { %7269 = vmatmul.mubr.msk.bf16.gmra.mrb[20].mxu1 %vm10552_vm0, %v10551_v48 }
 0x260   : > { %7272 = vmatprep.mubr.msk.bf16.mxu1 %vm10556_vm14, %v10555_v45  ;;  %vm10572_vm14 = vnez %v10277_v34  ;;  %v10581_v34 = vsel %vm10411_vm3, %v8840_v44, 0  ;;  %vm10589_vm3 = vmmov %vm10552_vm0 }
 0x261   : > { %v10573_v36 = vsel %vm10572_vm14, %v8708_v40, 0  ;;  %v10579_v40 = vsel %vm10408_vm8, %v8762_v6, 0  ;;  %vm10588_vm8 = vmmov %vm10552_vm0 }
 0x262   : > { %vm10594_vm14 = vmmov %vm10552_vm0 }
 0x267   : > { %7273 = vmatmul.mubr.msk.bf16.gmra.mrb[24].mxu1 %vm10559_vm5, %v10558_v60  ;;  %vm10575_vm5 = vcmask 1041408  }
 0x268   : > { %7276 = vmatprep.mubr.msk.bf16.mxu1 %vm10562_vm13, %v10561_v26  ;;  %7630 = vmatprep.subr.msk.bf16.mxu0 %vm10575_vm5, %v5829_v35  ;;  %vm10576_vm2 = vmmov %vm10575_vm5 }
 0x269   : > { %v5886_v16 = vsel %vm10576_vm2, %v5829_v35, 0  ;;  %vm10580_vm13 = vmmov %vm10552_vm0 }
 0x26a   : > { %7297 = vmatpush3.bf16.msra.mxu0 %v5886_v16  ;;  %vm10596_vm5 = vmmov %vm10552_vm0 }
 0x26b   : > { %vm10597_vm2 = vmmov %vm10552_vm0 }
 0x26f   : > { %7277 = vmatmul.mubr.msk.bf16.gmra.mrb[28].mxu1 %vm10566_vm7, %v10565_v39  ;;  %vm10587_vm7 = vmmov %vm10552_vm0 }
 0x270   : > { %7280 = vmatprep.mubr.msk.bf16.mxu1 %vm10552_vm0, %v10569_v41 }
 0x277   : > { %7281 = vmatmul.mubr.msk.bf16.gmra.mrb[0].mxu1 %vm10571_vm10, %v10570_v29  ;;  %vm10593_vm10 = vmmov %vm10552_vm0 }
 0x278   : > { %7284 = vmatprep.mubr.msk.bf16.mxu1 %vm10574_vm1, %v10573_v36  ;;  %vm10595_vm1 = vmmov %vm10552_vm0 }
 0x27f   : > { %7285 = vmatmul.mubr.msk.bf16.gmra.mrb[4].mxu1 %vm10578_vm9, %v10577_v47  ;;  %vm10598_vm9 = vmmov %vm10552_vm0 }
 0x280   : > { %7288 = vmatprep.mubr.msk.bf16.mxu1 %vm10580_vm13, %v10579_v40  ;;  %vm10599_vm13 = vmmov %vm10552_vm0 }
 0x287   : > { %7289 = vmatmul.mubr.msk.bf16.gmra.mrb[8].mxu1 %vm10582_vm12, %v10581_v34  ;;  %vm10600_vm12 = vmmov %vm10552_vm0 }
 0x288   : > { %7292 = vmatprep.mubr.msk.bf16.mxu1 %vm10585_vm4, %v10584_v13  ;;  %vm10601_vm4 = vmmov %vm10552_vm0 }
 0x28f   : > { %7293 = vmatmul.mubr.msk.bf16.gmra.mrb[12].mxu1 %vm10587_vm7, %v5534_v49  ;;  %vm10602_vm7 = vmmov %vm10552_vm0 }
 0x2c1   : > { %v9614_v6 = vpop.f32.mrb[48].mxu0 }
 0x2c2   : > { %v9616_v31 = vpop.f32.mrb[49].mxu0 }
 0x2c3   : > { %v9618_v0 = vpop.f32.mrb[50].mxu0 }
 0x2c4   : > { %v9620_v44 = vpop.f32.mrb[51].mxu0 }
 0x2c9   : > { %v9622_v28 = vpop.f32.mrb[52].mxu0 }
 0x2ca   : > { %v9624_v25 = vpop.f32.mrb[53].mxu0 }
 0x2cb   : > { %v9626_v62 = vpop.f32.mrb[54].mxu0 }
 0x2cc   : > { %v9628_v8 = vpop.f32.mrb[55].mxu0 }
 0x2d1   : > { %v9630_v54 = vpop.f32.mrb[56].mxu0 }
 0x2d2   : > { %v9632_v18 = vpop.f32.mrb[57].mxu0 }
 0x2d3   : > { %v9634_v53 = vpop.f32.mrb[58].mxu0 }
 0x2d4   : > { %v9636_v5 = vpop.f32.mrb[59].mxu0 }
 0x2d9   : > { %v9638_v30 = vpop.f32.mrb[60].mxu0 }
 0x2da   : > { %v9640_v24 = vpop.f32.mrb[61].mxu0 }
 0x2db   : > { %v9642_v43 = vpop.f32.mrb[62].mxu0 }
 0x2dc   : > { %v9644_v56 = vpop.f32.mrb[63].mxu0 }
 0x2e1   : > { %v7096_v4 = vpop.f32.mrb[32].mxu0 }
 0x2e2   : > { %v3512_v46 = vpop.f32.mrb[33].mxu0  ;;  %v7332_v61 = vadd.f32 %v7096_v4, %v9653_v42 }
 0x2e3   : > { %v7097_v27 = vpop.f32.mrb[34].mxu0  ;;  %v7334_v57 = vadd.f32 %v9653_v42, %v3512_v46 }
 0x2e4   : > { %v3515_v59 = vpop.f32.mrb[35].mxu0  ;;  %v7336_v2 = vadd.f32 %v7097_v27, %v9653_v42 }
 0x2e5   : > { %v7338_v33 = vadd.f32 %v9653_v42, %v3515_v59 }
 0x2e9   : > { %v7100_v37 = vpop.f32.mrb[36].mxu0 }
 0x2ea   : > { %v3528_v38 = vpop.f32.mrb[37].mxu0  ;;  %v7340_v15 = vadd.f32 %v7100_v37, %v9653_v42 }
 0x2eb   : > { %v7101_v11 = vpop.f32.mrb[38].mxu0  ;;  %v7342_v58 = vadd.f32 %v9653_v42, %v3528_v38 }
 0x2ec   : > { %v3531_v32 = vpop.f32.mrb[39].mxu0  ;;  %v7344_v36 = vadd.f32 %v7101_v11, %v9653_v42 }
 0x2ed   : > { %v7346_v47 = vadd.f32 %v9653_v42, %v3531_v32 }
 0x2f1   : > { %v7104_v17 = vpop.f32.mrb[40].mxu0 }
 0x2f2   : > { %v3544_v1 = vpop.f32.mrb[41].mxu0  ;;  %v7348_v59 = vadd.f32 %v7104_v17, %v9653_v42 }
 0x2f3   : > { %v7105_v63 = vpop.f32.mrb[42].mxu0  ;;  %v7350_v38 = vadd.f32 %v9653_v42, %v3544_v1 }
 0x2f4   : > { %v3547_v14 = vpop.f32.mrb[43].mxu0 }
 0x2f9   : > { %v7108_v7 = vpop.f32.mrb[44].mxu0 }
 0x2fa   : > { %v3560_v12 = vpop.f32.mrb[45].mxu0 }
 0x2fb   : > { %v9646_v21 = vpop.f32.mrb[46].mxu0 }
 0x2fc   : > { %v9648_v19 = vpop.f32.mrb[47].mxu0 }
 0x32a   : > { %v7266_v20 = vpop.f32.mrb[16].mxu1 }
 0x32b   : > { %v7333_v22 = vadd.f32 %v7332_v61, %v7266_v20  ;;  %v5622_v50 = vpop.f32.mrb[17].mxu1  ;;  %v7352_v61 = vadd.f32 %v7105_v63, %v9653_v42 }
 0x32c   : > { %v7335_v10 = vadd.f32 %v7334_v57, %v5622_v50  ;;  %v7267_v3 = vpop.f32.mrb[18].mxu1 }
 0x32d   : > { %v7337_v52 = vadd.f32 %v7336_v2, %v7267_v3  ;;  %v5625_v55 = vpop.f32.mrb[19].mxu1  ;;  %v5783_v23 = vmax.f32 %v7333_v22, 0.0  ;;  %v7354_v2 = vadd.f32 %v9653_v42, %v3547_v14 }
 0x32e   : > { %v7339_v48 = vadd.f32 %v7338_v33, %v5625_v55  ;;  %v5781_v60 = vmax.f32 %v7335_v10, 0.0 }
 0x32f   : > { %v5784_v45 = vmax.f32 %v7337_v52, 0.0 }
 0x330   : > { %v5782_v26 = vmax.f32 %v7339_v48, 0.0  ;;  %v7356_v48 = vadd.f32 %v7108_v7, %v9653_v42 }
 0x331   : > { %v5814_v39 = vpack.c.bf16 %v5784_v45, %v5783_v23  ;;  %v7358_v23 = vadd.f32 %v9653_v42, %v3560_v12 }
 0x332   : > { %v5813_v41 = vpack.c.bf16 %v5782_v26, %v5781_v60  ;;  %v7270_v29 = vpop.f32.mrb[20].mxu1  ;;  %v7360_v60 = vadd.f32 %v9646_v21, %v9653_v42  ;;  %v7364_v21 = vadd.f32 %v9614_v6, %v9653_v42 }
 0x333   : > { %v7341_v35 = vadd.f32 %v7340_v15, %v7270_v29  ;;  %v5638_v16 = vpop.f32.mrb[21].mxu1 }
 0x334   : > { %v7343_v40 = vadd.f32 %v7342_v58, %v5638_v16  ;;  %v7271_v34 = vpop.f32.mrb[22].mxu1  ;;  %7298 = vmatprep.mubr.msk.bf16.mxu0 %vm10588_vm8, %v5813_v41  ;;  %vm6273_vm8 = vcmask 125952  }
 0x335   : > { %v7345_v51 = vadd.f32 %v7344_v36, %v7271_v34  ;;  %v5641_v13 = vpop.f32.mrb[23].mxu1  ;;  %7299 = vmatmul.mubr.msk.bf16.vlgmr.msra.gmra.mrb[64].mxu0 %vm10589_vm3, %v5814_v39  ;;  %v5787_v49 = vmax.f32 %v7341_v35, 0.0  ;;  %v7362_v39 = vadd.f32 %v9653_v42, %v9648_v19  ;;  %v7366_v19 = vadd.f32 %v9653_v42, %v9616_v31 }
 0x336   : > { %v7347_v9 = vadd.f32 %v7346_v47, %v5641_v13  ;;  %v5785_v46 = vmax.f32 %v7343_v40, 0.0  ;;  %v7368_v13 = vadd.f32 %v9618_v0, %v9653_v42  ;;  %v7372_v0 = vadd.f32 %v9622_v28, %v9653_v42 }
 0x337   : > { %v5788_v4 = vmax.f32 %v7345_v51, 0.0 }
 0x338   : > { %v5786_v27 = vmax.f32 %v7347_v9, 0.0 }
 0x339   : > { %v5816_v37 = vpack.c.bf16 %v5788_v4, %v5787_v49  ;;  %v7370_v4 = vadd.f32 %v9653_v42, %v9620_v44  ;;  %v7374_v44 = vadd.f32 %v9653_v42, %v9624_v25 }
 0x33a   : > { %v5815_v11 = vpack.c.bf16 %v5786_v27, %v5785_v46  ;;  %v7274_v32 = vpop.f32.mrb[24].mxu1 }
 0x33b   : > { %v7349_v57 = vadd.f32 %v7348_v59, %v7274_v32  ;;  %v5654_v20 = vpop.f32.mrb[25].mxu1 }
 0x33c   : > { %v7351_v22 = vadd.f32 %v7350_v38, %v5654_v20  ;;  %v7275_v50 = vpop.f32.mrb[26].mxu1  ;;  %7302 = vmatprep.mubr.msk.bf16.mxu0 %vm10590_vm11, %v5815_v11 }
 0x33d   : > { %v7353_v33 = vadd.f32 %v7352_v61, %v7275_v50  ;;  %v5657_v10 = vpop.f32.mrb[27].mxu1  ;;  %7303 = vmatmul.mubr.msk.bf16.gmra.mrb[68].mxu0 %vm10591_vm6, %v5816_v37  ;;  %v5791_v3 = vmax.f32 %v7349_v57, 0.0 }
 0x33e   : > { %v7355_v17 = vadd.f32 %v7354_v2, %v5657_v10  ;;  %v5789_v1 = vmax.f32 %v7351_v22, 0.0  ;;  %v7376_v2 = vadd.f32 %v9626_v62, %v9653_v42  ;;  %v7380_v62 = vadd.f32 %v9630_v54, %v9653_v42 }
 0x33f   : > { %v5792_v52 = vmax.f32 %v7353_v33, 0.0  ;;  %v7378_v33 = vadd.f32 %v9653_v42, %v9628_v8  ;;  %v7382_v8 = vadd.f32 %v9653_v42, %v9632_v18 }
 0x340   : > { %v5790_v55 = vmax.f32 %v7355_v17, 0.0 }
 0x341   : > { %v5818_v63 = vpack.c.bf16 %v5792_v52, %v5791_v3 }
 0x342   : > { %v5817_v45 = vpack.c.bf16 %v5790_v55, %v5789_v1  ;;  %v7278_v14 = vpop.f32.mrb[28].mxu1 }
 0x343   : > { %v7357_v26 = vadd.f32 %v7356_v48, %v7278_v14  ;;  %v5670_v15 = vpop.f32.mrb[29].mxu1  ;;  %v7384_v14 = vadd.f32 %v9634_v53, %v9653_v42  ;;  %v7388_v53 = vadd.f32 %v9638_v30, %v9653_v42 }
 0x344   : > { %v7359_v58 = vadd.f32 %v7358_v23, %v5670_v15  ;;  %v7279_v41 = vpop.f32.mrb[30].mxu1  ;;  %7306 = vmatprep.mubr.msk.bf16.mxu0 %vm10592_vm15, %v5817_v45  ;;  %v7386_v15 = vadd.f32 %v9653_v42, %v9636_v5  ;;  %v7390_v5 = vadd.f32 %v9653_v42, %v9640_v24 }
 0x345   : > { %v7361_v29 = vadd.f32 %v7360_v60, %v7279_v41  ;;  %v5673_v36 = vpop.f32.mrb[31].mxu1  ;;  %7307 = vmatmul.mubr.msk.bf16.gmra.mrb[72].mxu0 %vm10552_vm0, %v5818_v63  ;;  %v5795_v12 = vmax.f32 %v7357_v26, 0.0 }
 0x346   : > { %v7363_v7 = vadd.f32 %v7362_v39, %v5673_v36  ;;  %v5793_v16 = vmax.f32 %v7359_v58, 0.0 }
 0x347   : > { %v5796_v35 = vmax.f32 %v7361_v29, 0.0 }
 0x348   : > { %v5794_v47 = vmax.f32 %v7363_v7, 0.0 }
 0x349   : > { %v5820_v40 = vpack.c.bf16 %v5796_v35, %v5795_v12 }
 0x34a   : > { %v5819_v34 = vpack.c.bf16 %v5794_v47, %v5793_v16  ;;  %v7282_v51 = vpop.f32.mrb[0].mxu1 }
 0x34b   : > { %v7365_v9 = vadd.f32 %v7364_v21, %v7282_v51  ;;  %v5686_v49 = vpop.f32.mrb[1].mxu1  ;;  %v7392_v21 = vadd.f32 %v9642_v43, %v9653_v42 }
 0x34c   : > { %v7367_v46 = vadd.f32 %v7366_v19, %v5686_v49  ;;  %v7283_v27 = vpop.f32.mrb[2].mxu1  ;;  %7310 = vmatprep.mubr.msk.bf16.mxu0 %vm10593_vm10, %v5819_v34  ;;  %v7394_v34 = vadd.f32 %v9653_v42, %v9644_v56  ;;  %v9724_v56 = vld [vmem:[%s9854_s6] ss:$0 sm:$0xff]  ;;  %v7676_v42 = vld [vmem:[%s7762_s9 + $0x8] sm:$0xff]  }
 0x34d   : > { %v7369_v59 = vadd.f32 %v7368_v13, %v7283_v27  ;;  %v5689_v6 = vpop.f32.mrb[3].mxu1  ;;  %7311 = vmatmul.mubr.msk.bf16.gmra.mrb[76].mxu0 %vm10594_vm14, %v5820_v40  ;;  %v5799_v31 = vmax.f32 %v7365_v9, 0.0 }
 0x34e   : > { %v7371_v37 = vadd.f32 %v7370_v4, %v5689_v6  ;;  %v5797_v11 = vmax.f32 %v7367_v46, 0.0  ;;  %v6051_v6 = vunpack.c.l.bf16 %v7676_v42 }
 0x34f   : > { %v5800_v38 = vmax.f32 %v7369_v59, 0.0 }
 0x350   : > { %v5798_v32 = vmax.f32 %v7371_v37, 0.0  ;;  %v7677_v37 = vld [vmem:[%s7762_s9] sm:$0xff]  }
 0x351   : > { %v5822_v61 = vpack.c.bf16 %v5800_v38, %v5799_v31  ;;  %v6049_v31 = vunpack.c.l.bf16 %v7677_v37 }
 0x352   : > { %v5821_v57 = vpack.c.bf16 %v5798_v32, %v5797_v11  ;;  %v7286_v20 = vpop.f32.mrb[4].mxu1 }
 0x353   : > { %v7373_v22 = vadd.f32 %v7372_v0, %v7286_v20  ;;  %v5702_v50 = vpop.f32.mrb[5].mxu1  ;;  %v6052_v0 = vunpack.c.h.bf16 %v7676_v42 }
 0x354   : > { %v7375_v10 = vadd.f32 %v7374_v44, %v5702_v50  ;;  %v7287_v17 = vpop.f32.mrb[6].mxu1  ;;  %7314 = vmatprep.mubr.msk.bf16.mxu0 %vm10595_vm1, %v5821_v57 }
 0x355   : > { %v7377_v3 = vadd.f32 %v7376_v2, %v7287_v17  ;;  %v5705_v28 = vpop.f32.mrb[7].mxu1  ;;  %7315 = vmatmul.mubr.msk.bf16.gmra.mrb[80].mxu0 %vm10596_vm5, %v5822_v61  ;;  %v5803_v25 = vmax.f32 %v7373_v22, 0.0  ;;  %v6050_v61 = vunpack.c.h.bf16 %v7677_v37 }
 0x356   : > { %v7379_v52 = vadd.f32 %v7378_v33, %v5705_v28  ;;  %v5801_v55 = vmax.f32 %v7375_v10, 0.0 }
 0x357   : > { %v5804_v1 = vmax.f32 %v7377_v3, 0.0 }
 0x358   : > { %v5802_v48 = vmax.f32 %v7379_v52, 0.0 }
 0x359   : > { %v5824_v63 = vpack.c.bf16 %v5804_v1, %v5803_v25  ;;  %v7678_v1 = vld [vmem:[%s7762_s9 + $0x18] sm:$0xff]  }
 0x35a   : > { %v5823_v23 = vpack.c.bf16 %v5802_v48, %v5801_v55  ;;  %v7290_v45 = vpop.f32.mrb[8].mxu1  ;;  %v6055_v55 = vunpack.c.l.bf16 %v7678_v1 }
 0x35b   : > { %v7381_v60 = vadd.f32 %v7380_v62, %v7290_v45  ;;  %v5718_v26 = vpop.f32.mrb[9].mxu1 }
 0x35c   : > { %v7383_v39 = vadd.f32 %v7382_v8, %v5718_v26  ;;  %v7291_v58 = vpop.f32.mrb[10].mxu1  ;;  %7318 = vmatprep.mubr.msk.bf16.mxu0 %vm10597_vm2, %v5823_v23  ;;  %v7679_v8 = vld [vmem:[%s7762_s9 + $0x10] sm:$0xff]   ;;  %v6056_v26 = vunpack.c.h.bf16 %v7678_v1 }
 0x35d   : > { %v7385_v41 = vadd.f32 %v7384_v14, %v7291_v58  ;;  %v5721_v54 = vpop.f32.mrb[11].mxu1  ;;  %7319 = vmatmul.mubr.msk.bf16.gmra.mrb[84].mxu0 %vm10598_vm9, %v5824_v63  ;;  %v5807_v18 = vmax.f32 %v7381_v60, 0.0  ;;  %v6053_v23 = vunpack.c.l.bf16 %v7679_v8 }
 0x35e   : > { %v7387_v29 = vadd.f32 %v7386_v15, %v5721_v54  ;;  %v5805_v7 = vmax.f32 %v7383_v39, 0.0 }
 0x35f   : > { %v5808_v36 = vmax.f32 %v7385_v41, 0.0  ;;  %v6054_v41 = vunpack.c.h.bf16 %v7679_v8 }
 0x360   : > { %v5806_v12 = vmax.f32 %v7387_v29, 0.0 }
 0x361   : > { %v5826_v35 = vpack.c.bf16 %v5808_v36, %v5807_v18 }
 0x362   : > { %v5825_v16 = vpack.c.bf16 %v5806_v12, %v5805_v7  ;;  %v7294_v47 = vpop.f32.mrb[12].mxu1 }
 0x363   : > { %v7389_v40 = vadd.f32 %v7388_v53, %v7294_v47  ;;  %v5734_v19 = vpop.f32.mrb[13].mxu1 }
 0x364   : > { %v7391_v51 = vadd.f32 %v7390_v5, %v5734_v19  ;;  %v7295_v13 = vpop.f32.mrb[14].mxu1  ;;  %7322 = vmatprep.mubr.msk.bf16.mxu0 %vm10599_vm13, %v5825_v16 }
 0x365   : > { %v7393_v30 = vadd.f32 %v7392_v21, %v7295_v13  ;;  %v5737_v9 = vpop.f32.mrb[15].mxu1  ;;  %7323 = vmatmul.mubr.msk.bf16.gmra.mrb[88].mxu0 %vm10600_vm12, %v5826_v35  ;;  %v5811_v49 = vmax.f32 %v7389_v40, 0.0  ;;  %v7680_v21 = vld [vmem:[%s7762_s9 + $0x28] sm:$0xff]   ;;  %v7681_v13 = vld [vmem:[%s7762_s9 + $0x20] sm:$0xff]  }
 0x366   : > { %v7395_v24 = vadd.f32 %v7394_v34, %v5737_v9  ;;  %v5809_v46 = vmax.f32 %v7391_v51, 0.0  ;;  %v6059_v40 = vunpack.c.l.bf16 %v7680_v21 }
 0x367   : > { %v5812_v4 = vmax.f32 %v7393_v30, 0.0  ;;  %v6057_v30 = vunpack.c.l.bf16 %v7681_v13 }
 0x368   : > { %v5810_v43 = vmax.f32 %v7395_v24, 0.0 }
 0x369   : > { %v5828_v27 = vpack.c.bf16 %v5812_v4, %v5811_v49  ;;  %v6060_v4 = vunpack.c.h.bf16 %v7680_v21 }
 0x36a   : > { %v5827_v59 = vpack.c.bf16 %v5810_v43, %v5809_v46 }
 0x36c   : > { %7326 = vmatprep.mubr.msk.bf16.mxu0 %vm10601_vm4, %v5827_v59  ;;  %v6058_v59 = vunpack.c.h.bf16 %v7681_v13 }
 0x36d   : > { %7327 = vmatmul.mubr.msk.bf16.gmra.mrb[92].mxu0 %vm10602_vm7, %v5828_v27 }
 0x408   : > { %v7300_v38 = vpop.f32.mrb[64].mxu0 }
 0x409   : > { %v5931_v11 = vadd.f32 %v7300_v38, %v9724_v56  ;;  %v5922_v32 = vpop.f32.mrb[65].mxu0 }
 0x40a   : > { %v5923_v44 = vadd.f32 %v9724_v56, %v5922_v32  ;;  %v7301_v57 = vpop.f32.mrb[66].mxu0 }
 0x40b   : > { %v6083_v20 = vadd.f32 %v6051_v6, %v5931_v11  ;;  %v5934_v2 = vadd.f32 %v7301_v57, %v9724_v56  ;;  %v5925_v22 = vpop.f32.mrb[67].mxu0 }
 0x40c   : > { %v6081_v50 = vadd.f32 %v6049_v31, %v5923_v44  ;;  %v5926_v33 = vadd.f32 %v9724_v56, %v5925_v22 }
 0x40d   : > { %v6115_v10 = vmax.f32 %v6083_v20, 0.0  ;;  %v6084_v17 = vadd.f32 %v6052_v0, %v5934_v2  ;;  %v7682_v20 = vld [vmem:[%s7762_s9 + $0x38] sm:$0xff]  }
 0x40e   : > { %v6113_v3 = vmax.f32 %v6081_v50, 0.0  ;;  %v6082_v28 = vadd.f32 %v6050_v61, %v5926_v33  ;;  %v6063_v2 = vunpack.c.l.bf16 %v7682_v20 }
 0x40f   : > { %v6739_v52 = vpack.c.bf16 %v6115_v10, %v6115_v10  ;;  %v6116_v25 = vmax.f32 %v6084_v17, 0.0  ;;  %v7683_v10 = vld [vmem:[%s7762_s9 + $0x30] sm:$0xff]  }
 0x410   : > { %v6737_v48 = vpack.c.bf16 %v6113_v3, %v6113_v3  ;;  %v6114_v62 = vmax.f32 %v6082_v28, 0.0  ;;  %v7304_v63 = vpop.f32.mrb[68].mxu0  ;;  %v6061_v17 = vunpack.c.l.bf16 %v7683_v10 }
 0x411   : > { %6276 = vst.msk [vmem:[%s9737_s21 + $0x8] sm:$0xf] %vm6273_vm8, %v6739_v52  ;;  %v6740_v45 = vpack.c.bf16 %v6116_v25, %v6116_v25  ;;  %v5947_v14 = vadd.f32 %v7304_v63, %v9724_v56  ;;  %v5938_v60 = vpop.f32.mrb[69].mxu0  ;;  %v6064_v25 = vunpack.c.h.bf16 %v7682_v20 }
 0x412   : > { %6274 = vst.msk [vmem:[%s9737_s21] sm:$0xf] %vm6273_vm8, %v6737_v48  ;;  %v6738_v15 = vpack.c.bf16 %v6114_v62, %v6114_v62  ;;  %v5939_v39 = vadd.f32 %v9724_v56, %v5938_v60  ;;  %v7305_v58 = vpop.f32.mrb[70].mxu0  ;;  %v6062_v62 = vunpack.c.h.bf16 %v7683_v10 }
 0x413   : > { %6277 = vst.msk [vmem:[%s9737_s21 + $0xc] sm:$0xf] %vm6273_vm8, %v6740_v45  ;;  %v6087_v54 = vadd.f32 %v6055_v55, %v5947_v14  ;;  %v5950_v29 = vadd.f32 %v7305_v58, %v9724_v56  ;;  %v5941_v18 = vpop.f32.mrb[71].mxu0 }
 0x414   : > { %6275 = vst.msk [vmem:[%s9737_s21 + $0x4] sm:$0xf] %vm6273_vm8, %v6738_v15  ;;  %v6085_v36 = vadd.f32 %v6053_v23, %v5939_v39  ;;  %v5942_v7 = vadd.f32 %v9724_v56, %v5941_v18 }
 0x415   : > { %v6119_v12 = vmax.f32 %v6087_v54, 0.0  ;;  %v6088_v53 = vadd.f32 %v6056_v26, %v5950_v29  ;;  %v7684_v54 = vld [vmem:[%s7762_s9 + $0x48] sm:$0xff]  }
 0x416   : > { %v6117_v35 = vmax.f32 %v6085_v36, 0.0  ;;  %v6086_v5 = vadd.f32 %v6054_v41, %v5942_v7  ;;  %v6067_v29 = vunpack.c.l.bf16 %v7684_v54 }
 0x417   : > { %v6743_v16 = vpack.c.bf16 %v6119_v12, %v6119_v12  ;;  %v6120_v47 = vmax.f32 %v6088_v53, 0.0  ;;  %v7685_v12 = vld [vmem:[%s7762_s9 + $0x40] sm:$0xff]  }
 0x418   : > { %v6741_v19 = vpack.c.bf16 %v6117_v35, %v6117_v35  ;;  %v6118_v34 = vmax.f32 %v6086_v5, 0.0  ;;  %v7308_v51 = vpop.f32.mrb[72].mxu0  ;;  %v6065_v53 = vunpack.c.l.bf16 %v7685_v12 }
 0x419   : > { %6280 = vst.msk [vmem:[%s9737_s21 + $0x18] sm:$0xf] %vm6273_vm8, %v6743_v16  ;;  %v6744_v9 = vpack.c.bf16 %v6120_v47, %v6120_v47  ;;  %v5963_v24 = vadd.f32 %v7308_v51, %v9724_v56  ;;  %v5954_v49 = vpop.f32.mrb[73].mxu0  ;;  %v6068_v47 = vunpack.c.h.bf16 %v7684_v54 }
 0x41a   : > { %6278 = vst.msk [vmem:[%s9737_s21 + $0x10] sm:$0xf] %vm6273_vm8, %v6741_v19  ;;  %v6742_v46 = vpack.c.bf16 %v6118_v34, %v6118_v34  ;;  %v5955_v43 = vadd.f32 %v9724_v56, %v5954_v49  ;;  %v7309_v27 = vpop.f32.mrb[74].mxu0  ;;  %v6066_v34 = vunpack.c.h.bf16 %v7685_v12 }
 0x41b   : > { %6281 = vst.msk [vmem:[%s9737_s21 + $0x1c] sm:$0xf] %vm6273_vm8, %v6744_v9  ;;  %v6091_v42 = vadd.f32 %v6059_v40, %v5963_v24  ;;  %v5966_v6 = vadd.f32 %v7309_v27, %v9724_v56  ;;  %v5957_v37 = vpop.f32.mrb[75].mxu0 }
 0x41c   : > { %6279 = vst.msk [vmem:[%s9737_s21 + $0x14] sm:$0xf] %vm6273_vm8, %v6742_v46  ;;  %v6089_v31 = vadd.f32 %v6057_v30, %v5955_v43  ;;  %v5958_v38 = vadd.f32 %v9724_v56, %v5957_v37 }
 0x41d   : > { %v6123_v11 = vmax.f32 %v6091_v42, 0.0  ;;  %v6092_v32 = vadd.f32 %v6060_v4, %v5966_v6  ;;  %v7686_v42 = vld [vmem:[%s7762_s9 + $0x58] sm:$0xff]  }
 0x41e   : > { %v6121_v0 = vmax.f32 %v6089_v31, 0.0  ;;  %v6090_v61 = vadd.f32 %v6058_v59, %v5958_v38  ;;  %v6071_v6 = vunpack.c.l.bf16 %v7686_v42 }
 0x41f   : > { %v6747_v44 = vpack.c.bf16 %v6123_v11, %v6123_v11  ;;  %v6124_v57 = vmax.f32 %v6092_v32, 0.0  ;;  %v7687_v11 = vld [vmem:[%s7762_s9 + $0x50] sm:$0xff]  }
 0x420   : > { %v6745_v22 = vpack.c.bf16 %v6121_v0, %v6121_v0  ;;  %v6122_v50 = vmax.f32 %v6090_v61, 0.0  ;;  %v7312_v33 = vpop.f32.mrb[76].mxu0  ;;  %v6069_v32 = vunpack.c.l.bf16 %v7687_v11 }
 0x421   : > { %6284 = vst.msk [vmem:[%s9737_s21 + $0x28] sm:$0xf] %vm6273_vm8, %v6747_v44  ;;  %v6748_v3 = vpack.c.bf16 %v6124_v57, %v6124_v57  ;;  %v5979_v28 = vadd.f32 %v7312_v33, %v9724_v56  ;;  %v5970_v52 = vpop.f32.mrb[77].mxu0  ;;  %v6072_v57 = vunpack.c.h.bf16 %v7686_v42 }
 0x422   : > { %6282 = vst.msk [vmem:[%s9737_s21 + $0x20] sm:$0xf] %vm6273_vm8, %v6745_v22  ;;  %v6746_v1 = vpack.c.bf16 %v6122_v50, %v6122_v50  ;;  %v5971_v55 = vadd.f32 %v9724_v56, %v5970_v52  ;;  %v7313_v48 = vpop.f32.mrb[78].mxu0  ;;  %v6070_v50 = vunpack.c.h.bf16 %v7687_v11 }
 0x423   : > { %6285 = vst.msk [vmem:[%s9737_s21 + $0x2c] sm:$0xf] %vm6273_vm8, %v6748_v3  ;;  %v6095_v63 = vadd.f32 %v6063_v2, %v5979_v28  ;;  %v5982_v8 = vadd.f32 %v7313_v48, %v9724_v56  ;;  %v5973_v23 = vpop.f32.mrb[79].mxu0 }
 0x424   : > { %6283 = vst.msk [vmem:[%s9737_s21 + $0x24] sm:$0xf] %vm6273_vm8, %v6746_v1  ;;  %v6093_v45 = vadd.f32 %v6061_v17, %v5971_v55  ;;  %v5974_v14 = vadd.f32 %v9724_v56, %v5973_v23 }
 0x425   : > { %v6127_v60 = vmax.f32 %v6095_v63, 0.0  ;;  %v6096_v26 = vadd.f32 %v6064_v25, %v5982_v8  ;;  %v7688_v63 = vld [vmem:[%s7762_s9 + $0x68] sm:$0xff]  }
 0x426   : > { %v6125_v15 = vmax.f32 %v6093_v45, 0.0  ;;  %v6094_v39 = vadd.f32 %v6062_v62, %v5974_v14  ;;  %v6075_v8 = vunpack.c.l.bf16 %v7688_v63 }
 0x427   : > { %v6751_v58 = vpack.c.bf16 %v6127_v60, %v6127_v60  ;;  %v6128_v41 = vmax.f32 %v6096_v26, 0.0  ;;  %v7689_v60 = vld [vmem:[%s7762_s9 + $0x60] sm:$0xff]  }
 0x428   : > { %v6749_v18 = vpack.c.bf16 %v6125_v15, %v6125_v15  ;;  %v6126_v36 = vmax.f32 %v6094_v39, 0.0  ;;  %v7316_v7 = vpop.f32.mrb[80].mxu0  ;;  %v6073_v26 = vunpack.c.l.bf16 %v7689_v60 }
 0x429   : > { %6288 = vst.msk [vmem:[%s9737_s21 + $0x38] sm:$0xf] %vm6273_vm8, %v6751_v58  ;;  %v6752_v35 = vpack.c.bf16 %v6128_v41, %v6128_v41  ;;  %v5995_v5 = vadd.f32 %v7316_v7, %v9724_v56  ;;  %v5986_v16 = vpop.f32.mrb[81].mxu0  ;;  %v6076_v41 = vunpack.c.h.bf16 %v7688_v63 }
 0x42a   : > { %6286 = vst.msk [vmem:[%s9737_s21 + $0x30] sm:$0xf] %vm6273_vm8, %v6749_v18  ;;  %v6750_v21 = vpack.c.bf16 %v6126_v36, %v6126_v36  ;;  %v5987_v40 = vadd.f32 %v9724_v56, %v5986_v16  ;;  %v7317_v19 = vpop.f32.mrb[82].mxu0  ;;  %v6074_v36 = vunpack.c.h.bf16 %v7689_v60 }
 0x42b   : > { %6289 = vst.msk [vmem:[%s9737_s21 + $0x3c] sm:$0xf] %vm6273_vm8, %v6752_v35  ;;  %v6099_v51 = vadd.f32 %v6067_v29, %v5995_v5  ;;  %v5998_v13 = vadd.f32 %v7317_v19, %v9724_v56  ;;  %v5989_v30 = vpop.f32.mrb[83].mxu0 }
 0x42c   : > { %6287 = vst.msk [vmem:[%s9737_s21 + $0x34] sm:$0xf] %vm6273_vm8, %v6750_v21  ;;  %v6097_v9 = vadd.f32 %v6065_v53, %v5987_v40  ;;  %v5990_v24 = vadd.f32 %v9724_v56, %v5989_v30 }
 0x42d   : > { %v6131_v49 = vmax.f32 %v6099_v51, 0.0  ;;  %v6100_v4 = vadd.f32 %v6068_v47, %v5998_v13  ;;  %v7690_v51 = vld [vmem:[%s7762_s9 + $0x78] sm:$0xff]  }
 0x42e   : > { %v6129_v46 = vmax.f32 %v6097_v9, 0.0  ;;  %v6098_v43 = vadd.f32 %v6066_v34, %v5990_v24  ;;  %v6079_v13 = vunpack.c.l.bf16 %v7690_v51 }
 0x42f   : > { %v6755_v27 = vpack.c.bf16 %v6131_v49, %v6131_v49  ;;  %v6132_v59 = vmax.f32 %v6100_v4, 0.0  ;;  %v7691_v49 = vld [vmem:[%s7762_s9 + $0x70] sm:$0xff]  }
 0x430   : > { %v6753_v37 = vpack.c.bf16 %v6129_v46, %v6129_v46  ;;  %v6130_v31 = vmax.f32 %v6098_v43, 0.0  ;;  %v7320_v38 = vpop.f32.mrb[84].mxu0  ;;  %v6077_v4 = vunpack.c.l.bf16 %v7691_v49 }
 0x431   : > { %6292 = vst.msk [vmem:[%s9737_s21 + $0x48] sm:$0xf] %vm6273_vm8, %v6755_v27  ;;  %v6756_v0 = vpack.c.bf16 %v6132_v59, %v6132_v59  ;;  %v6011_v61 = vadd.f32 %v7320_v38, %v9724_v56  ;;  %v6002_v44 = vpop.f32.mrb[85].mxu0  ;;  %v6080_v59 = vunpack.c.h.bf16 %v7690_v51 }
 0x432   : > { %6290 = vst.msk [vmem:[%s9737_s21 + $0x40] sm:$0xf] %vm6273_vm8, %v6753_v37  ;;  %v6754_v20 = vpack.c.bf16 %v6130_v31, %v6130_v31  ;;  %v6003_v2 = vadd.f32 %v9724_v56, %v6002_v44  ;;  %v7321_v22 = vpop.f32.mrb[86].mxu0  ;;  %v6078_v31 = vunpack.c.h.bf16 %v7691_v49 }
 0x433   : > { %6293 = vst.msk [vmem:[%s9737_s21 + $0x4c] sm:$0xf] %vm6273_vm8, %v6756_v0  ;;  %v6103_v33 = vadd.f32 %v6071_v6, %v6011_v61  ;;  %v6014_v10 = vadd.f32 %v7321_v22, %v9724_v56  ;;  %v6005_v17 = vpop.f32.mrb[87].mxu0 }
 0x434   : > { %6291 = vst.msk [vmem:[%s9737_s21 + $0x44] sm:$0xf] %vm6273_vm8, %v6754_v20  ;;  %v6101_v3 = vadd.f32 %v6069_v32, %v6003_v2  ;;  %v6006_v28 = vadd.f32 %v9724_v56, %v6005_v17 }
 0x435   : > { %v6135_v52 = vmax.f32 %v6103_v33, 0.0  ;;  %v6104_v25 = vadd.f32 %v6072_v57, %v6014_v10 }
 0x436   : > { %v6133_v1 = vmax.f32 %v6101_v3, 0.0  ;;  %v6102_v55 = vadd.f32 %v6070_v50, %v6006_v28 }
 0x437   : > { %v6759_v48 = vpack.c.bf16 %v6135_v52, %v6135_v52  ;;  %v6136_v62 = vmax.f32 %v6104_v25, 0.0 }
 0x438   : > { %v6757_v23 = vpack.c.bf16 %v6133_v1, %v6133_v1  ;;  %v6134_v45 = vmax.f32 %v6102_v55, 0.0  ;;  %v7324_v14 = vpop.f32.mrb[88].mxu0 }
 0x439   : > { %6296 = vst.msk [vmem:[%s9737_s21 + $0x58] sm:$0xf] %vm6273_vm8, %v6759_v48  ;;  %v6760_v15 = vpack.c.bf16 %v6136_v62, %v6136_v62  ;;  %v6027_v39 = vadd.f32 %v7324_v14, %v9724_v56  ;;  %v6018_v58 = vpop.f32.mrb[89].mxu0 }
 0x43a   : > { %6294 = vst.msk [vmem:[%s9737_s21 + $0x50] sm:$0xf] %vm6273_vm8, %v6757_v23  ;;  %v6758_v54 = vpack.c.bf16 %v6134_v45, %v6134_v45  ;;  %v6019_v29 = vadd.f32 %v9724_v56, %v6018_v58  ;;  %v7325_v18 = vpop.f32.mrb[90].mxu0 }
 0x43b   : > { %6297 = vst.msk [vmem:[%s9737_s21 + $0x5c] sm:$0xf] %vm6273_vm8, %v6760_v15  ;;  %v6107_v7 = vadd.f32 %v6075_v8, %v6027_v39  ;;  %v6030_v12 = vadd.f32 %v7325_v18, %v9724_v56  ;;  %v6021_v53 = vpop.f32.mrb[91].mxu0 }
 0x43c   : > { %6295 = vst.msk [vmem:[%s9737_s21 + $0x54] sm:$0xf] %vm6273_vm8, %v6758_v54  ;;  %v6105_v35 = vadd.f32 %v6073_v26, %v6019_v29  ;;  %v6022_v5 = vadd.f32 %v9724_v56, %v6021_v53 }
 0x43d   : > { %v6139_v16 = vmax.f32 %v6107_v7, 0.0  ;;  %v6108_v47 = vadd.f32 %v6076_v41, %v6030_v12 }
 0x43e   : > { %v6137_v21 = vmax.f32 %v6105_v35, 0.0  ;;  %v6106_v40 = vadd.f32 %v6074_v36, %v6022_v5 }
 0x43f   : > { %v6763_v19 = vpack.c.bf16 %v6139_v16, %v6139_v16  ;;  %v6140_v34 = vmax.f32 %v6108_v47, 0.0 }
 0x440   : > { %v6761_v30 = vpack.c.bf16 %v6137_v21, %v6137_v21  ;;  %v6138_v9 = vmax.f32 %v6106_v40, 0.0  ;;  %v7328_v24 = vpop.f32.mrb[92].mxu0 }
 0x441   : > { %6300 = vst.msk [vmem:[%s9737_s21 + $0x68] sm:$0xf] %vm6273_vm8, %v6763_v19  ;;  %v6764_v46 = vpack.c.bf16 %v6140_v34, %v6140_v34  ;;  %v6043_v43 = vadd.f32 %v7328_v24, %v9724_v56  ;;  %v6034_v27 = vpop.f32.mrb[93].mxu0 }
 0x442   : > { %6298 = vst.msk [vmem:[%s9737_s21 + $0x60] sm:$0xf] %vm6273_vm8, %v6761_v30  ;;  %v6762_v42 = vpack.c.bf16 %v6138_v9, %v6138_v9  ;;  %v6035_v6 = vadd.f32 %v9724_v56, %v6034_v27  ;;  %v7329_v37 = vpop.f32.mrb[94].mxu0 }
 0x443   : > { %6301 = vst.msk [vmem:[%s9737_s21 + $0x6c] sm:$0xf] %vm6273_vm8, %v6764_v46  ;;  %v6111_v38 = vadd.f32 %v6079_v13, %v6043_v43  ;;  %v6046_v11 = vadd.f32 %v7329_v37, %v9724_v56  ;;  %v6037_v32 = vpop.f32.mrb[95].mxu0 }
 0x444   : > { %6299 = vst.msk [vmem:[%s9737_s21 + $0x64] sm:$0xf] %vm6273_vm8, %v6762_v42  ;;  %v6109_v0 = vadd.f32 %v6077_v4, %v6035_v6  ;;  %v6038_v61 = vadd.f32 %v9724_v56, %v6037_v32 }
 0x445   : > { %v6143_v44 = vmax.f32 %v6111_v38, 0.0  ;;  %v6112_v57 = vadd.f32 %v6080_v59, %v6046_v11 }
 0x446   : > { %v6141_v20 = vmax.f32 %v6109_v0, 0.0  ;;  %v6110_v2 = vadd.f32 %v6078_v31, %v6038_v61 }
 0x447   : > { %v6767_v22 = vpack.c.bf16 %v6143_v44, %v6143_v44  ;;  %v6144_v50 = vmax.f32 %v6112_v57, 0.0 }
 0x448   : > { %v6765_v33 = vpack.c.bf16 %v6141_v20, %v6141_v20  ;;  %v6142_v10 = vmax.f32 %v6110_v2, 0.0 }
 0x449   : > { %6304 = vst.msk [vmem:[%s9737_s21 + $0x78] sm:$0xf] %vm6273_vm8, %v6767_v22  ;;  %v6768_v17 = vpack.c.bf16 %v6144_v50, %v6144_v50 }
 0x44a   : > { %6302 = vst.msk [vmem:[%s9737_s21 + $0x70] sm:$0xf] %vm6273_vm8, %v6765_v33  ;;  %v6766_v3 = vpack.c.bf16 %v6142_v10, %v6142_v10 }
 0x44b   : > { %6305 = vst.msk [vmem:[%s9737_s21 + $0x7c] sm:$0xf] %vm6273_vm8, %v6768_v17 }
 0x44c   : > { %6303 = vst.msk [vmem:[%s9737_s21 + $0x74] sm:$0xf] %vm6273_vm8, %v6766_v3 }
 0x44d PF: > { %s17_s24 = sadd.s32 1, %s7698_s24  }
 0x44e   : > { %p14_p4 = scmp.ge.s32.totalorder %s17_s24, 6  }
 0x450   :  { %16 = sbr.rel (!%p14_p4) target bundleno = 1 (0x1), region = 86 }

</bundles_post_ra>
